<compile_context>
chip_gen: v5e
topology: v5e:2x2
jax: 0.10.0
libtpu: 0.0.40
codegen_flags: <defaults>
</compile_context>

<pallas_src>
import math
import jax
import jax.numpy as jnp
from jax import lax
from jax.experimental import pallas as pl
from jax.experimental.pallas import tpu as pltpu

BN_EPS = 1e-5
BN_SCALE = 1.0 / math.sqrt(1.0 + BN_EPS)   # eval BatchNorm with mean=0, var=1, gamma=1, beta=0
VMEM_LIMIT = 32 * 1024 * 1024              # <= half of v7x physical VMEM; plenty everywhere


def _round_up(x, m):
    return ((x + m - 1) // m) * m


# ----------------------------------------------------------------------------
# Kernel 1: fused matmul + per-output-column affine + optional LeakyReLU
# ----------------------------------------------------------------------------
def _matmul_kernel_single(leaky):
    def kernel(a_ref, b_ref, scale_ref, shift_ref, o_ref):
        y = jnp.dot(a_ref[...], b_ref[...], preferred_element_type=jnp.float32)
        y = y * scale_ref[...] + shift_ref[...]
        if leaky is not None:
            y = jnp.where(y >= 0, y, leaky * y)
        o_ref[...] = y.astype(o_ref.dtype)
    return kernel


def _matmul_kernel_multi(leaky):
    def kernel(a_ref, b_ref, scale_ref, shift_ref, o_ref, acc_ref):
        k = pl.program_id(2)

        @pl.when(k == 0)
        def _():
            acc_ref[...] = jnp.zeros_like(acc_ref)

        acc_ref[...] += jnp.dot(a_ref[...], b_ref[...],
                                preferred_element_type=jnp.float32)

        @pl.when(k == pl.num_programs(2) - 1)
        def _():
            y = acc_ref[...] * scale_ref[...] + shift_ref[...]
            if leaky is not None:
                y = jnp.where(y >= 0, y, leaky * y)
            o_ref[...] = y.astype(o_ref.dtype)
    return kernel


def matmul_affine(a, b, scale, shift, leaky=None, out_dtype=jnp.float32):
    """out = act((a @ b) * scale + shift); bf16 operands, f32 accumulation."""
    M, K = a.shape
    K2, N = b.shape
    assert K == K2

    # Lane-dense output: pad N to at least 128.
    Np = _round_up(N, 128)
    if Np <= 512:
        tn = Np
    else:
        Np = _round_up(Np, 512)
        tn = 512

    # Single K step for every layer in this model (max K = 1600).
    if K <= 2048:
        tk, Kp = K, K
    else:
        tk = 2048
        Kp = _round_up(K, tk)

    tm_cap = 2048 if Kp <= 256 else (1024 if Kp <= 640 else 512)
    tm = min(tm_cap, _round_up(M, 8))
    Mp = _round_up(M, tm)

    a_p = a.astype(jnp.bfloat16)
    if (Mp, Kp) != (M, K):
        a_p = jnp.pad(a_p, ((0, Mp - M), (0, Kp - K)))
    b_p = b.astype(jnp.bfloat16)
    if (Kp, Np) != (K, N):
        b_p = jnp.pad(b_p, ((0, Kp - K), (0, Np - N)))
    scale_p = scale.reshape(1, N).astype(jnp.float32)
    shift_p = shift.reshape(1, N).astype(jnp.float32)
    if Np != N:
        scale_p = jnp.pad(scale_p, ((0, 0), (0, Np - N)))
        shift_p = jnp.pad(shift_p, ((0, 0), (0, Np - N)))

    nk = Kp // tk
    if nk == 1:
        out = pl.pallas_call(
            _matmul_kernel_single(leaky),
            out_shape=jax.ShapeDtypeStruct((Mp, Np), out_dtype),
            grid_spec=pltpu.PrefetchScalarGridSpec(
                num_scalar_prefetch=0,
                grid=(Mp // tm, Np // tn),
                in_specs=[
                    pl.BlockSpec((tm, tk), lambda i, j: (i, 0)),
                    pl.BlockSpec((tk, tn), lambda i, j: (0, j)),
                    pl.BlockSpec((1, tn), lambda i, j: (0, j)),
                    pl.BlockSpec((1, tn), lambda i, j: (0, j)),
                ],
                out_specs=pl.BlockSpec((tm, tn), lambda i, j: (i, j)),
            ),
            compiler_params=pltpu.CompilerParams(
                dimension_semantics=("parallel", "parallel"),
                vmem_limit_bytes=VMEM_LIMIT),
        )(a_p, b_p, scale_p, shift_p)
    else:
        out = pl.pallas_call(
            _matmul_kernel_multi(leaky),
            out_shape=jax.ShapeDtypeStruct((Mp, Np), out_dtype),
            grid_spec=pltpu.PrefetchScalarGridSpec(
                num_scalar_prefetch=0,
                grid=(Mp // tm, Np // tn, nk),
                in_specs=[
                    pl.BlockSpec((tm, tk), lambda i, j, k: (i, k)),
                    pl.BlockSpec((tk, tn), lambda i, j, k: (k, j)),
                    pl.BlockSpec((1, tn), lambda i, j, k: (0, j)),
                    pl.BlockSpec((1, tn), lambda i, j, k: (0, j)),
                ],
                out_specs=pl.BlockSpec((tm, tn), lambda i, j, k: (i, j)),
                scratch_shapes=[pltpu.VMEM((tm, tn), jnp.float32)],
            ),
            compiler_params=pltpu.CompilerParams(
                dimension_semantics=("parallel", "parallel", "arbitrary"),
                vmem_limit_bytes=VMEM_LIMIT),
        )(a_p, b_p, scale_p, shift_p)
    if (Mp, Np) != (M, N):
        out = out[:M, :N]
    return out


# ----------------------------------------------------------------------------
# Kernel 2: tap-decomposed conv with row batching (R output rows per grid step)
# ----------------------------------------------------------------------------
def _conv_tap_kernel(KH, KW, SW, OW_pad, leaky):
    def kernel(a_ref, b_ref, scale_ref, shift_ref, o_ref):
        R = a_ref.shape[0]
        cin = a_ref.shape[-1]
        acc = None
        for i in range(KH):
            for j in range(KW):
                pj, dw = j % SW, j // SW
                a = a_ref[:, i * SW + pj, dw:dw + OW_pad, :]        # (R, OW_pad, Cin)
                a = a.reshape(R * OW_pad, cin)
                p = jnp.dot(a, b_ref[i * KW + j],
                            preferred_element_type=jnp.float32)
                acc = p if acc is None else acc + p
        y = acc * scale_ref[...] + shift_ref[...]
        if leaky is not None:
            y = jnp.where(y >= 0, y, leaky * y)
        o_ref[...] = y.reshape(o_ref.shape).astype(o_ref.dtype)
    return kernel


def conv2d_direct(x, w, scale, shift, stride, padding, leaky, out_dtype=jnp.bfloat16):
    """x: (N,H,W,Cin), w: (KH,KW,Cin,Cout) -> (N,OH,OW,Cout). bf16 MXU, f32 accum."""
    N, H, W, Cin = x.shape
    KH, KW, _, Cout = w.shape
    sh, sw = stride
    ph, pw = padding
    OH = (H + 2 * ph - KH) // sh + 1
    OW = (W + 2 * pw - KW) // sw + 1
    OW_pad = _round_up(OW, 16)                 # bf16 sublane packing
    DW = (KW - 1) // sw
    PW = OW_pad + DW

    Hp = H + 2 * ph
    Wp = max(W + 2 * pw, sw * PW)
    xpad = jnp.pad(x.astype(jnp.bfloat16),
                   ((0, 0), (ph, Hp - H - ph), (pw, Wp - W - pw), (0, 0)))

    # Kernel-row / W-phase slabs (only used for the small deep feature maps; the big stride-1
    # fusion conv uses the dedicated no-slab kernel below).
    slabs = []
    for i in range(KH):
        row = lax.slice_in_dim(xpad, i, i + sh * (OH - 1) + 1, stride=sh, axis=1)
        for pj in range(sw):
            slabs.append(lax.slice_in_dim(row, pj, pj + sw * (PW - 1) + 1,
                                          stride=sw, axis=2))
    xs = jnp.stack(slabs, axis=2).reshape(N * OH, KH * sw, PW, Cin)

    # Row batching: target a >=256-row MXU M dimension per grid step.
    M_rows = N * OH
    R = max(1, min(256 // OW_pad, 32, M_rows))
    Mpad = _round_up(M_rows, R)
    if Mpad != M_rows:
        xs = jnp.pad(xs, ((0, Mpad - M_rows), (0, 0), (0, 0), (0, 0)))

    Coutp = _round_up(Cout, 128) if Cout <= 512 else _round_up(Cout, 512)
    TN = min(Coutp, 512)
    wb = w.reshape(KH * KW, Cin, Cout).astype(jnp.bfloat16)
    scale_p = scale.reshape(1, Cout).astype(jnp.float32)
    shift_p = shift.reshape(1, Cout).astype(jnp.float32)
    if Coutp != Cout:
        wb = jnp.pad(wb, ((0, 0), (0, 0), (0, Coutp - Cout)))
        scale_p = jnp.pad(scale_p, ((0, 0), (0, Coutp - Cout)))
        shift_p = jnp.pad(shift_p, ((0, 0), (0, Coutp - Cout)))

    grid = (Coutp // TN, Mpad // R)     # cout tile outer -> weights stay resident over the sweep
    out = pl.pallas_call(
        _conv_tap_kernel(KH, KW, sw, OW_pad, leaky),
        out_shape=jax.ShapeDtypeStruct((Mpad, OW_pad, Coutp), out_dtype),
        grid_spec=pltpu.PrefetchScalarGridSpec(
            num_scalar_prefetch=0,
            grid=grid,
            in_specs=[
                pl.BlockSpec((R, KH * sw, PW, Cin), lambda ct, m: (m, 0, 0, 0)),
                pl.BlockSpec((KH * KW, Cin, TN), lambda ct, m: (0, 0, ct)),
                pl.BlockSpec((1, TN), lambda ct, m: (0, ct)),
                pl.BlockSpec((1, TN), lambda ct, m: (0, ct)),
            ],
            out_specs=pl.BlockSpec((R, OW_pad, TN), lambda ct, m: (m, 0, ct)),
        ),
        compiler_params=pltpu.CompilerParams(
            dimension_semantics=("parallel", "parallel"),
            vmem_limit_bytes=VMEM_LIMIT),
    )(xs, wb, scale_p, shift_p)
    return out[:M_rows, :OW, :Cout].reshape(N, OH, OW, Cout)


# ----------------------------------------------------------------------------
# Kernel 3: fusion conv (3x3, stride 1, pad 1, bias) fused with global average pool.
# No slab / no full fused-map HBM round-trip: streams padded input rows, accumulates
# per-channel pool sums in a VMEM scratch across the (kh, oh) reduction axes.
# ----------------------------------------------------------------------------
def _fusion_pool_kernel(KH, KW, OW_pad, OW, inv_hw):
    def kernel(x1_ref, x2_ref, w1_ref, w2_ref, b_ref, o_ref, acc_ref):
        kh = pl.program_id(1)
        oh = pl.program_id(2)

        part = None
        for j in range(KW):
            a1 = x1_ref[0, 0, j:j + OW_pad, :]
            a2 = x2_ref[0, 0, j:j + OW_pad, :]
            p = jnp.dot(a1, w1_ref[0, j], preferred_element_type=jnp.float32)
            p = p + jnp.dot(a2, w2_ref[0, j], preferred_element_type=jnp.float32)
            part = p if part is None else part + p

        # Mask the zero-padded output columns out of the pool sum.
        col = lax.broadcasted_iota(jnp.int32, (OW_pad, 1), 0)
        part = jnp.where(col < OW, part, 0.0)

        @pl.when((kh == 0) & (oh == 0))
        def _():
            acc_ref[...] = jnp.zeros_like(acc_ref)

        acc_ref[...] += jnp.sum(part, axis=0, keepdims=True)

        @pl.when((kh == KH - 1) & (oh == pl.num_programs(2) - 1))
        def _():
            o_ref[0] = acc_ref[...] * inv_hw + b_ref[...]
    return kernel


def fusion_conv_avgpool(x1, x2, w, bias):
    """conv3x3(stride1,pad1,bias) over concat([x1,x2],C) followed by global avg pool.
    x1,x2: (N,H,W,C1/C2); w: (3,3,C1+C2,Cout); returns (N,Cout) f32."""
    N, H, W, C1 = x1.shape
    C2 = x2.shape[3]
    KH, KW, Cin, Cout = w.shape
    assert Cin == C1 + C2 and KH == 3 and KW == 3
    OH, OW = H, W
    OW_pad = _round_up(OW, 16)
    Wp = OW_pad + KW - 1
    Hp = H + 2

    def _pad(x):
        return jnp.pad(x.astype(jnp.bfloat16),
                       ((0, 0), (1, Hp - H - 1), (1, Wp - W - 1), (0, 0)))

    x1p, x2p = _pad(x1), _pad(x2)
    w1 = w[:, :, :C1, :].astype(jnp.bfloat16)
    w2 = w[:, :, C1:, :].astype(jnp.bfloat16)
    b_p = bias.reshape(1, Cout).astype(jnp.float32)

    out = pl.pallas_call(
        _fusion_pool_kernel(KH, KW, OW_pad, OW, 1.0 / (OH * OW)),
        out_shape=jax.ShapeDtypeStruct((N, 1, Cout), jnp.float32),
        grid_spec=pltpu.PrefetchScalarGridSpec(
            num_scalar_prefetch=0,
            grid=(N, KH, OH),
            in_specs=[
                pl.BlockSpec((1, 1, Wp, C1), lambda n, kh, oh: (n, oh + kh, 0, 0)),
                pl.BlockSpec((1, 1, Wp, C2), lambda n, kh, oh: (n, oh + kh, 0, 0)),
                pl.BlockSpec((1, KW, C1, Cout), lambda n, kh, oh: (kh, 0, 0, 0)),
                pl.BlockSpec((1, KW, C2, Cout), lambda n, kh, oh: (kh, 0, 0, 0)),
                pl.BlockSpec((1, Cout), lambda n, kh, oh: (0, 0)),
            ],
            out_specs=pl.BlockSpec((1, 1, Cout), lambda n, kh, oh: (n, 0, 0)),
            scratch_shapes=[pltpu.VMEM((1, Cout), jnp.float32)],
        ),
        compiler_params=pltpu.CompilerParams(
            dimension_semantics=("parallel", "arbitrary", "arbitrary"),
            vmem_limit_bytes=VMEM_LIMIT),
    )(x1p, x2p, w1, w2, b_p)
    return out[:, 0, :]


# ----------------------------------------------------------------------------
# Conv dispatch helpers
# ----------------------------------------------------------------------------
def conv2d_im2col(x, w, scale, shift, stride, padding, leaky, out_dtype=jnp.bfloat16):
    N, H, W, C = x.shape
    KH, KW, Cin, OC = w.shape
    sh, sw = stride
    ph, pw = padding
    OH = (H + 2 * ph - KH) // sh + 1
    OW = (W + 2 * pw - KW) // sw + 1
    xp = jnp.pad(x.astype(jnp.bfloat16), ((0, 0), (ph, ph), (pw, pw), (0, 0)))
    cols = []
    for i in range(KH):
        for j in range(KW):
            cols.append(xp[:, i:i + sh * (OH - 1) + 1:sh,
                           j:j + sw * (OW - 1) + 1:sw, :])
    patches = jnp.concatenate(cols, axis=-1)
    a = patches.reshape(N * OH * OW, KH * KW * C)
    b = w.reshape(KH * KW * Cin, OC)
    y = matmul_affine(a, b, scale, shift, leaky=leaky, out_dtype=out_dtype)
    return y.reshape(N, OH, OW, OC)


def conv1x1(x, w, scale, shift, stride, padding, leaky, out_dtype=jnp.bfloat16):
    sh, sw = stride
    ph, pw = padding
    if ph or pw:
        x = jnp.pad(x, ((0, 0), (ph, ph), (pw, pw), (0, 0)))
    if sh != 1 or sw != 1:
        x = x[:, ::sh, ::sw, :]
    N, H, W, C = x.shape
    OC = w.shape[-1]
    y = matmul_affine(x.reshape(N * H * W, C), w.reshape(C, OC),
                      scale, shift, leaky=leaky, out_dtype=out_dtype)
    return y.reshape(N, H, W, OC)


def conv_block(x, w, scale, shift, stride, padding, leaky=None, out_dtype=jnp.bfloat16):
    KH, KW, Cin, _ = w.shape
    if KH == 1 and KW == 1:
        return conv1x1(x, w, scale, shift, stride, padding, leaky, out_dtype)
    if Cin >= 128:       # small-Cin convs go im2col so the MXU contraction is >=256
        return conv2d_direct(x, w, scale, shift, stride, padding, leaky, out_dtype)
    return conv2d_im2col(x, w, scale, shift, stride, padding, leaky, out_dtype)


# ----------------------------------------------------------------------------
# Kernel 4: W-axis bilinear interpolation as a two-tap matrix product on the MXU
# ----------------------------------------------------------------------------
def _lin_coords(out_size, in_size):
    src = (jnp.arange(out_size, dtype=jnp.float32) + 0.5) * (in_size / out_size) - 0.5
    src = jnp.clip(src, 0.0, in_size - 1.0)
    i0 = jnp.floor(src).astype(jnp.int32)
    i1 = jnp.minimum(i0 + 1, in_size - 1)
    w1 = src - i0.astype(jnp.float32)
    return i0, i1, 1.0 - w1, w1


def _interp_matrix(out_size, in_size):
    i0, i1, w0, w1 = _lin_coords(out_size, in_size)
    r = jnp.arange(out_size)
    m = jnp.zeros((out_size, in_size), jnp.float32)
    m = m.at[r, i0].add(w0)
    m = m.at[r, i1].add(w1)
    return m


def _winterp_kernel(Rr):
    def kernel(m_ref, x_ref, o_ref):
        mm = m_ref[...]
        for r in range(Rr):
            o_ref[r] = jnp.dot(mm, x_ref[r],
                               preferred_element_type=jnp.float32).astype(o_ref.dtype)
    return kernel


def _upsample_w_pallas(x, out_w):
    """x: (N,H,Win,C) bf16 -> (N,H,out_w,C) bf16 via (out_w x Win) two-tap matrix on the MXU."""
    N, H, Win, C = x.shape
    OWp = _round_up(out_w, 16)
    Winp = _round_up(Win, 8)
    m = _interp_matrix(out_w, Win)
    m = jnp.pad(m, ((0, OWp - out_w), (0, Winp - Win))).astype(jnp.bfloat16)
    xr = x.astype(jnp.bfloat16)
    if Winp != Win:
        xr = jnp.pad(xr, ((0, 0), (0, 0), (0, Winp - Win), (0, 0)))
    rows = N * H
    Rr = min(8, rows)
    rows_p = _round_up(rows, Rr)
    xr = xr.reshape(rows, Winp, C)
    if rows_p != rows:
        xr = jnp.pad(xr, ((0, rows_p - rows), (0, 0), (0, 0)))
    out = pl.pallas_call(
        _winterp_kernel(Rr),
        out_shape=jax.ShapeDtypeStruct((rows_p, OWp, C), jnp.bfloat16),
        grid_spec=pltpu.PrefetchScalarGridSpec(
            num_scalar_prefetch=0,
            grid=(rows_p // Rr,),
            in_specs=[
                pl.BlockSpec((OWp, Winp), lambda b: (0, 0)),
                pl.BlockSpec((Rr, Winp, C), lambda b: (b, 0, 0)),
            ],
            out_specs=pl.BlockSpec((Rr, OWp, C), lambda b: (b, 0, 0)),
        ),
        compiler_params=pltpu.CompilerParams(
            dimension_semantics=("parallel",),
            vmem_limit_bytes=VMEM_LIMIT),
    )(m, xr)
    return out[:rows, :out_w, :].reshape(N, H, out_w, C)


def upsample_bilinear(x, out_h, out_w):
    """nn.Upsample(mode='bilinear', align_corners=False); separable H-then-W, bf16."""
    # TODO(synk): the H-axis two-tap lerp stays as small XLA gathers (no Pallas equivalent needed).
    N, H, W, C = x.shape
    x = x.astype(jnp.bfloat16)
    if out_h != H:
        h0, h1, wh0, wh1 = _lin_coords(out_h, H)
        x = (x[:, h0].astype(jnp.float32) * wh0[None, :, None, None]
             + x[:, h1].astype(jnp.float32) * wh1[None, :, None, None]).astype(jnp.bfloat16)
    if out_w == W:
        return x
    if C % 128 == 0 and out_w >= 128 and W >= 8:
        return _upsample_w_pallas(x, out_w)
    w0, w1, ww0, ww1 = _lin_coords(out_w, W)
    return (x[:, :, w0].astype(jnp.float32) * ww0[None, None, :, None]
            + x[:, :, w1].astype(jnp.float32) * ww1[None, None, :, None]).astype(jnp.bfloat16)


# ----------------------------------------------------------------------------
# LSTM (recurrence + tiny projections kept in XLA)
# ----------------------------------------------------------------------------
def lstm_bidirectional(x, params, hidden):
    B, S, D = x.shape
    Hh = hidden
    wih = jnp.concatenate([params['lstm_wih_fwd'].T, params['lstm_wih_bwd'].T], axis=1)
    bias = jnp.concatenate([params['lstm_bih_fwd'] + params['lstm_bhh_fwd'],
                            params['lstm_bih_bwd'] + params['lstm_bhh_bwd']], axis=0)
    # TODO(synk): tiny (B*S x 256) projection and recurrent h @ W_hh stay as XLA dots.
    gates_x = (x.reshape(B * S, D).astype(jnp.float32) @ wih + bias).reshape(B, S, 8 * Hh)
    gx_f = gates_x[..., :4 * Hh]
    gx_b = gates_x[..., 4 * Hh:][:, ::-1]
    gx = jnp.transpose(jnp.stack([gx_f, gx_b], axis=0), (2, 0, 1, 3))      # (S,2,B,4H)
    whh = jnp.stack([params['lstm_whh_fwd'].T, params['lstm_whh_bwd'].T], axis=0)

    def step(carry, g):
        h, c = carry
        gates = g + jnp.einsum('dbh,dhg->dbg', h, whh)
        i = jax.nn.sigmoid(gates[..., 0 * Hh:1 * Hh])
        f = jax.nn.sigmoid(gates[..., 1 * Hh:2 * Hh])
        gg = jnp.tanh(gates[..., 2 * Hh:3 * Hh])
        o = jax.nn.sigmoid(gates[..., 3 * Hh:4 * Hh])
        c = f * c + i * gg
        h = o * jnp.tanh(c)
        return (h, c), h

    init = (jnp.zeros((2, B, Hh), jnp.float32), jnp.zeros((2, B, Hh), jnp.float32))
    _, hs = lax.scan(step, init, gx)
    fwd = jnp.transpose(hs[:, 0], (1, 0, 2))
    bwd = jnp.transpose(hs[:, 1], (1, 0, 2))[:, ::-1]
    return jnp.concatenate([fwd, bwd], axis=-1)


# ----------------------------------------------------------------------------
# Parameters (deterministic synthetic init mirroring the module's shapes)
# ----------------------------------------------------------------------------
DV_CONVS = [
    ('dv_conv1', 7, 3, 64, (2, 2), (3, 3)),
    ('dv_conv2', 5, 64, 128, (2, 2), (2, 2)),
    ('dv_conv3', 5, 128, 256, (2, 2), (2, 2)),
    ('dv_conv3_1', 3, 256, 256, (1, 1), (1, 1)),
    ('dv_conv4', 3, 256, 512, (2, 2), (1, 1)),
    ('dv_conv4_1', 3, 512, 512, (1, 1), (1, 1)),
    ('dv_conv5', 3, 512, 512, (2, 2), (1, 1)),
    ('dv_conv5_1', 3, 512, 512, (1, 1), (1, 1)),
    ('dv_conv6', 3, 512, 1024, (2, 2), (1, 1)),
]


def lidar_conv_cfg(lid_c):
    return [
        ('li_conv1', 3, lid_c, 32, (1, 2), (1, 0)),
        ('li_conv2', 3, 32, 64, (1, 2), (1, 0)),
        ('li_conv3', 3, 64, 128, (1, 2), (1, 0)),
        ('li_conv4', 3, 128, 256, (2, 2), (1, 0)),
        ('li_conv5', 3, 256, 512, (2, 2), (1, 0)),
        ('li_conv6', 1, 512, 128, (1, 1), (1, 0)),
    ]


FPN_RGB_CIN = [256, 512, 1024]
FPN_LID_CIN = [128, 256, 128]


def init_params(key, lidar_channels, rnn_hidden=256):
    keys = iter(jax.random.split(key, 64))
    p = {}

    def conv_w(kh, kw, cin, cout):
        std = math.sqrt(2.0 / (1.0 + 0.1 ** 2)) / math.sqrt(cout * kh * kw)
        return jax.random.normal(next(keys), (kh, kw, cin, cout), jnp.float32) * std

    for name, k, cin, cout, _, _ in DV_CONVS:
        p[name + '_w'] = conv_w(k, k, cin, cout)

    for name, k, cin, cout, _, _ in lidar_conv_cfg(lidar_channels):
        p[name + '_w'] = conv_w(k, k, cin, cout)
        p[name + '_b'] = jnp.zeros((cout,), jnp.float32)

    for i, cin in enumerate(FPN_RGB_CIN):
        p[f'fpn_rgb{i}_w'] = conv_w(1, 1, cin, 256)
        p[f'fpn_rgb{i}_b'] = jnp.zeros((256,), jnp.float32)
    for i, cin in enumerate(FPN_LID_CIN):
        p[f'fpn_lid{i}_w'] = conv_w(1, 1, cin, 256)
        p[f'fpn_lid{i}_b'] = jnp.zeros((256,), jnp.float32)

    p['fusion_w'] = conv_w(3, 3, 512, 256)
    p['fusion_b'] = jnp.zeros((256,), jnp.float32)

    Hh = rnn_hidden
    for d in ('fwd', 'bwd'):
        p[f'lstm_wih_{d}'] = jax.random.normal(next(keys), (4 * Hh, 256), jnp.float32) * (0.1 / math.sqrt(256))
        p[f'lstm_whh_{d}'] = jax.random.normal(next(keys), (4 * Hh, Hh), jnp.float32) * (0.1 / math.sqrt(Hh))
        p[f'lstm_bih_{d}'] = jnp.zeros((4 * Hh,), jnp.float32)
        p[f'lstm_bhh_{d}'] = jnp.zeros((4 * Hh,), jnp.float32)

    fc_std = math.sqrt(2.0 / (1.0 + 0.1 ** 2)) / math.sqrt(7)
    p['fc_w'] = jax.random.normal(next(keys), (2 * Hh, 7), jnp.float32) * fc_std
    p['fc_b'] = jnp.zeros((7,), jnp.float32)
    return p


# ----------------------------------------------------------------------------
# FusionLIVO forward
# ----------------------------------------------------------------------------
def fusion_livo_forward(params, rgb_high, lidar_combined, rnn_hidden=256):
    B, S, C, H, W = rgb_high.shape
    BS = B * S
    x = jnp.transpose(rgb_high.reshape(BS, C, H, W), (0, 2, 3, 1))   # -> NHWC

    def dv_block(x, name, stride, pad):
        # Conv(bias=False) + eval-BN + LeakyReLU(0.1) + Dropout(eval=identity)
        w = params[name + '_w']
        oc = w.shape[-1]
        return conv_block(x, w, jnp.full((oc,), BN_SCALE, jnp.float32),
                          jnp.zeros((oc,), jnp.float32), stride, pad, leaky=0.1)

    def biased(x, wname, bname, stride, pad, w_prescale=1.0):
        # plain conv with bias; w_prescale folds the *previous* lidar layer's eval-BN in.
        w = params[wname] * w_prescale
        oc = w.shape[-1]
        return conv_block(x, w, jnp.ones((oc,), jnp.float32), params[bname],
                          stride, pad, leaky=None)

    # --- DeepVO RGB encoder ---
    c1 = dv_block(x, 'dv_conv1', (2, 2), (3, 3))
    c2 = dv_block(c1, 'dv_conv2', (2, 2), (2, 2))
    c3 = dv_block(c2, 'dv_conv3', (2, 2), (2, 2))
    c3_1 = dv_block(c3, 'dv_conv3_1', (1, 1), (1, 1))
    c4 = dv_block(c3_1, 'dv_conv4', (2, 2), (1, 1))
    c4_1 = dv_block(c4, 'dv_conv4_1', (1, 1), (1, 1))
    c5 = dv_block(c4_1, 'dv_conv5', (2, 2), (1, 1))
    c5_1 = dv_block(c5, 'dv_conv5_1', (1, 1), (1, 1))
    c6 = dv_block(c5_1, 'dv_conv6', (2, 2), (1, 1))

    # --- LiDAR encoder (no activation; eval-BN between convs folded into next conv weights) ---
    Bl, Sl, Cl, Hl, Wl = lidar_combined.shape
    lx = jnp.transpose(lidar_combined.reshape(Bl * Sl, Cl, Hl, Wl), (0, 2, 3, 1))
    l1 = biased(lx, 'li_conv1_w', 'li_conv1_b', (1, 2), (1, 0))
    l2 = biased(l1, 'li_conv2_w', 'li_conv2_b', (1, 2), (1, 0), BN_SCALE)
    l3 = biased(l2, 'li_conv3_w', 'li_conv3_b', (1, 2), (1, 0), BN_SCALE)
    l4 = biased(l3, 'li_conv4_w', 'li_conv4_b', (2, 2), (1, 0), BN_SCALE)
    l5 = biased(l4, 'li_conv5_w', 'li_conv5_b', (2, 2), (1, 0), BN_SCALE)
    l6 = biased(l5, 'li_conv6_w', 'li_conv6_b', (1, 1), (1, 0), BN_SCALE)

    # --- RGB FPN (upsample sizes derived from actual feature maps; match the reference's
    #     hard-coded sizes at the default 256x832 / 64x900 resolution) ---
    rgb_feats = [c3_1, c4_1, c6]
    rgb_fpn = [biased(rgb_feats[i], f'fpn_rgb{i}_w', f'fpn_rgb{i}_b', (1, 1), (0, 0))
               for i in range(3)]
    rgb_fpn[1] = rgb_fpn[1] + upsample_bilinear(rgb_fpn[2], c4_1.shape[1], c4_1.shape[2])
    rgb_fpn[0] = rgb_fpn[0] + upsample_bilinear(rgb_fpn[1], c3_1.shape[1], c3_1.shape[2])
    rgb_fused = upsample_bilinear(rgb_fpn[0], Hl, Wl)

    # --- LiDAR FPN ---
    lid_feats = [l3, l4, l6]
    lid_fpn = [biased(lid_feats[i], f'fpn_lid{i}_w', f'fpn_lid{i}_b', (1, 1), (0, 0))
               for i in range(3)]
    lid_fpn[1] = lid_fpn[1] + upsample_bilinear(lid_fpn[2], l4.shape[1], l4.shape[2])
    lid_fpn[0] = lid_fpn[0] + upsample_bilinear(lid_fpn[1], l3.shape[1], l3.shape[2])
    lid_fused = upsample_bilinear(lid_fpn[0], Hl, Wl)

    # --- Fused fusion-conv + global average pool (single Pallas kernel) ---
    oc = params['fusion_w'].shape[-1]
    pooled = fusion_conv_avgpool(rgb_fused, lid_fused,
                                 params['fusion_w'], params['fusion_b']).reshape(B, S, oc)

    # --- LSTM + head ---
    rnn_out = lstm_bidirectional(pooled, params, rnn_hidden)                 # (B, S, 512)
    out = (rnn_out.reshape(B * S, 2 * rnn_hidden) @ params['fc_w']
           + params['fc_b']).reshape(B, S, 7)

    max_translation = 10.0
    translation = jnp.clip(out[..., :3] / max_translation, -1.0, 1.0) * max_translation
    q = out[..., 3:] + 1e-8
    qnorm = jnp.sqrt(jnp.sum(q * q, axis=-1, keepdims=True))
    quaternion = q / jnp.maximum(qnorm, 1e-12)
    # TODO(synk): the reference's host-side NaN/Inf ValueError checks are omitted.
    return jnp.concatenate([translation, quaternion], axis=-1)


# ----------------------------------------------------------------------------
if __name__ == "__main__":
    key = jax.random.PRNGKey(0)
    k_rgb, k_lidar, k_param = jax.random.split(key, 3)

    B, S = 2, 2
    RGB_H, RGB_W = 64, 128        # small stand-in for the default 256x832
    LID_H, LID_W = 16, 128        # small stand-in for the default 64x900
    LID_C = 8                     # depth(1)+intensity(1)+normals(3)+rgb_low(3)

    rgb_high = jax.random.normal(k_rgb, (B, S, 3, RGB_H, RGB_W), jnp.float32)
    lidar_combined = jax.random.normal(k_lidar, (B, S, LID_C, LID_H, LID_W), jnp.float32)

    params = init_params(k_param, lidar_channels=LID_C, rnn_hidden=256)

    fwd = jax.jit(fusion_livo_forward)
    out = fwd(params, rgb_high, lidar_combined)
    out = jax.block_until_ready(out)

    assert out.shape == (B, S, 7), out.shape
    assert bool(jnp.all(jnp.isfinite(out)))
    print("KERNEL_OK")
</pallas_src>

<mosaic_0001>
module attributes {stable_mosaic.version = 11 : i64} {
  func.func @kernel(%arg0: i32, %arg1: i32, %arg2: memref<2048x147xbf16, #tpu.memory_space<vmem>>, %arg3: memref<147x128xbf16, #tpu.memory_space<vmem>>, %arg4: memref<1x128xf32, #tpu.memory_space<vmem>>, %arg5: memref<1x128xf32, #tpu.memory_space<vmem>>, %arg6: memref<2048x128xbf16, #tpu.memory_space<vmem>>) attributes {dimension_semantics = [#tpu.dimension_semantics<parallel>, #tpu.dimension_semantics<parallel>], iteration_bounds = array<i64: 4, 1>, scalar_prefetch = 0 : i64, scratch_operands = 0 : i64, tpu.core_type = #tpu.core_type<tc>, window_params = [{transform_indices = @transform_0, window_bounds = array<i64: 2048, 147>}, {transform_indices = @transform_1, window_bounds = array<i64: 147, 128>}, {transform_indices = @transform_2, window_bounds = array<i64: 1, 128>}, {transform_indices = @transform_3, window_bounds = array<i64: 1, 128>}, {transform_indices = @transform_4, window_bounds = array<i64: 2048, 128>}]} {
    %c0 = arith.constant 0 : index
    %c0_0 = arith.constant 0 : index
    %0 = vector.load %arg2[%c0, %c0_0] : memref<2048x147xbf16, #tpu.memory_space<vmem>>, vector<2048x147xbf16>
    %c0_1 = arith.constant 0 : index
    %c0_2 = arith.constant 0 : index
    %1 = vector.load %arg3[%c0_1, %c0_2] : memref<147x128xbf16, #tpu.memory_space<vmem>>, vector<147x128xbf16>
    %cst = arith.constant dense<0.000000e+00> : vector<2048x128xf32>
    %2 = tpu.matmul %0, %1, %cst {dimension_numbers = #tpu.dot_dimension_numbers<[1], [0], [0], [1], [0, 0, 1, 1], [], []>} : vector<2048x147xbf16>, vector<147x128xbf16>, vector<2048x128xf32> -> vector<2048x128xf32>
    %c0_3 = arith.constant 0 : index
    %c0_4 = arith.constant 0 : index
    %3 = vector.load %arg4[%c0_3, %c0_4] : memref<1x128xf32, #tpu.memory_space<vmem>>, vector<1x128xf32>
    %4 = vector.broadcast %3 : vector<1x128xf32> to vector<2048x128xf32>
    %5 = arith.mulf %2, %4 : vector<2048x128xf32>
    %c0_5 = arith.constant 0 : index
    %c0_6 = arith.constant 0 : index
    %6 = vector.load %arg5[%c0_5, %c0_6] : memref<1x128xf32, #tpu.memory_space<vmem>>, vector<1x128xf32>
    %7 = vector.broadcast %6 : vector<1x128xf32> to vector<2048x128xf32>
    %8 = arith.addf %5, %7 : vector<2048x128xf32>
    %cst_7 = arith.constant 0.000000e+00 : f32
    %9 = vector.broadcast %cst_7 : f32 to vector<2048x128xf32>
    %10 = arith.cmpf oge, %8, %9 : vector<2048x128xf32>
    %cst_8 = arith.constant 1.000000e-01 : f32
    %11 = vector.broadcast %cst_8 : f32 to vector<2048x128xf32>
    %12 = arith.mulf %11, %8 : vector<2048x128xf32>
    %13 = arith.select %10, %8, %12 : vector<2048x128xi1>, vector<2048x128xf32>
    %14 = arith.truncf %13 : vector<2048x128xf32> to vector<2048x128xbf16>
    %c0_9 = arith.constant 0 : index
    %c0_10 = arith.constant 0 : index
    %15 = vector.load %arg6[%c0_9, %c0_10] : memref<2048x128xbf16, #tpu.memory_space<vmem>>, vector<2048x128xbf16>
    tpu.vector_store %arg6[%c0_9, %c0_10], %14 {strides = array<i32>} : memref<2048x128xbf16, #tpu.memory_space<vmem>>, vector<2048x128xbf16>,
    return
  }
  func.func @transform_0(%arg0: i32, %arg1: i32) -> (i32, i32) {
    %c0_i32 = arith.constant 0 : i32
    %c0_i32_0 = arith.constant 0 : i32
    return %arg0, %c0_i32 : i32, i32
  }
  func.func @transform_1(%arg0: i32, %arg1: i32) -> (i32, i32) {
    %c0_i32 = arith.constant 0 : i32
    %c0_i32_0 = arith.constant 0 : i32
    return %c0_i32, %arg1 : i32, i32
  }
  func.func @transform_2(%arg0: i32, %arg1: i32) -> (i32, i32) {
    %c0_i32 = arith.constant 0 : i32
    %c0_i32_0 = arith.constant 0 : i32
    return %c0_i32, %arg1 : i32, i32
  }
  func.func @transform_3(%arg0: i32, %arg1: i32) -> (i32, i32) {
    %c0_i32 = arith.constant 0 : i32
    %c0_i32_0 = arith.constant 0 : i32
    return %c0_i32, %arg1 : i32, i32
  }
  func.func @transform_4(%arg0: i32, %arg1: i32) -> (i32, i32) {
    %c0_i32 = arith.constant 0 : i32
    return %arg0, %arg1 : i32, i32
  }
}

module attributes {stable_mosaic.version = 11 : i64} {
  func.func @kernel(%arg0: i32, %arg1: i32, %arg2: memref<512x1600xbf16, #tpu.memory_space<vmem>>, %arg3: memref<1600x128xbf16, #tpu.memory_space<vmem>>, %arg4: memref<1x128xf32, #tpu.memory_space<vmem>>, %arg5: memref<1x128xf32, #tpu.memory_space<vmem>>, %arg6: memref<512x128xbf16, #tpu.memory_space<vmem>>) attributes {dimension_semantics = [#tpu.dimension_semantics<parallel>, #tpu.dimension_semantics<parallel>], iteration_bounds = array<i64: 4, 1>, scalar_prefetch = 0 : i64, scratch_operands = 0 : i64, tpu.core_type = #tpu.core_type<tc>, window_params = [{transform_indices = @transform_0, window_bounds = array<i64: 512, 1600>}, {transform_indices = @transform_1, window_bounds = array<i64: 1600, 128>}, {transform_indices = @transform_2, window_bounds = array<i64: 1, 128>}, {transform_indices = @transform_3, window_bounds = array<i64: 1, 128>}, {transform_indices = @transform_4, window_bounds = array<i64: 512, 128>}]} {
    %c0 = arith.constant 0 : index
    %c0_0 = arith.constant 0 : index
    %0 = vector.load %arg2[%c0, %c0_0] : memref<512x1600xbf16, #tpu.memory_space<vmem>>, vector<512x1600xbf16>
    %c0_1 = arith.constant 0 : index
    %c0_2 = arith.constant 0 : index
    %1 = vector.load %arg3[%c0_1, %c0_2] : memref<1600x128xbf16, #tpu.memory_space<vmem>>, vector<1600x128xbf16>
    %cst = arith.constant dense<0.000000e+00> : vector<512x128xf32>
    %2 = tpu.matmul %0, %1, %cst {dimension_numbers = #tpu.dot_dimension_numbers<[1], [0], [0], [1], [0, 0, 1, 1], [], []>} : vector<512x1600xbf16>, vector<1600x128xbf16>, vector<512x128xf32> -> vector<512x128xf32>
    %c0_3 = arith.constant 0 : index
    %c0_4 = arith.constant 0 : index
    %3 = vector.load %arg4[%c0_3, %c0_4] : memref<1x128xf32, #tpu.memory_space<vmem>>, vector<1x128xf32>
    %4 = vector.broadcast %3 : vector<1x128xf32> to vector<512x128xf32>
    %5 = arith.mulf %2, %4 : vector<512x128xf32>
    %c0_5 = arith.constant 0 : index
    %c0_6 = arith.constant 0 : index
    %6 = vector.load %arg5[%c0_5, %c0_6] : memref<1x128xf32, #tpu.memory_space<vmem>>, vector<1x128xf32>
    %7 = vector.broadcast %6 : vector<1x128xf32> to vector<512x128xf32>
    %8 = arith.addf %5, %7 : vector<512x128xf32>
    %cst_7 = arith.constant 0.000000e+00 : f32
    %9 = vector.broadcast %cst_7 : f32 to vector<512x128xf32>
    %10 = arith.cmpf oge, %8, %9 : vector<512x128xf32>
    %cst_8 = arith.constant 1.000000e-01 : f32
    %11 = vector.broadcast %cst_8 : f32 to vector<512x128xf32>
    %12 = arith.mulf %11, %8 : vector<512x128xf32>
    %13 = arith.select %10, %8, %12 : vector<512x128xi1>, vector<512x128xf32>
    %14 = arith.truncf %13 : vector<512x128xf32> to vector<512x128xbf16>
    %c0_9 = arith.constant 0 : index
    %c0_10 = arith.constant 0 : index
    %15 = vector.load %arg6[%c0_9, %c0_10] : memref<512x128xbf16, #tpu.memory_space<vmem>>, vector<512x128xbf16>
    tpu.vector_store %arg6[%c0_9, %c0_10], %14 {strides = array<i32>} : memref<512x128xbf16, #tpu.memory_space<vmem>>, vector<512x128xbf16>,
    return
  }
  func.func @transform_0(%arg0: i32, %arg1: i32) -> (i32, i32) {
    %c0_i32 = arith.constant 0 : i32
    %c0_i32_0 = arith.constant 0 : i32
    return %arg0, %c0_i32 : i32, i32
  }
  func.func @transform_1(%arg0: i32, %arg1: i32) -> (i32, i32) {
    %c0_i32 = arith.constant 0 : i32
    %c0_i32_0 = arith.constant 0 : i32
    return %c0_i32, %arg1 : i32, i32
  }
  func.func @transform_2(%arg0: i32, %arg1: i32) -> (i32, i32) {
    %c0_i32 = arith.constant 0 : i32
    %c0_i32_0 = arith.constant 0 : i32
    return %c0_i32, %arg1 : i32, i32
  }
  func.func @transform_3(%arg0: i32, %arg1: i32) -> (i32, i32) {
    %c0_i32 = arith.constant 0 : i32
    %c0_i32_0 = arith.constant 0 : i32
    return %c0_i32, %arg1 : i32, i32
  }
  func.func @transform_4(%arg0: i32, %arg1: i32) -> (i32, i32) {
    %c0_i32 = arith.constant 0 : i32
    return %arg0, %arg1 : i32, i32
  }
}

module attributes {stable_mosaic.version = 11 : i64} {
  func.func @kernel(%arg0: i32, %arg1: i32, %arg2: memref<16x10x18x128xbf16, #tpu.memory_space<vmem>>, %arg3: memref<25x128x256xbf16, #tpu.memory_space<vmem>>, %arg4: memref<1x256xf32, #tpu.memory_space<vmem>>, %arg5: memref<1x256xf32, #tpu.memory_space<vmem>>, %arg6: memref<16x16x256xbf16, #tpu.memory_space<vmem>>) attributes {dimension_semantics = [#tpu.dimension_semantics<parallel>, #tpu.dimension_semantics<parallel>], iteration_bounds = array<i64: 1, 2>, scalar_prefetch = 0 : i64, scratch_operands = 0 : i64, tpu.core_type = #tpu.core_type<tc>, window_params = [{transform_indices = @transform_0, window_bounds = array<i64: 16, 10, 18, 128>}, {transform_indices = @transform_1, window_bounds = array<i64: 25, 128, 256>}, {transform_indices = @transform_2, window_bounds = array<i64: 1, 256>}, {transform_indices = @transform_3, window_bounds = array<i64: 1, 256>}, {transform_indices = @transform_4, window_bounds = array<i64: 16, 16, 256>}]} {
    %c0 = arith.constant 0 : index
    %c0_0 = arith.constant 0 : index
    %c0_1 = arith.constant 0 : index
    %c0_2 = arith.constant 0 : index
    %0 = vector.load %arg2[%c0, %c0_0, %c0_1, %c0_2] : memref<16x10x18x128xbf16, #tpu.memory_space<vmem>>, vector<16x1x16x128xbf16>
    %1 = vector.shape_cast %0 : vector<16x1x16x128xbf16> to vector<16x16x128xbf16>
    %2 = vector.shape_cast %1 : vector<16x16x128xbf16> to vector<256x128xbf16>
    %c0_3 = arith.constant 0 : index
    %c0_4 = arith.constant 0 : index
    %c0_5 = arith.constant 0 : index
    %3 = vector.load %arg3[%c0_3, %c0_4, %c0_5] : memref<25x128x256xbf16, #tpu.memory_space<vmem>>, vector<1x128x256xbf16>
    %4 = vector.shape_cast %3 : vector<1x128x256xbf16> to vector<128x256xbf16>
    %cst = arith.constant dense<0.000000e+00> : vector<256x256xf32>
    %5 = tpu.matmul %2, %4, %cst {dimension_numbers = #tpu.dot_dimension_numbers<[1], [0], [0], [1], [0, 0, 1, 1], [], []>} : vector<256x128xbf16>, vector<128x256xbf16>, vector<256x256xf32> -> vector<256x256xf32>
    %c0_6 = arith.constant 0 : index
    %c1 = arith.constant 1 : index
    %c0_7 = arith.constant 0 : index
    %c0_8 = arith.constant 0 : index
    %6 = vector.load %arg2[%c0_6, %c1, %c0_7, %c0_8] : memref<16x10x18x128xbf16, #tpu.memory_space<vmem>>, vector<16x1x16x128xbf16>
    %7 = vector.shape_cast %6 : vector<16x1x16x128xbf16> to vector<16x16x128xbf16>
    %8 = vector.shape_cast %7 : vector<16x16x128xbf16> to vector<256x128xbf16>
    %c1_9 = arith.constant 1 : index
    %c0_10 = arith.constant 0 : index
    %c0_11 = arith.constant 0 : index
    %9 = vector.load %arg3[%c1_9, %c0_10, %c0_11] : memref<25x128x256xbf16, #tpu.memory_space<vmem>>, vector<1x128x256xbf16>
    %10 = vector.shape_cast %9 : vector<1x128x256xbf16> to vector<128x256xbf16>
    %cst_12 = arith.constant dense<0.000000e+00> : vector<256x256xf32>
    %11 = tpu.matmul %8, %10, %cst_12 {dimension_numbers = #tpu.dot_dimension_numbers<[1], [0], [0], [1], [0, 0, 1, 1], [], []>} : vector<256x128xbf16>, vector<128x256xbf16>, vector<256x256xf32> -> vector<256x256xf32>
    %12 = arith.addf %5, %11 : vector<256x256xf32>
    %c0_13 = arith.constant 0 : index
    %c0_14 = arith.constant 0 : index
    %c1_15 = arith.constant 1 : index
    %c0_16 = arith.constant 0 : index
    %13 = vector.load %arg2[%c0_13, %c0_14, %c1_15, %c0_16] : memref<16x10x18x128xbf16, #tpu.memory_space<vmem>>, vector<16x1x16x128xbf16>
    %14 = vector.shape_cast %13 : vector<16x1x16x128xbf16> to vector<16x16x128xbf16>
    %15 = vector.shape_cast %14 : vector<16x16x128xbf16> to vector<256x128xbf16>
    %c2 = arith.constant 2 : index
    %c0_17 = arith.constant 0 : index
    %c0_18 = arith.constant 0 : index
    %16 = vector.load %arg3[%c2, %c0_17, %c0_18] : memref<25x128x256xbf16, #tpu.memory_space<vmem>>, vector<1x128x256xbf16>
    %17 = vector.shape_cast %16 : vector<1x128x256xbf16> to vector<128x256xbf16>
    %cst_19 = arith.constant dense<0.000000e+00> : vector<256x256xf32>
    %18 = tpu.matmul %15, %17, %cst_19 {dimension_numbers = #tpu.dot_dimension_numbers<[1], [0], [0], [1], [0, 0, 1, 1], [], []>} : vector<256x128xbf16>, vector<128x256xbf16>, vector<256x256xf32> -> vector<256x256xf32>
    %19 = arith.addf %12, %18 : vector<256x256xf32>
    %c0_20 = arith.constant 0 : index
    %c1_21 = arith.constant 1 : index
    %c1_22 = arith.constant 1 : index
    %c0_23 = arith.constant 0 : index
    %20 = vector.load %arg2[%c0_20, %c1_21, %c1_22, %c0_23] : memref<16x10x18x128xbf16, #tpu.memory_space<vmem>>, vector<16x1x16x128xbf16>
    %21 = vector.shape_cast %20 : vector<16x1x16x128xbf16> to vector<16x16x128xbf16>
    %22 = vector.shape_cast %21 : vector<16x16x128xbf16> to vector<256x128xbf16>
    %c3 = arith.constant 3 : index
    %c0_24 = arith.constant 0 : index
    %c0_25 = arith.constant 0 : index
    %23 = vector.load %arg3[%c3, %c0_24, %c0_25] : memref<25x128x256xbf16, #tpu.memory_space<vmem>>, vector<1x128x256xbf16>
    %24 = vector.shape_cast %23 : vector<1x128x256xbf16> to vector<128x256xbf16>
    %cst_26 = arith.constant dense<0.000000e+00> : vector<256x256xf32>
    %25 = tpu.matmul %22, %24, %cst_26 {dimension_numbers = #tpu.dot_dimension_numbers<[1], [0], [0], [1], [0, 0, 1, 1], [], []>} : vector<256x128xbf16>, vector<128x256xbf16>, vector<256x256xf32> -> vector<256x256xf32>
    %26 = arith.addf %19, %25 : vector<256x256xf32>
    %c0_27 = arith.constant 0 : index
    %c0_28 = arith.constant 0 : index
    %c2_29 = arith.constant 2 : index
    %c0_30 = arith.constant 0 : index
    %27 = vector.load %arg2[%c0_27, %c0_28, %c2_29, %c0_30] : memref<16x10x18x128xbf16, #tpu.memory_space<vmem>>, vector<16x1x16x128xbf16>
    %28 = vector.shape_cast %27 : vector<16x1x16x128xbf16> to vector<16x16x128xbf16>
    %29 = vector.shape_cast %28 : vector<16x16x128xbf16> to vector<256x128xbf16>
    %c4 = arith.constant 4 : index
    %c0_31 = arith.constant 0 : index
    %c0_32 = arith.constant 0 : index
    %30 = vector.load %arg3[%c4, %c0_31, %c0_32] : memref<25x128x256xbf16, #tpu.memory_space<vmem>>, vector<1x128x256xbf16>
    %31 = vector.shape_cast %30 : vector<1x128x256xbf16> to vector<128x256xbf16>
    %cst_33 = arith.constant dense<0.000000e+00> : vector<256x256xf32>
    %32 = tpu.matmul %29, %31, %cst_33 {dimension_numbers = #tpu.dot_dimension_numbers<[1], [0], [0], [1], [0, 0, 1, 1], [], []>} : vector<256x128xbf16>, vector<128x256xbf16>, vector<256x256xf32> -> vector<256x256xf32>
    %33 = arith.addf %26, %32 : vector<256x256xf32>
    %c0_34 = arith.constant 0 : index
    %c2_35 = arith.constant 2 : index
    %c0_36 = arith.constant 0 : index
    %c0_37 = arith.constant 0 : index
    %34 = vector.load %arg2[%c0_34, %c2_35, %c0_36, %c0_37] : memref<16x10x18x128xbf16, #tpu.memory_space<vmem>>, vector<16x1x16x128xbf16>
    %35 = vector.shape_cast %34 : vector<16x1x16x128xbf16> to vector<16x16x128xbf16>
    %36 = vector.shape_cast %35 : vector<16x16x128xbf16> to vector<256x128xbf16>
    %c5 = arith.constant 5 : index
    %c0_38 = arith.constant 0 : index
    %c0_39 = arith.constant 0 : index
    %37 = vector.load %arg3[%c5, %c0_38, %c0_39] : memref<25x128x256xbf16, #tpu.memory_space<vmem>>, vector<1x128x256xbf16>
    %38 = vector.shape_cast %37 : vector<1x128x256xbf16> to vector<128x256xbf16>
    %cst_40 = arith.constant dense<0.000000e+00> : vector<256x256xf32>
    %39 = tpu.matmul %36, %38, %cst_40 {dimension_numbers = #tpu.dot_dimension_numbers<[1], [0], [0], [1], [0, 0, 1, 1], [], []>} : vector<256x128xbf16>, vector<128x256xbf16>, vector<256x256xf32> -> vector<256x256xf32>
    %40 = arith.addf %33, %39 : vector<256x256xf32>
    %c0_41 = arith.constant 0 : index
    %c3_42 = arith.constant 3 : index
    %c0_43 = arith.constant 0 : index
    %c0_44 = arith.constant 0 : index
    %41 = vector.load %arg2[%c0_41, %c3_42, %c0_43, %c0_44] : memref<16x10x18x128xbf16, #tpu.memory_space<vmem>>, vector<16x1x16x128xbf16>
    %42 = vector.shape_cast %41 : vector<16x1x16x128xbf16> to vector<16x16x128xbf16>
    %43 = vector.shape_cast %42 : vector<16x16x128xbf16> to vector<256x128xbf16>
    %c6 = arith.constant 6 : index
    %c0_45 = arith.constant 0 : index
    %c0_46 = arith.constant 0 : index
    %44 = vector.load %arg3[%c6, %c0_45, %c0_46] : memref<25x128x256xbf16, #tpu.memory_space<vmem>>, vector<1x128x256xbf16>
    %45 = vector.shape_cast %44 : vector<1x128x256xbf16> to vector<128x256xbf16>
    %cst_47 = arith.constant dense<0.000000e+00> : vector<256x256xf32>
    %46 = tpu.matmul %43, %45, %cst_47 {dimension_numbers = #tpu.dot_dimension_numbers<[1], [0], [0], [1], [0, 0, 1, 1], [], []>} : vector<256x128xbf16>, vector<128x256xbf16>, vector<256x256xf32> -> vector<256x256xf32>
    %47 = arith.addf %40, %46 : vector<256x256xf32>
    %c0_48 = arith.constant 0 : index
    %c2_49 = arith.constant 2 : index
    %c1_50 = arith.constant 1 : index
    %c0_51 = arith.constant 0 : index
    %48 = vector.load %arg2[%c0_48, %c2_49, %c1_50, %c0_51] : memref<16x10x18x128xbf16, #tpu.memory_space<vmem>>, vector<16x1x16x128xbf16>
    %49 = vector.shape_cast %48 : vector<16x1x16x128xbf16> to vector<16x16x128xbf16>
    %50 = vector.shape_cast %49 : vector<16x16x128xbf16> to vector<256x128xbf16>
    %c7 = arith.constant 7 : index
    %c0_52 = arith.constant 0 : index
    %c0_53 = arith.constant 0 : index
    %51 = vector.load %arg3[%c7, %c0_52, %c0_53] : memref<25x128x256xbf16, #tpu.memory_space<vmem>>, vector<1x128x256xbf16>
    %52 = vector.shape_cast %51 : vector<1x128x256xbf16> to vector<128x256xbf16>
    %cst_54 = arith.constant dense<0.000000e+00> : vector<256x256xf32>
    %53 = tpu.matmul %50, %52, %cst_54 {dimension_numbers = #tpu.dot_dimension_numbers<[1], [0], [0], [1], [0, 0, 1, 1], [], []>} : vector<256x128xbf16>, vector<128x256xbf16>, vector<256x256xf32> -> vector<256x256xf32>
    %54 = arith.addf %47, %53 : vector<256x256xf32>
    %c0_55 = arith.constant 0 : index
    %c3_56 = arith.constant 3 : index
    %c1_57 = arith.constant 1 : index
    %c0_58 = arith.constant 0 : index
    %55 = vector.load %arg2[%c0_55, %c3_56, %c1_57, %c0_58] : memref<16x10x18x128xbf16, #tpu.memory_space<vmem>>, vector<16x1x16x128xbf16>
    %56 = vector.shape_cast %55 : vector<16x1x16x128xbf16> to vector<16x16x128xbf16>
    %57 = vector.shape_cast %56 : vector<16x16x128xbf16> to vector<256x128xbf16>
    %c8 = arith.constant 8 : index
    %c0_59 = arith.constant 0 : index
    %c0_60 = arith.constant 0 : index
    %58 = vector.load %arg3[%c8, %c0_59, %c0_60] : memref<25x128x256xbf16, #tpu.memory_space<vmem>>, vector<1x128x256xbf16>
    %59 = vector.shape_cast %58 : vector<1x128x256xbf16> to vector<128x256xbf16>
    %cst_61 = arith.constant dense<0.000000e+00> : vector<256x256xf32>
    %60 = tpu.matmul %57, %59, %cst_61 {dimension_numbers = #tpu.dot_dimension_numbers<[1], [0], [0], [1], [0, 0, 1, 1], [], []>} : vector<256x128xbf16>, vector<128x256xbf16>, vector<256x256xf32> -> vector<256x256xf32>
    %61 = arith.addf %54, %60 : vector<256x256xf32>
    %c0_62 = arith.constant 0 : index
    %c2_63 = arith.constant 2 : index
    %c2_64 = arith.constant 2 : index
    %c0_65 = arith.constant 0 : index
    %62 = vector.load %arg2[%c0_62, %c2_63, %c2_64, %c0_65] : memref<16x10x18x128xbf16, #tpu.memory_space<vmem>>, vector<16x1x16x128xbf16>
    %63 = vector.shape_cast %62 : vector<16x1x16x128xbf16> to vector<16x16x128xbf16>
    %64 = vector.shape_cast %63 : vector<16x16x128xbf16> to vector<256x128xbf16>
    %c9 = arith.constant 9 : index
    %c0_66 = arith.constant 0 : index
    %c0_67 = arith.constant 0 : index
    %65 = vector.load %arg3[%c9, %c0_66, %c0_67] : memref<25x128x256xbf16, #tpu.memory_space<vmem>>, vector<1x128x256xbf16>
    %66 = vector.shape_cast %65 : vector<1x128x256xbf16> to vector<128x256xbf16>
    %cst_68 = arith.constant dense<0.000000e+00> : vector<256x256xf32>
    %67 = tpu.matmul %64, %66, %cst_68 {dimension_numbers = #tpu.dot_dimension_numbers<[1], [0], [0], [1], [0, 0, 1, 1], [], []>} : vector<256x128xbf16>, vector<128x256xbf16>, vector<256x256xf32> -> vector<256x256xf32>
    %68 = arith.addf %61, %67 : vector<256x256xf32>
    %c0_69 = arith.constant 0 : index
    %c4_70 = arith.constant 4 : index
    %c0_71 = arith.constant 0 : index
    %c0_72 = arith.constant 0 : index
    %69 = vector.load %arg2[%c0_69, %c4_70, %c0_71, %c0_72] : memref<16x10x18x128xbf16, #tpu.memory_space<vmem>>, vector<16x1x16x128xbf16>
    %70 = vector.shape_cast %69 : vector<16x1x16x128xbf16> to vector<16x16x128xbf16>
    %71 = vector.shape_cast %70 : vector<16x16x128xbf16> to vector<256x128xbf16>
    %c10 = arith.constant 10 : index
    %c0_73 = arith.constant 0 : index
    %c0_74 = arith.constant 0 : index
    %72 = vector.load %arg3[%c10, %c0_73, %c0_74] : memref<25x128x256xbf16, #tpu.memory_space<vmem>>, vector<1x128x256xbf16>
    %73 = vector.shape_cast %72 : vector<1x128x256xbf16> to vector<128x256xbf16>
    %cst_75 = arith.constant dense<0.000000e+00> : vector<256x256xf32>
    %74 = tpu.matmul %71, %73, %cst_75 {dimension_numbers = #tpu.dot_dimension_numbers<[1], [0], [0], [1], [0, 0, 1, 1], [], []>} : vector<256x128xbf16>, vector<128x256xbf16>, vector<256x256xf32> -> vector<256x256xf32>
    %75 = arith.addf %68, %74 : vector<256x256xf32>
    %c0_76 = arith.constant 0 : index
    %c5_77 = arith.constant 5 : index
    %c0_78 = arith.constant 0 : index
    %c0_79 = arith.constant 0 : index
    %76 = vector.load %arg2[%c0_76, %c5_77, %c0_78, %c0_79] : memref<16x10x18x128xbf16, #tpu.memory_space<vmem>>, vector<16x1x16x128xbf16>
    %77 = vector.shape_cast %76 : vector<16x1x16x128xbf16> to vector<16x16x128xbf16>
    %78 = vector.shape_cast %77 : vector<16x16x128xbf16> to vector<256x128xbf16>
    %c11 = arith.constant 11 : index
    %c0_80 = arith.constant 0 : index
    %c0_81 = arith.constant 0 : index
    %79 = vector.load %arg3[%c11, %c0_80, %c0_81] : memref<25x128x256xbf16, #tpu.memory_space<vmem>>, vector<1x128x256xbf16>
    %80 = vector.shape_cast %79 : vector<1x128x256xbf16> to vector<128x256xbf16>
    %cst_82 = arith.constant dense<0.000000e+00> : vector<256x256xf32>
    %81 = tpu.matmul %78, %80, %cst_82 {dimension_numbers = #tpu.dot_dimension_numbers<[1], [0], [0], [1], [0, 0, 1, 1], [], []>} : vector<256x128xbf16>, vector<128x256xbf16>, vector<256x256xf32> -> vector<256x256xf32>
    %82 = arith.addf %75, %81 : vector<256x256xf32>
    %c0_83 = arith.constant 0 : index
    %c4_84 = arith.constant 4 : index
    %c1_85 = arith.constant 1 : index
    %c0_86 = arith.constant 0 : index
    %83 = vector.load %arg2[%c0_83, %c4_84, %c1_85, %c0_86] : memref<16x10x18x128xbf16, #tpu.memory_space<vmem>>, vector<16x1x16x128xbf16>
    %84 = vector.shape_cast %83 : vector<16x1x16x128xbf16> to vector<16x16x128xbf16>
    %85 = vector.shape_cast %84 : vector<16x16x128xbf16> to vector<256x128xbf16>
    %c12 = arith.constant 12 : index
    %c0_87 = arith.constant 0 : index
    %c0_88 = arith.constant 0 : index
    %86 = vector.load %arg3[%c12, %c0_87, %c0_88] : memref<25x128x256xbf16, #tpu.memory_space<vmem>>, vector<1x128x256xbf16>
    %87 = vector.shape_cast %86 : vector<1x128x256xbf16> to vector<128x256xbf16>
    %cst_89 = arith.constant dense<0.000000e+00> : vector<256x256xf32>
    %88 = tpu.matmul %85, %87, %cst_89 {dimension_numbers = #tpu.dot_dimension_numbers<[1], [0], [0], [1], [0, 0, 1, 1], [], []>} : vector<256x128xbf16>, vector<128x256xbf16>, vector<256x256xf32> -> vector<256x256xf32>
    %89 = arith.addf %82, %88 : vector<256x256xf32>
    %c0_90 = arith.constant 0 : index
    %c5_91 = arith.constant 5 : index
    %c1_92 = arith.constant 1 : index
    %c0_93 = arith.constant 0 : index
    %90 = vector.load %arg2[%c0_90, %c5_91, %c1_92, %c0_93] : memref<16x10x18x128xbf16, #tpu.memory_space<vmem>>, vector<16x1x16x128xbf16>
    %91 = vector.shape_cast %90 : vector<16x1x16x128xbf16> to vector<16x16x128xbf16>
    %92 = vector.shape_cast %91 : vector<16x16x128xbf16> to vector<256x128xbf16>
    %c13 = arith.constant 13 : index
    %c0_94 = arith.constant 0 : index
    %c0_95 = arith.constant 0 : index
    %93 = vector.load %arg3[%c13, %c0_94, %c0_95] : memref<25x128x256xbf16, #tpu.memory_space<vmem>>, vector<1x128x256xbf16>
    %94 = vector.shape_cast %93 : vector<1x128x256xbf16> to vector<128x256xbf16>
    %cst_96 = arith.constant dense<0.000000e+00> : vector<256x256xf32>
    %95 = tpu.matmul %92, %94, %cst_96 {dimension_numbers = #tpu.dot_dimension_numbers<[1], [0], [0], [1], [0, 0, 1, 1], [], []>} : vector<256x128xbf16>, vector<128x256xbf16>, vector<256x256xf32> -> vector<256x256xf32>
    %96 = arith.addf %89, %95 : vector<256x256xf32>
    %c0_97 = arith.constant 0 : index
    %c4_98 = arith.constant 4 : index
    %c2_99 = arith.constant 2 : index
    %c0_100 = arith.constant 0 : index
    %97 = vector.load %arg2[%c0_97, %c4_98, %c2_99, %c0_100] : memref<16x10x18x128xbf16, #tpu.memory_space<vmem>>, vector<16x1x16x128xbf16>
    %98 = vector.shape_cast %97 : vector<16x1x16x128xbf16> to vector<16x16x128xbf16>
    %99 = vector.shape_cast %98 : vector<16x16x128xbf16> to vector<256x128xbf16>
    %c14 = arith.constant 14 : index
    %c0_101 = arith.constant 0 : index
    %c0_102 = arith.constant 0 : index
    %100 = vector.load %arg3[%c14, %c0_101, %c0_102] : memref<25x128x256xbf16, #tpu.memory_space<vmem>>, vector<1x128x256xbf16>
    %101 = vector.shape_cast %100 : vector<1x128x256xbf16> to vector<128x256xbf16>
    %cst_103 = arith.constant dense<0.000000e+00> : vector<256x256xf32>
    %102 = tpu.matmul %99, %101, %cst_103 {dimension_numbers = #tpu.dot_dimension_numbers<[1], [0], [0], [1], [0, 0, 1, 1], [], []>} : vector<256x128xbf16>, vector<128x256xbf16>, vector<256x256xf32> -> vector<256x256xf32>
    %103 = arith.addf %96, %102 : vector<256x256xf32>
    %c0_104 = arith.constant 0 : index
    %c6_105 = arith.constant 6 : index
    %c0_106 = arith.constant 0 : index
    %c0_107 = arith.constant 0 : index
    %104 = vector.load %arg2[%c0_104, %c6_105, %c0_106, %c0_107] : memref<16x10x18x128xbf16, #tpu.memory_space<vmem>>, vector<16x1x16x128xbf16>
    %105 = vector.shape_cast %104 : vector<16x1x16x128xbf16> to vector<16x16x128xbf16>
    %106 = vector.shape_cast %105 : vector<16x16x128xbf16> to vector<256x128xbf16>
    %c15 = arith.constant 15 : index
    %c0_108 = arith.constant 0 : index
    %c0_109 = arith.constant 0 : index
    %107 = vector.load %arg3[%c15, %c0_108, %c0_109] : memref<25x128x256xbf16, #tpu.memory_space<vmem>>, vector<1x128x256xbf16>
    %108 = vector.shape_cast %107 : vector<1x128x256xbf16> to vector<128x256xbf16>
    %cst_110 = arith.constant dense<0.000000e+00> : vector<256x256xf32>
    %109 = tpu.matmul %106, %108, %cst_110 {dimension_numbers = #tpu.dot_dimension_numbers<[1], [0], [0], [1], [0, 0, 1, 1], [], []>} : vector<256x128xbf16>, vector<128x256xbf16>, vector<256x256xf32> -> vector<256x256xf32>
    %110 = arith.addf %103, %109 : vector<256x256xf32>
    %c0_111 = arith.constant 0 : index
    %c7_112 = arith.constant 7 : index
    %c0_113 = arith.constant 0 : index
    %c0_114 = arith.constant 0 : index
    %111 = vector.load %arg2[%c0_111, %c7_112, %c0_113, %c0_114] : memref<16x10x18x128xbf16, #tpu.memory_space<vmem>>, vector<16x1x16x128xbf16>
    %112 = vector.shape_cast %111 : vector<16x1x16x128xbf16> to vector<16x16x128xbf16>
    %113 = vector.shape_cast %112 : vector<16x16x128xbf16> to vector<256x128xbf16>
    %c16 = arith.constant 16 : index
    %c0_115 = arith.constant 0 : index
    %c0_116 = arith.constant 0 : index
    %114 = vector.load %arg3[%c16, %c0_115, %c0_116] : memref<25x128x256xbf16, #tpu.memory_space<vmem>>, vector<1x128x256xbf16>
    %115 = vector.shape_cast %114 : vector<1x128x256xbf16> to vector<128x256xbf16>
    %cst_117 = arith.constant dense<0.000000e+00> : vector<256x256xf32>
    %116 = tpu.matmul %113, %115, %cst_117 {dimension_numbers = #tpu.dot_dimension_numbers<[1], [0], [0], [1], [0, 0, 1, 1], [], []>} : vector<256x128xbf16>, vector<128x256xbf16>, vector<256x256xf32> -> vector<256x256xf32>
    %117 = arith.addf %110, %116 : vector<256x256xf32>
    %c0_118 = arith.constant 0 : index
    %c6_119 = arith.constant 6 : index
    %c1_120 = arith.constant 1 : index
    %c0_121 = arith.constant 0 : index
    %118 = vector.load %arg2[%c0_118, %c6_119, %c1_120, %c0_121] : memref<16x10x18x128xbf16, #tpu.memory_space<vmem>>, vector<16x1x16x128xbf16>
    %119 = vector.shape_cast %118 : vector<16x1x16x128xbf16> to vector<16x16x128xbf16>
    %120 = vector.shape_cast %119 : vector<16x16x128xbf16> to vector<256x128xbf16>
    %c17 = arith.constant 17 : index
    %c0_122 = arith.constant 0 : index
    %c0_123 = arith.constant 0 : index
    %121 = vector.load %arg3[%c17, %c0_122, %c0_123] : memref<25x128x256xbf16, #tpu.memory_space<vmem>>, vector<1x128x256xbf16>
    %122 = vector.shape_cast %121 : vector<1x128x256xbf16> to vector<128x256xbf16>
    %cst_124 = arith.constant dense<0.000000e+00> : vector<256x256xf32>
    %123 = tpu.matmul %120, %122, %cst_124 {dimension_numbers = #tpu.dot_dimension_numbers<[1], [0], [0], [1], [0, 0, 1, 1], [], []>} : vector<256x128xbf16>, vector<128x256xbf16>, vector<256x256xf32> -> vector<256x256xf32>
    %124 = arith.addf %117, %123 : vector<256x256xf32>
    %c0_125 = arith.constant 0 : index
    %c7_126 = arith.constant 7 : index
    %c1_127 = arith.constant 1 : index
    %c0_128 = arith.constant 0 : index
    %125 = vector.load %arg2[%c0_125, %c7_126, %c1_127, %c0_128] : memref<16x10x18x128xbf16, #tpu.memory_space<vmem>>, vector<16x1x16x128xbf16>
    %126 = vector.shape_cast %125 : vector<16x1x16x128xbf16> to vector<16x16x128xbf16>
    %127 = vector.shape_cast %126 : vector<16x16x128xbf16> to vector<256x128xbf16>
    %c18 = arith.constant 18 : index
    %c0_129 = arith.constant 0 : index
    %c0_130 = arith.constant 0 : index
    %128 = vector.load %arg3[%c18, %c0_129, %c0_130] : memref<25x128x256xbf16, #tpu.memory_space<vmem>>, vector<1x128x256xbf16>
    %129 = vector.shape_cast %128 : vector<1x128x256xbf16> to vector<128x256xbf16>
    %cst_131 = arith.constant dense<0.000000e+00> : vector<256x256xf32>
    %130 = tpu.matmul %127, %129, %cst_131 {dimension_numbers = #tpu.dot_dimension_numbers<[1], [0], [0], [1], [0, 0, 1, 1], [], []>} : vector<256x128xbf16>, vector<128x256xbf16>, vector<256x256xf32> -> vector<256x256xf32>
    %131 = arith.addf %124, %130 : vector<256x256xf32>
    %c0_132 = arith.constant 0 : index
    %c6_133 = arith.constant 6 : index
    %c2_134 = arith.constant 2 : index
    %c0_135 = arith.constant 0 : index
    %132 = vector.load %arg2[%c0_132, %c6_133, %c2_134, %c0_135] : memref<16x10x18x128xbf16, #tpu.memory_space<vmem>>, vector<16x1x16x128xbf16>
    %133 = vector.shape_cast %132 : vector<16x1x16x128xbf16> to vector<16x16x128xbf16>
    %134 = vector.shape_cast %133 : vector<16x16x128xbf16> to vector<256x128xbf16>
    %c19 = arith.constant 19 : index
    %c0_136 = arith.constant 0 : index
    %c0_137 = arith.constant 0 : index
    %135 = vector.load %arg3[%c19, %c0_136, %c0_137] : memref<25x128x256xbf16, #tpu.memory_space<vmem>>, vector<1x128x256xbf16>
    %136 = vector.shape_cast %135 : vector<1x128x256xbf16> to vector<128x256xbf16>
    %cst_138 = arith.constant dense<0.000000e+00> : vector<256x256xf32>
    %137 = tpu.matmul %134, %136, %cst_138 {dimension_numbers = #tpu.dot_dimension_numbers<[1], [0], [0], [1], [0, 0, 1, 1], [], []>} : vector<256x128xbf16>, vector<128x256xbf16>, vector<256x256xf32> -> vector<256x256xf32>
    %138 = arith.addf %131, %137 : vector<256x256xf32>
    %c0_139 = arith.constant 0 : index
    %c8_140 = arith.constant 8 : index
    %c0_141 = arith.constant 0 : index
    %c0_142 = arith.constant 0 : index
    %139 = vector.load %arg2[%c0_139, %c8_140, %c0_141, %c0_142] : memref<16x10x18x128xbf16, #tpu.memory_space<vmem>>, vector<16x1x16x128xbf16>
    %140 = vector.shape_cast %139 : vector<16x1x16x128xbf16> to vector<16x16x128xbf16>
    %141 = vector.shape_cast %140 : vector<16x16x128xbf16> to vector<256x128xbf16>
    %c20 = arith.constant 20 : index
    %c0_143 = arith.constant 0 : index
    %c0_144 = arith.constant 0 : index
    %142 = vector.load %arg3[%c20, %c0_143, %c0_144] : memref<25x128x256xbf16, #tpu.memory_space<vmem>>, vector<1x128x256xbf16>
    %143 = vector.shape_cast %142 : vector<1x128x256xbf16> to vector<128x256xbf16>
    %cst_145 = arith.constant dense<0.000000e+00> : vector<256x256xf32>
    %144 = tpu.matmul %141, %143, %cst_145 {dimension_numbers = #tpu.dot_dimension_numbers<[1], [0], [0], [1], [0, 0, 1, 1], [], []>} : vector<256x128xbf16>, vector<128x256xbf16>, vector<256x256xf32> -> vector<256x256xf32>
    %145 = arith.addf %138, %144 : vector<256x256xf32>
    %c0_146 = arith.constant 0 : index
    %c9_147 = arith.constant 9 : index
    %c0_148 = arith.constant 0 : index
    %c0_149 = arith.constant 0 : index
    %146 = vector.load %arg2[%c0_146, %c9_147, %c0_148, %c0_149] : memref<16x10x18x128xbf16, #tpu.memory_space<vmem>>, vector<16x1x16x128xbf16>
    %147 = vector.shape_cast %146 : vector<16x1x16x128xbf16> to vector<16x16x128xbf16>
    %148 = vector.shape_cast %147 : vector<16x16x128xbf16> to vector<256x128xbf16>
    %c21 = arith.constant 21 : index
    %c0_150 = arith.constant 0 : index
    %c0_151 = arith.constant 0 : index
    %149 = vector.load %arg3[%c21, %c0_150, %c0_151] : memref<25x128x256xbf16, #tpu.memory_space<vmem>>, vector<1x128x256xbf16>
    %150 = vector.shape_cast %149 : vector<1x128x256xbf16> to vector<128x256xbf16>
    %cst_152 = arith.constant dense<0.000000e+00> : vector<256x256xf32>
    %151 = tpu.matmul %148, %150, %cst_152 {dimension_numbers = #tpu.dot_dimension_numbers<[1], [0], [0], [1], [0, 0, 1, 1], [], []>} : vector<256x128xbf16>, vector<128x256xbf16>, vector<256x256xf32> -> vector<256x256xf32>
    %152 = arith.addf %145, %151 : vector<256x256xf32>
    %c0_153 = arith.constant 0 : index
    %c8_154 = arith.constant 8 : index
    %c1_155 = arith.constant 1 : index
    %c0_156 = arith.constant 0 : index
    %153 = vector.load %arg2[%c0_153, %c8_154, %c1_155, %c0_156] : memref<16x10x18x128xbf16, #tpu.memory_space<vmem>>, vector<16x1x16x128xbf16>
    %154 = vector.shape_cast %153 : vector<16x1x16x128xbf16> to vector<16x16x128xbf16>
    %155 = vector.shape_cast %154 : vector<16x16x128xbf16> to vector<256x128xbf16>
    %c22 = arith.constant 22 : index
    %c0_157 = arith.constant 0 : index
    %c0_158 = arith.constant 0 : index
    %156 = vector.load %arg3[%c22, %c0_157, %c0_158] : memref<25x128x256xbf16, #tpu.memory_space<vmem>>, vector<1x128x256xbf16>
    %157 = vector.shape_cast %156 : vector<1x128x256xbf16> to vector<128x256xbf16>
    %cst_159 = arith.constant dense<0.000000e+00> : vector<256x256xf32>
    %158 = tpu.matmul %155, %157, %cst_159 {dimension_numbers = #tpu.dot_dimension_numbers<[1], [0], [0], [1], [0, 0, 1, 1], [], []>} : vector<256x128xbf16>, vector<128x256xbf16>, vector<256x256xf32> -> vector<256x256xf32>
    %159 = arith.addf %152, %158 : vector<256x256xf32>
    %c0_160 = arith.constant 0 : index
    %c9_161 = arith.constant 9 : index
    %c1_162 = arith.constant 1 : index
    %c0_163 = arith.constant 0 : index
    %160 = vector.load %arg2[%c0_160, %c9_161, %c1_162, %c0_163] : memref<16x10x18x128xbf16, #tpu.memory_space<vmem>>, vector<16x1x16x128xbf16>
    %161 = vector.shape_cast %160 : vector<16x1x16x128xbf16> to vector<16x16x128xbf16>
    %162 = vector.shape_cast %161 : vector<16x16x128xbf16> to vector<256x128xbf16>
    %c23 = arith.constant 23 : index
    %c0_164 = arith.constant 0 : index
    %c0_165 = arith.constant 0 : index
    %163 = vector.load %arg3[%c23, %c0_164, %c0_165] : memref<25x128x256xbf16, #tpu.memory_space<vmem>>, vector<1x128x256xbf16>
    %164 = vector.shape_cast %163 : vector<1x128x256xbf16> to vector<128x256xbf16>
    %cst_166 = arith.constant dense<0.000000e+00> : vector<256x256xf32>
    %165 = tpu.matmul %162, %164, %cst_166 {dimension_numbers = #tpu.dot_dimension_numbers<[1], [0], [0], [1], [0, 0, 1, 1], [], []>} : vector<256x128xbf16>, vector<128x256xbf16>, vector<256x256xf32> -> vector<256x256xf32>
    %166 = arith.addf %159, %165 : vector<256x256xf32>
    %c0_167 = arith.constant 0 : index
    %c8_168 = arith.constant 8 : index
    %c2_169 = arith.constant 2 : index
    %c0_170 = arith.constant 0 : index
    %167 = vector.load %arg2[%c0_167, %c8_168, %c2_169, %c0_170] : memref<16x10x18x128xbf16, #tpu.memory_space<vmem>>, vector<16x1x16x128xbf16>
    %168 = vector.shape_cast %167 : vector<16x1x16x128xbf16> to vector<16x16x128xbf16>
    %169 = vector.shape_cast %168 : vector<16x16x128xbf16> to vector<256x128xbf16>
    %c24 = arith.constant 24 : index
    %c0_171 = arith.constant 0 : index
    %c0_172 = arith.constant 0 : index
    %170 = vector.load %arg3[%c24, %c0_171, %c0_172] : memref<25x128x256xbf16, #tpu.memory_space<vmem>>, vector<1x128x256xbf16>
    %171 = vector.shape_cast %170 : vector<1x128x256xbf16> to vector<128x256xbf16>
    %cst_173 = arith.constant dense<0.000000e+00> : vector<256x256xf32>
    %172 = tpu.matmul %169, %171, %cst_173 {dimension_numbers = #tpu.dot_dimension_numbers<[1], [0], [0], [1], [0, 0, 1, 1], [], []>} : vector<256x128xbf16>, vector<128x256xbf16>, vector<256x256xf32> -> vector<256x256xf32>
    %173 = arith.addf %166, %172 : vector<256x256xf32>
    %c0_174 = arith.constant 0 : index
    %c0_175 = arith.constant 0 : index
    %174 = vector.load %arg4[%c0_174, %c0_175] : memref<1x256xf32, #tpu.memory_space<vmem>>, vector<1x256xf32>
    %175 = vector.broadcast %174 : vector<1x256xf32> to vector<256x256xf32>
    %176 = arith.mulf %173, %175 : vector<256x256xf32>
    %c0_176 = arith.constant 0 : index
    %c0_177 = arith.constant 0 : index
    %177 = vector.load %arg5[%c0_176, %c0_177] : memref<1x256xf32, #tpu.memory_space<vmem>>, vector<1x256xf32>
    %178 = vector.broadcast %177 : vector<1x256xf32> to vector<256x256xf32>
    %179 = arith.addf %176, %178 : vector<256x256xf32>
    %cst_178 = arith.constant 0.000000e+00 : f32
    %180 = vector.broadcast %cst_178 : f32 to vector<256x256xf32>
    %181 = arith.cmpf oge, %179, %180 : vector<256x256xf32>
    %cst_179 = arith.constant 1.000000e-01 : f32
    %182 = vector.broadcast %cst_179 : f32 to vector<256x256xf32>
    %183 = arith.mulf %182, %179 : vector<256x256xf32>
    %184 = arith.select %181, %179, %183 : vector<256x256xi1>, vector<256x256xf32>
    %185 = vector.shape_cast %184 : vector<256x256xf32> to vector<16x16x256xf32>
    %186 = arith.truncf %185 : vector<16x16x256xf32> to vector<16x16x256xbf16>
    %c0_180 = arith.constant 0 : index
    %c0_181 = arith.constant 0 : index
    %c0_182 = arith.constant 0 : index
    %187 = vector.load %arg6[%c0_180, %c0_181, %c0_182] : memref<16x16x256xbf16, #tpu.memory_space<vmem>>, vector<16x16x256xbf16>
    tpu.vector_store %arg6[%c0_180, %c0_181, %c0_182], %186 {strides = array<i32>} : memref<16x16x256xbf16, #tpu.memory_space<vmem>>, vector<16x16x256xbf16>,
    return
  }
  func.func @transform_0(%arg0: i32, %arg1: i32) -> (i32, i32, i32, i32) {
    %c0_i32 = arith.constant 0 : i32
    %c0_i32_0 = arith.constant 0 : i32
    %c0_i32_1 = arith.constant 0 : i32
    %c0_i32_2 = arith.constant 0 : i32
    return %arg1, %c0_i32, %c0_i32_0, %c0_i32_1 : i32, i32, i32, i32
  }
  func.func @transform_1(%arg0: i32, %arg1: i32) -> (i32, i32, i32) {
    %c0_i32 = arith.constant 0 : i32
    %c0_i32_0 = arith.constant 0 : i32
    %c0_i32_1 = arith.constant 0 : i32
    return %c0_i32, %c0_i32_0, %arg0 : i32, i32, i32
  }
  func.func @transform_2(%arg0: i32, %arg1: i32) -> (i32, i32) {
    %c0_i32 = arith.constant 0 : i32
    %c0_i32_0 = arith.constant 0 : i32
    return %c0_i32, %arg0 : i32, i32
  }
  func.func @transform_3(%arg0: i32, %arg1: i32) -> (i32, i32) {
    %c0_i32 = arith.constant 0 : i32
    %c0_i32_0 = arith.constant 0 : i32
    return %c0_i32, %arg0 : i32, i32
  }
  func.func @transform_4(%arg0: i32, %arg1: i32) -> (i32, i32, i32) {
    %c0_i32 = arith.constant 0 : i32
    %c0_i32_0 = arith.constant 0 : i32
    return %arg1, %c0_i32, %arg0 : i32, i32, i32
  }
}

module attributes {stable_mosaic.version = 11 : i64} {
  func.func @kernel(%arg0: i32, %arg1: i32, %arg2: memref<16x3x18x256xbf16, #tpu.memory_space<vmem>>, %arg3: memref<9x256x256xbf16, #tpu.memory_space<vmem>>, %arg4: memref<1x256xf32, #tpu.memory_space<vmem>>, %arg5: memref<1x256xf32, #tpu.memory_space<vmem>>, %arg6: memref<16x16x256xbf16, #tpu.memory_space<vmem>>) attributes {dimension_semantics = [#tpu.dimension_semantics<parallel>, #tpu.dimension_semantics<parallel>], iteration_bounds = array<i64: 1, 2>, scalar_prefetch = 0 : i64, scratch_operands = 0 : i64, tpu.core_type = #tpu.core_type<tc>, window_params = [{transform_indices = @transform_0, window_bounds = array<i64: 16, 3, 18, 256>}, {transform_indices = @transform_1, window_bounds = array<i64: 9, 256, 256>}, {transform_indices = @transform_2, window_bounds = array<i64: 1, 256>}, {transform_indices = @transform_3, window_bounds = array<i64: 1, 256>}, {transform_indices = @transform_4, window_bounds = array<i64: 16, 16, 256>}]} {
    %c0 = arith.constant 0 : index
    %c0_0 = arith.constant 0 : index
    %c0_1 = arith.constant 0 : index
    %c0_2 = arith.constant 0 : index
    %0 = vector.load %arg2[%c0, %c0_0, %c0_1, %c0_2] : memref<16x3x18x256xbf16, #tpu.memory_space<vmem>>, vector<16x1x16x256xbf16>
    %1 = vector.shape_cast %0 : vector<16x1x16x256xbf16> to vector<16x16x256xbf16>
    %2 = vector.shape_cast %1 : vector<16x16x256xbf16> to vector<256x256xbf16>
    %c0_3 = arith.constant 0 : index
    %c0_4 = arith.constant 0 : index
    %c0_5 = arith.constant 0 : index
    %3 = vector.load %arg3[%c0_3, %c0_4, %c0_5] : memref<9x256x256xbf16, #tpu.memory_space<vmem>>, vector<1x256x256xbf16>
    %4 = vector.shape_cast %3 : vector<1x256x256xbf16> to vector<256x256xbf16>
    %cst = arith.constant dense<0.000000e+00> : vector<256x256xf32>
    %5 = tpu.matmul %2, %4, %cst {dimension_numbers = #tpu.dot_dimension_numbers<[1], [0], [0], [1], [0, 0, 1, 1], [], []>} : vector<256x256xbf16>, vector<256x256xbf16>, vector<256x256xf32> -> vector<256x256xf32>
    %c0_6 = arith.constant 0 : index
    %c0_7 = arith.constant 0 : index
    %c1 = arith.constant 1 : index
    %c0_8 = arith.constant 0 : index
    %6 = vector.load %arg2[%c0_6, %c0_7, %c1, %c0_8] : memref<16x3x18x256xbf16, #tpu.memory_space<vmem>>, vector<16x1x16x256xbf16>
    %7 = vector.shape_cast %6 : vector<16x1x16x256xbf16> to vector<16x16x256xbf16>
    %8 = vector.shape_cast %7 : vector<16x16x256xbf16> to vector<256x256xbf16>
    %c1_9 = arith.constant 1 : index
    %c0_10 = arith.constant 0 : index
    %c0_11 = arith.constant 0 : index
    %9 = vector.load %arg3[%c1_9, %c0_10, %c0_11] : memref<9x256x256xbf16, #tpu.memory_space<vmem>>, vector<1x256x256xbf16>
    %10 = vector.shape_cast %9 : vector<1x256x256xbf16> to vector<256x256xbf16>
    %cst_12 = arith.constant dense<0.000000e+00> : vector<256x256xf32>
    %11 = tpu.matmul %8, %10, %cst_12 {dimension_numbers = #tpu.dot_dimension_numbers<[1], [0], [0], [1], [0, 0, 1, 1], [], []>} : vector<256x256xbf16>, vector<256x256xbf16>, vector<256x256xf32> -> vector<256x256xf32>
    %12 = arith.addf %5, %11 : vector<256x256xf32>
    %c0_13 = arith.constant 0 : index
    %c0_14 = arith.constant 0 : index
    %c2 = arith.constant 2 : index
    %c0_15 = arith.constant 0 : index
    %13 = vector.load %arg2[%c0_13, %c0_14, %c2, %c0_15] : memref<16x3x18x256xbf16, #tpu.memory_space<vmem>>, vector<16x1x16x256xbf16>
    %14 = vector.shape_cast %13 : vector<16x1x16x256xbf16> to vector<16x16x256xbf16>
    %15 = vector.shape_cast %14 : vector<16x16x256xbf16> to vector<256x256xbf16>
    %c2_16 = arith.constant 2 : index
    %c0_17 = arith.constant 0 : index
    %c0_18 = arith.constant 0 : index
    %16 = vector.load %arg3[%c2_16, %c0_17, %c0_18] : memref<9x256x256xbf16, #tpu.memory_space<vmem>>, vector<1x256x256xbf16>
    %17 = vector.shape_cast %16 : vector<1x256x256xbf16> to vector<256x256xbf16>
    %cst_19 = arith.constant dense<0.000000e+00> : vector<256x256xf32>
    %18 = tpu.matmul %15, %17, %cst_19 {dimension_numbers = #tpu.dot_dimension_numbers<[1], [0], [0], [1], [0, 0, 1, 1], [], []>} : vector<256x256xbf16>, vector<256x256xbf16>, vector<256x256xf32> -> vector<256x256xf32>
    %19 = arith.addf %12, %18 : vector<256x256xf32>
    %c0_20 = arith.constant 0 : index
    %c1_21 = arith.constant 1 : index
    %c0_22 = arith.constant 0 : index
    %c0_23 = arith.constant 0 : index
    %20 = vector.load %arg2[%c0_20, %c1_21, %c0_22, %c0_23] : memref<16x3x18x256xbf16, #tpu.memory_space<vmem>>, vector<16x1x16x256xbf16>
    %21 = vector.shape_cast %20 : vector<16x1x16x256xbf16> to vector<16x16x256xbf16>
    %22 = vector.shape_cast %21 : vector<16x16x256xbf16> to vector<256x256xbf16>
    %c3 = arith.constant 3 : index
    %c0_24 = arith.constant 0 : index
    %c0_25 = arith.constant 0 : index
    %23 = vector.load %arg3[%c3, %c0_24, %c0_25] : memref<9x256x256xbf16, #tpu.memory_space<vmem>>, vector<1x256x256xbf16>
    %24 = vector.shape_cast %23 : vector<1x256x256xbf16> to vector<256x256xbf16>
    %cst_26 = arith.constant dense<0.000000e+00> : vector<256x256xf32>
    %25 = tpu.matmul %22, %24, %cst_26 {dimension_numbers = #tpu.dot_dimension_numbers<[1], [0], [0], [1], [0, 0, 1, 1], [], []>} : vector<256x256xbf16>, vector<256x256xbf16>, vector<256x256xf32> -> vector<256x256xf32>
    %26 = arith.addf %19, %25 : vector<256x256xf32>
    %c0_27 = arith.constant 0 : index
    %c1_28 = arith.constant 1 : index
    %c1_29 = arith.constant 1 : index
    %c0_30 = arith.constant 0 : index
    %27 = vector.load %arg2[%c0_27, %c1_28, %c1_29, %c0_30] : memref<16x3x18x256xbf16, #tpu.memory_space<vmem>>, vector<16x1x16x256xbf16>
    %28 = vector.shape_cast %27 : vector<16x1x16x256xbf16> to vector<16x16x256xbf16>
    %29 = vector.shape_cast %28 : vector<16x16x256xbf16> to vector<256x256xbf16>
    %c4 = arith.constant 4 : index
    %c0_31 = arith.constant 0 : index
    %c0_32 = arith.constant 0 : index
    %30 = vector.load %arg3[%c4, %c0_31, %c0_32] : memref<9x256x256xbf16, #tpu.memory_space<vmem>>, vector<1x256x256xbf16>
    %31 = vector.shape_cast %30 : vector<1x256x256xbf16> to vector<256x256xbf16>
    %cst_33 = arith.constant dense<0.000000e+00> : vector<256x256xf32>
    %32 = tpu.matmul %29, %31, %cst_33 {dimension_numbers = #tpu.dot_dimension_numbers<[1], [0], [0], [1], [0, 0, 1, 1], [], []>} : vector<256x256xbf16>, vector<256x256xbf16>, vector<256x256xf32> -> vector<256x256xf32>
    %33 = arith.addf %26, %32 : vector<256x256xf32>
    %c0_34 = arith.constant 0 : index
    %c1_35 = arith.constant 1 : index
    %c2_36 = arith.constant 2 : index
    %c0_37 = arith.constant 0 : index
    %34 = vector.load %arg2[%c0_34, %c1_35, %c2_36, %c0_37] : memref<16x3x18x256xbf16, #tpu.memory_space<vmem>>, vector<16x1x16x256xbf16>
    %35 = vector.shape_cast %34 : vector<16x1x16x256xbf16> to vector<16x16x256xbf16>
    %36 = vector.shape_cast %35 : vector<16x16x256xbf16> to vector<256x256xbf16>
    %c5 = arith.constant 5 : index
    %c0_38 = arith.constant 0 : index
    %c0_39 = arith.constant 0 : index
    %37 = vector.load %arg3[%c5, %c0_38, %c0_39] : memref<9x256x256xbf16, #tpu.memory_space<vmem>>, vector<1x256x256xbf16>
    %38 = vector.shape_cast %37 : vector<1x256x256xbf16> to vector<256x256xbf16>
    %cst_40 = arith.constant dense<0.000000e+00> : vector<256x256xf32>
    %39 = tpu.matmul %36, %38, %cst_40 {dimension_numbers = #tpu.dot_dimension_numbers<[1], [0], [0], [1], [0, 0, 1, 1], [], []>} : vector<256x256xbf16>, vector<256x256xbf16>, vector<256x256xf32> -> vector<256x256xf32>
    %40 = arith.addf %33, %39 : vector<256x256xf32>
    %c0_41 = arith.constant 0 : index
    %c2_42 = arith.constant 2 : index
    %c0_43 = arith.constant 0 : index
    %c0_44 = arith.constant 0 : index
    %41 = vector.load %arg2[%c0_41, %c2_42, %c0_43, %c0_44] : memref<16x3x18x256xbf16, #tpu.memory_space<vmem>>, vector<16x1x16x256xbf16>
    %42 = vector.shape_cast %41 : vector<16x1x16x256xbf16> to vector<16x16x256xbf16>
    %43 = vector.shape_cast %42 : vector<16x16x256xbf16> to vector<256x256xbf16>
    %c6 = arith.constant 6 : index
    %c0_45 = arith.constant 0 : index
    %c0_46 = arith.constant 0 : index
    %44 = vector.load %arg3[%c6, %c0_45, %c0_46] : memref<9x256x256xbf16, #tpu.memory_space<vmem>>, vector<1x256x256xbf16>
    %45 = vector.shape_cast %44 : vector<1x256x256xbf16> to vector<256x256xbf16>
    %cst_47 = arith.constant dense<0.000000e+00> : vector<256x256xf32>
    %46 = tpu.matmul %43, %45, %cst_47 {dimension_numbers = #tpu.dot_dimension_numbers<[1], [0], [0], [1], [0, 0, 1, 1], [], []>} : vector<256x256xbf16>, vector<256x256xbf16>, vector<256x256xf32> -> vector<256x256xf32>
    %47 = arith.addf %40, %46 : vector<256x256xf32>
    %c0_48 = arith.constant 0 : index
    %c2_49 = arith.constant 2 : index
    %c1_50 = arith.constant 1 : index
    %c0_51 = arith.constant 0 : index
    %48 = vector.load %arg2[%c0_48, %c2_49, %c1_50, %c0_51] : memref<16x3x18x256xbf16, #tpu.memory_space<vmem>>, vector<16x1x16x256xbf16>
    %49 = vector.shape_cast %48 : vector<16x1x16x256xbf16> to vector<16x16x256xbf16>
    %50 = vector.shape_cast %49 : vector<16x16x256xbf16> to vector<256x256xbf16>
    %c7 = arith.constant 7 : index
    %c0_52 = arith.constant 0 : index
    %c0_53 = arith.constant 0 : index
    %51 = vector.load %arg3[%c7, %c0_52, %c0_53] : memref<9x256x256xbf16, #tpu.memory_space<vmem>>, vector<1x256x256xbf16>
    %52 = vector.shape_cast %51 : vector<1x256x256xbf16> to vector<256x256xbf16>
    %cst_54 = arith.constant dense<0.000000e+00> : vector<256x256xf32>
    %53 = tpu.matmul %50, %52, %cst_54 {dimension_numbers = #tpu.dot_dimension_numbers<[1], [0], [0], [1], [0, 0, 1, 1], [], []>} : vector<256x256xbf16>, vector<256x256xbf16>, vector<256x256xf32> -> vector<256x256xf32>
    %54 = arith.addf %47, %53 : vector<256x256xf32>
    %c0_55 = arith.constant 0 : index
    %c2_56 = arith.constant 2 : index
    %c2_57 = arith.constant 2 : index
    %c0_58 = arith.constant 0 : index
    %55 = vector.load %arg2[%c0_55, %c2_56, %c2_57, %c0_58] : memref<16x3x18x256xbf16, #tpu.memory_space<vmem>>, vector<16x1x16x256xbf16>
    %56 = vector.shape_cast %55 : vector<16x1x16x256xbf16> to vector<16x16x256xbf16>
    %57 = vector.shape_cast %56 : vector<16x16x256xbf16> to vector<256x256xbf16>
    %c8 = arith.constant 8 : index
    %c0_59 = arith.constant 0 : index
    %c0_60 = arith.constant 0 : index
    %58 = vector.load %arg3[%c8, %c0_59, %c0_60] : memref<9x256x256xbf16, #tpu.memory_space<vmem>>, vector<1x256x256xbf16>
    %59 = vector.shape_cast %58 : vector<1x256x256xbf16> to vector<256x256xbf16>
    %cst_61 = arith.constant dense<0.000000e+00> : vector<256x256xf32>
    %60 = tpu.matmul %57, %59, %cst_61 {dimension_numbers = #tpu.dot_dimension_numbers<[1], [0], [0], [1], [0, 0, 1, 1], [], []>} : vector<256x256xbf16>, vector<256x256xbf16>, vector<256x256xf32> -> vector<256x256xf32>
    %61 = arith.addf %54, %60 : vector<256x256xf32>
    %c0_62 = arith.constant 0 : index
    %c0_63 = arith.constant 0 : index
    %62 = vector.load %arg4[%c0_62, %c0_63] : memref<1x256xf32, #tpu.memory_space<vmem>>, vector<1x256xf32>
    %63 = vector.broadcast %62 : vector<1x256xf32> to vector<256x256xf32>
    %64 = arith.mulf %61, %63 : vector<256x256xf32>
    %c0_64 = arith.constant 0 : index
    %c0_65 = arith.constant 0 : index
    %65 = vector.load %arg5[%c0_64, %c0_65] : memref<1x256xf32, #tpu.memory_space<vmem>>, vector<1x256xf32>
    %66 = vector.broadcast %65 : vector<1x256xf32> to vector<256x256xf32>
    %67 = arith.addf %64, %66 : vector<256x256xf32>
    %cst_66 = arith.constant 0.000000e+00 : f32
    %68 = vector.broadcast %cst_66 : f32 to vector<256x256xf32>
    %69 = arith.cmpf oge, %67, %68 : vector<256x256xf32>
    %cst_67 = arith.constant 1.000000e-01 : f32
    %70 = vector.broadcast %cst_67 : f32 to vector<256x256xf32>
    %71 = arith.mulf %70, %67 : vector<256x256xf32>
    %72 = arith.select %69, %67, %71 : vector<256x256xi1>, vector<256x256xf32>
    %73 = vector.shape_cast %72 : vector<256x256xf32> to vector<16x16x256xf32>
    %74 = arith.truncf %73 : vector<16x16x256xf32> to vector<16x16x256xbf16>
    %c0_68 = arith.constant 0 : index
    %c0_69 = arith.constant 0 : index
    %c0_70 = arith.constant 0 : index
    %75 = vector.load %arg6[%c0_68, %c0_69, %c0_70] : memref<16x16x256xbf16, #tpu.memory_space<vmem>>, vector<16x16x256xbf16>
    tpu.vector_store %arg6[%c0_68, %c0_69, %c0_70], %74 {strides = array<i32>} : memref<16x16x256xbf16, #tpu.memory_space<vmem>>, vector<16x16x256xbf16>,
    return
  }
  func.func @transform_0(%arg0: i32, %arg1: i32) -> (i32, i32, i32, i32) {
    %c0_i32 = arith.constant 0 : i32
    %c0_i32_0 = arith.constant 0 : i32
    %c0_i32_1 = arith.constant 0 : i32
    %c0_i32_2 = arith.constant 0 : i32
    return %arg1, %c0_i32, %c0_i32_0, %c0_i32_1 : i32, i32, i32, i32
  }
  func.func @transform_1(%arg0: i32, %arg1: i32) -> (i32, i32, i32) {
    %c0_i32 = arith.constant 0 : i32
    %c0_i32_0 = arith.constant 0 : i32
    %c0_i32_1 = arith.constant 0 : i32
    return %c0_i32, %c0_i32_0, %arg0 : i32, i32, i32
  }
  func.func @transform_2(%arg0: i32, %arg1: i32) -> (i32, i32) {
    %c0_i32 = arith.constant 0 : i32
    %c0_i32_0 = arith.constant 0 : i32
    return %c0_i32, %arg0 : i32, i32
  }
  func.func @transform_3(%arg0: i32, %arg1: i32) -> (i32, i32) {
    %c0_i32 = arith.constant 0 : i32
    %c0_i32_0 = arith.constant 0 : i32
    return %c0_i32, %arg0 : i32, i32
  }
  func.func @transform_4(%arg0: i32, %arg1: i32) -> (i32, i32, i32) {
    %c0_i32 = arith.constant 0 : i32
    %c0_i32_0 = arith.constant 0 : i32
    return %arg1, %c0_i32, %arg0 : i32, i32, i32
  }
}

module attributes {stable_mosaic.version = 11 : i64} {
  func.func @kernel(%arg0: i32, %arg1: i32, %arg2: memref<16x6x17x256xbf16, #tpu.memory_space<vmem>>, %arg3: memref<9x256x512xbf16, #tpu.memory_space<vmem>>, %arg4: memref<1x512xf32, #tpu.memory_space<vmem>>, %arg5: memref<1x512xf32, #tpu.memory_space<vmem>>, %arg6: memref<16x16x512xbf16, #tpu.memory_space<vmem>>) attributes {dimension_semantics = [#tpu.dimension_semantics<parallel>, #tpu.dimension_semantics<parallel>], iteration_bounds = array<i64: 1, 1>, scalar_prefetch = 0 : i64, scratch_operands = 0 : i64, tpu.core_type = #tpu.core_type<tc>, window_params = [{transform_indices = @transform_0, window_bounds = array<i64: 16, 6, 17, 256>}, {transform_indices = @transform_1, window_bounds = array<i64: 9, 256, 512>}, {transform_indices = @transform_2, window_bounds = array<i64: 1, 512>}, {transform_indices = @transform_3, window_bounds = array<i64: 1, 512>}, {transform_indices = @transform_4, window_bounds = array<i64: 16, 16, 512>}]} {
    %c0 = arith.constant 0 : index
    %c0_0 = arith.constant 0 : index
    %c0_1 = arith.constant 0 : index
    %c0_2 = arith.constant 0 : index
    %0 = vector.load %arg2[%c0, %c0_0, %c0_1, %c0_2] : memref<16x6x17x256xbf16, #tpu.memory_space<vmem>>, vector<16x1x16x256xbf16>
    %1 = vector.shape_cast %0 : vector<16x1x16x256xbf16> to vector<16x16x256xbf16>
    %2 = vector.shape_cast %1 : vector<16x16x256xbf16> to vector<256x256xbf16>
    %c0_3 = arith.constant 0 : index
    %c0_4 = arith.constant 0 : index
    %c0_5 = arith.constant 0 : index
    %3 = vector.load %arg3[%c0_3, %c0_4, %c0_5] : memref<9x256x512xbf16, #tpu.memory_space<vmem>>, vector<1x256x512xbf16>
    %4 = vector.shape_cast %3 : vector<1x256x512xbf16> to vector<256x512xbf16>
    %cst = arith.constant dense<0.000000e+00> : vector<256x512xf32>
    %5 = tpu.matmul %2, %4, %cst {dimension_numbers = #tpu.dot_dimension_numbers<[1], [0], [0], [1], [0, 0, 1, 1], [], []>} : vector<256x256xbf16>, vector<256x512xbf16>, vector<256x512xf32> -> vector<256x512xf32>
    %c0_6 = arith.constant 0 : index
    %c1 = arith.constant 1 : index
    %c0_7 = arith.constant 0 : index
    %c0_8 = arith.constant 0 : index
    %6 = vector.load %arg2[%c0_6, %c1, %c0_7, %c0_8] : memref<16x6x17x256xbf16, #tpu.memory_space<vmem>>, vector<16x1x16x256xbf16>
    %7 = vector.shape_cast %6 : vector<16x1x16x256xbf16> to vector<16x16x256xbf16>
    %8 = vector.shape_cast %7 : vector<16x16x256xbf16> to vector<256x256xbf16>
    %c1_9 = arith.constant 1 : index
    %c0_10 = arith.constant 0 : index
    %c0_11 = arith.constant 0 : index
    %9 = vector.load %arg3[%c1_9, %c0_10, %c0_11] : memref<9x256x512xbf16, #tpu.memory_space<vmem>>, vector<1x256x512xbf16>
    %10 = vector.shape_cast %9 : vector<1x256x512xbf16> to vector<256x512xbf16>
    %cst_12 = arith.constant dense<0.000000e+00> : vector<256x512xf32>
    %11 = tpu.matmul %8, %10, %cst_12 {dimension_numbers = #tpu.dot_dimension_numbers<[1], [0], [0], [1], [0, 0, 1, 1], [], []>} : vector<256x256xbf16>, vector<256x512xbf16>, vector<256x512xf32> -> vector<256x512xf32>
    %12 = arith.addf %5, %11 : vector<256x512xf32>
    %c0_13 = arith.constant 0 : index
    %c0_14 = arith.constant 0 : index
    %c1_15 = arith.constant 1 : index
    %c0_16 = arith.constant 0 : index
    %13 = vector.load %arg2[%c0_13, %c0_14, %c1_15, %c0_16] : memref<16x6x17x256xbf16, #tpu.memory_space<vmem>>, vector<16x1x16x256xbf16>
    %14 = vector.shape_cast %13 : vector<16x1x16x256xbf16> to vector<16x16x256xbf16>
    %15 = vector.shape_cast %14 : vector<16x16x256xbf16> to vector<256x256xbf16>
    %c2 = arith.constant 2 : index
    %c0_17 = arith.constant 0 : index
    %c0_18 = arith.constant 0 : index
    %16 = vector.load %arg3[%c2, %c0_17, %c0_18] : memref<9x256x512xbf16, #tpu.memory_space<vmem>>, vector<1x256x512xbf16>
    %17 = vector.shape_cast %16 : vector<1x256x512xbf16> to vector<256x512xbf16>
    %cst_19 = arith.constant dense<0.000000e+00> : vector<256x512xf32>
    %18 = tpu.matmul %15, %17, %cst_19 {dimension_numbers = #tpu.dot_dimension_numbers<[1], [0], [0], [1], [0, 0, 1, 1], [], []>} : vector<256x256xbf16>, vector<256x512xbf16>, vector<256x512xf32> -> vector<256x512xf32>
    %19 = arith.addf %12, %18 : vector<256x512xf32>
    %c0_20 = arith.constant 0 : index
    %c2_21 = arith.constant 2 : index
    %c0_22 = arith.constant 0 : index
    %c0_23 = arith.constant 0 : index
    %20 = vector.load %arg2[%c0_20, %c2_21, %c0_22, %c0_23] : memref<16x6x17x256xbf16, #tpu.memory_space<vmem>>, vector<16x1x16x256xbf16>
    %21 = vector.shape_cast %20 : vector<16x1x16x256xbf16> to vector<16x16x256xbf16>
    %22 = vector.shape_cast %21 : vector<16x16x256xbf16> to vector<256x256xbf16>
    %c3 = arith.constant 3 : index
    %c0_24 = arith.constant 0 : index
    %c0_25 = arith.constant 0 : index
    %23 = vector.load %arg3[%c3, %c0_24, %c0_25] : memref<9x256x512xbf16, #tpu.memory_space<vmem>>, vector<1x256x512xbf16>
    %24 = vector.shape_cast %23 : vector<1x256x512xbf16> to vector<256x512xbf16>
    %cst_26 = arith.constant dense<0.000000e+00> : vector<256x512xf32>
    %25 = tpu.matmul %22, %24, %cst_26 {dimension_numbers = #tpu.dot_dimension_numbers<[1], [0], [0], [1], [0, 0, 1, 1], [], []>} : vector<256x256xbf16>, vector<256x512xbf16>, vector<256x512xf32> -> vector<256x512xf32>
    %26 = arith.addf %19, %25 : vector<256x512xf32>
    %c0_27 = arith.constant 0 : index
    %c3_28 = arith.constant 3 : index
    %c0_29 = arith.constant 0 : index
    %c0_30 = arith.constant 0 : index
    %27 = vector.load %arg2[%c0_27, %c3_28, %c0_29, %c0_30] : memref<16x6x17x256xbf16, #tpu.memory_space<vmem>>, vector<16x1x16x256xbf16>
    %28 = vector.shape_cast %27 : vector<16x1x16x256xbf16> to vector<16x16x256xbf16>
    %29 = vector.shape_cast %28 : vector<16x16x256xbf16> to vector<256x256xbf16>
    %c4 = arith.constant 4 : index
    %c0_31 = arith.constant 0 : index
    %c0_32 = arith.constant 0 : index
    %30 = vector.load %arg3[%c4, %c0_31, %c0_32] : memref<9x256x512xbf16, #tpu.memory_space<vmem>>, vector<1x256x512xbf16>
    %31 = vector.shape_cast %30 : vector<1x256x512xbf16> to vector<256x512xbf16>
    %cst_33 = arith.constant dense<0.000000e+00> : vector<256x512xf32>
    %32 = tpu.matmul %29, %31, %cst_33 {dimension_numbers = #tpu.dot_dimension_numbers<[1], [0], [0], [1], [0, 0, 1, 1], [], []>} : vector<256x256xbf16>, vector<256x512xbf16>, vector<256x512xf32> -> vector<256x512xf32>
    %33 = arith.addf %26, %32 : vector<256x512xf32>
    %c0_34 = arith.constant 0 : index
    %c2_35 = arith.constant 2 : index
    %c1_36 = arith.constant 1 : index
    %c0_37 = arith.constant 0 : index
    %34 = vector.load %arg2[%c0_34, %c2_35, %c1_36, %c0_37] : memref<16x6x17x256xbf16, #tpu.memory_space<vmem>>, vector<16x1x16x256xbf16>
    %35 = vector.shape_cast %34 : vector<16x1x16x256xbf16> to vector<16x16x256xbf16>
    %36 = vector.shape_cast %35 : vector<16x16x256xbf16> to vector<256x256xbf16>
    %c5 = arith.constant 5 : index
    %c0_38 = arith.constant 0 : index
    %c0_39 = arith.constant 0 : index
    %37 = vector.load %arg3[%c5, %c0_38, %c0_39] : memref<9x256x512xbf16, #tpu.memory_space<vmem>>, vector<1x256x512xbf16>
    %38 = vector.shape_cast %37 : vector<1x256x512xbf16> to vector<256x512xbf16>
    %cst_40 = arith.constant dense<0.000000e+00> : vector<256x512xf32>
    %39 = tpu.matmul %36, %38, %cst_40 {dimension_numbers = #tpu.dot_dimension_numbers<[1], [0], [0], [1], [0, 0, 1, 1], [], []>} : vector<256x256xbf16>, vector<256x512xbf16>, vector<256x512xf32> -> vector<256x512xf32>
    %40 = arith.addf %33, %39 : vector<256x512xf32>
    %c0_41 = arith.constant 0 : index
    %c4_42 = arith.constant 4 : index
    %c0_43 = arith.constant 0 : index
    %c0_44 = arith.constant 0 : index
    %41 = vector.load %arg2[%c0_41, %c4_42, %c0_43, %c0_44] : memref<16x6x17x256xbf16, #tpu.memory_space<vmem>>, vector<16x1x16x256xbf16>
    %42 = vector.shape_cast %41 : vector<16x1x16x256xbf16> to vector<16x16x256xbf16>
    %43 = vector.shape_cast %42 : vector<16x16x256xbf16> to vector<256x256xbf16>
    %c6 = arith.constant 6 : index
    %c0_45 = arith.constant 0 : index
    %c0_46 = arith.constant 0 : index
    %44 = vector.load %arg3[%c6, %c0_45, %c0_46] : memref<9x256x512xbf16, #tpu.memory_space<vmem>>, vector<1x256x512xbf16>
    %45 = vector.shape_cast %44 : vector<1x256x512xbf16> to vector<256x512xbf16>
    %cst_47 = arith.constant dense<0.000000e+00> : vector<256x512xf32>
    %46 = tpu.matmul %43, %45, %cst_47 {dimension_numbers = #tpu.dot_dimension_numbers<[1], [0], [0], [1], [0, 0, 1, 1], [], []>} : vector<256x256xbf16>, vector<256x512xbf16>, vector<256x512xf32> -> vector<256x512xf32>
    %47 = arith.addf %40, %46 : vector<256x512xf32>
    %c0_48 = arith.constant 0 : index
    %c5_49 = arith.constant 5 : index
    %c0_50 = arith.constant 0 : index
    %c0_51 = arith.constant 0 : index
    %48 = vector.load %arg2[%c0_48, %c5_49, %c0_50, %c0_51] : memref<16x6x17x256xbf16, #tpu.memory_space<vmem>>, vector<16x1x16x256xbf16>
    %49 = vector.shape_cast %48 : vector<16x1x16x256xbf16> to vector<16x16x256xbf16>
    %50 = vector.shape_cast %49 : vector<16x16x256xbf16> to vector<256x256xbf16>
    %c7 = arith.constant 7 : index
    %c0_52 = arith.constant 0 : index
    %c0_53 = arith.constant 0 : index
    %51 = vector.load %arg3[%c7, %c0_52, %c0_53] : memref<9x256x512xbf16, #tpu.memory_space<vmem>>, vector<1x256x512xbf16>
    %52 = vector.shape_cast %51 : vector<1x256x512xbf16> to vector<256x512xbf16>
    %cst_54 = arith.constant dense<0.000000e+00> : vector<256x512xf32>
    %53 = tpu.matmul %50, %52, %cst_54 {dimension_numbers = #tpu.dot_dimension_numbers<[1], [0], [0], [1], [0, 0, 1, 1], [], []>} : vector<256x256xbf16>, vector<256x512xbf16>, vector<256x512xf32> -> vector<256x512xf32>
    %54 = arith.addf %47, %53 : vector<256x512xf32>
    %c0_55 = arith.constant 0 : index
    %c4_56 = arith.constant 4 : index
    %c1_57 = arith.constant 1 : index
    %c0_58 = arith.constant 0 : index
    %55 = vector.load %arg2[%c0_55, %c4_56, %c1_57, %c0_58] : memref<16x6x17x256xbf16, #tpu.memory_space<vmem>>, vector<16x1x16x256xbf16>
    %56 = vector.shape_cast %55 : vector<16x1x16x256xbf16> to vector<16x16x256xbf16>
    %57 = vector.shape_cast %56 : vector<16x16x256xbf16> to vector<256x256xbf16>
    %c8 = arith.constant 8 : index
    %c0_59 = arith.constant 0 : index
    %c0_60 = arith.constant 0 : index
    %58 = vector.load %arg3[%c8, %c0_59, %c0_60] : memref<9x256x512xbf16, #tpu.memory_space<vmem>>, vector<1x256x512xbf16>
    %59 = vector.shape_cast %58 : vector<1x256x512xbf16> to vector<256x512xbf16>
    %cst_61 = arith.constant dense<0.000000e+00> : vector<256x512xf32>
    %60 = tpu.matmul %57, %59, %cst_61 {dimension_numbers = #tpu.dot_dimension_numbers<[1], [0], [0], [1], [0, 0, 1, 1], [], []>} : vector<256x256xbf16>, vector<256x512xbf16>, vector<256x512xf32> -> vector<256x512xf32>
    %61 = arith.addf %54, %60 : vector<256x512xf32>
    %c0_62 = arith.constant 0 : index
    %c0_63 = arith.constant 0 : index
    %62 = vector.load %arg4[%c0_62, %c0_63] : memref<1x512xf32, #tpu.memory_space<vmem>>, vector<1x512xf32>
    %63 = vector.broadcast %62 : vector<1x512xf32> to vector<256x512xf32>
    %64 = arith.mulf %61, %63 : vector<256x512xf32>
    %c0_64 = arith.constant 0 : index
    %c0_65 = arith.constant 0 : index
    %65 = vector.load %arg5[%c0_64, %c0_65] : memref<1x512xf32, #tpu.memory_space<vmem>>, vector<1x512xf32>
    %66 = vector.broadcast %65 : vector<1x512xf32> to vector<256x512xf32>
    %67 = arith.addf %64, %66 : vector<256x512xf32>
    %cst_66 = arith.constant 0.000000e+00 : f32
    %68 = vector.broadcast %cst_66 : f32 to vector<256x512xf32>
    %69 = arith.cmpf oge, %67, %68 : vector<256x512xf32>
    %cst_67 = arith.constant 1.000000e-01 : f32
    %70 = vector.broadcast %cst_67 : f32 to vector<256x512xf32>
    %71 = arith.mulf %70, %67 : vector<256x512xf32>
    %72 = arith.select %69, %67, %71 : vector<256x512xi1>, vector<256x512xf32>
    %73 = vector.shape_cast %72 : vector<256x512xf32> to vector<16x16x512xf32>
    %74 = arith.truncf %73 : vector<16x16x512xf32> to vector<16x16x512xbf16>
    %c0_68 = arith.constant 0 : index
    %c0_69 = arith.constant 0 : index
    %c0_70 = arith.constant 0 : index
    %75 = vector.load %arg6[%c0_68, %c0_69, %c0_70] : memref<16x16x512xbf16, #tpu.memory_space<vmem>>, vector<16x16x512xbf16>
    tpu.vector_store %arg6[%c0_68, %c0_69, %c0_70], %74 {strides = array<i32>} : memref<16x16x512xbf16, #tpu.memory_space<vmem>>, vector<16x16x512xbf16>,
    return
  }
  func.func @transform_0(%arg0: i32, %arg1: i32) -> (i32, i32, i32, i32) {
    %c0_i32 = arith.constant 0 : i32
    %c0_i32_0 = arith.constant 0 : i32
    %c0_i32_1 = arith.constant 0 : i32
    %c0_i32_2 = arith.constant 0 : i32
    return %arg1, %c0_i32, %c0_i32_0, %c0_i32_1 : i32, i32, i32, i32
  }
  func.func @transform_1(%arg0: i32, %arg1: i32) -> (i32, i32, i32) {
    %c0_i32 = arith.constant 0 : i32
    %c0_i32_0 = arith.constant 0 : i32
    %c0_i32_1 = arith.constant 0 : i32
    return %c0_i32, %c0_i32_0, %arg0 : i32, i32, i32
  }
  func.func @transform_2(%arg0: i32, %arg1: i32) -> (i32, i32) {
    %c0_i32 = arith.constant 0 : i32
    %c0_i32_0 = arith.constant 0 : i32
    return %c0_i32, %arg0 : i32, i32
  }
  func.func @transform_3(%arg0: i32, %arg1: i32) -> (i32, i32) {
    %c0_i32 = arith.constant 0 : i32
    %c0_i32_0 = arith.constant 0 : i32
    return %c0_i32, %arg0 : i32, i32
  }
  func.func @transform_4(%arg0: i32, %arg1: i32) -> (i32, i32, i32) {
    %c0_i32 = arith.constant 0 : i32
    %c0_i32_0 = arith.constant 0 : i32
    return %arg1, %c0_i32, %arg0 : i32, i32, i32
  }
}

module attributes {stable_mosaic.version = 11 : i64} {
  func.func @kernel(%arg0: i32, %arg1: i32, %arg2: memref<16x3x18x512xbf16, #tpu.memory_space<vmem>>, %arg3: memref<9x512x512xbf16, #tpu.memory_space<vmem>>, %arg4: memref<1x512xf32, #tpu.memory_space<vmem>>, %arg5: memref<1x512xf32, #tpu.memory_space<vmem>>, %arg6: memref<16x16x512xbf16, #tpu.memory_space<vmem>>) attributes {dimension_semantics = [#tpu.dimension_semantics<parallel>, #tpu.dimension_semantics<parallel>], iteration_bounds = array<i64: 1, 1>, scalar_prefetch = 0 : i64, scratch_operands = 0 : i64, tpu.core_type = #tpu.core_type<tc>, window_params = [{transform_indices = @transform_0, window_bounds = array<i64: 16, 3, 18, 512>}, {transform_indices = @transform_1, window_bounds = array<i64: 9, 512, 512>}, {transform_indices = @transform_2, window_bounds = array<i64: 1, 512>}, {transform_indices = @transform_3, window_bounds = array<i64: 1, 512>}, {transform_indices = @transform_4, window_bounds = array<i64: 16, 16, 512>}]} {
    %c0 = arith.constant 0 : index
    %c0_0 = arith.constant 0 : index
    %c0_1 = arith.constant 0 : index
    %c0_2 = arith.constant 0 : index
    %0 = vector.load %arg2[%c0, %c0_0, %c0_1, %c0_2] : memref<16x3x18x512xbf16, #tpu.memory_space<vmem>>, vector<16x1x16x512xbf16>
    %1 = vector.shape_cast %0 : vector<16x1x16x512xbf16> to vector<16x16x512xbf16>
    %2 = vector.shape_cast %1 : vector<16x16x512xbf16> to vector<256x512xbf16>
    %c0_3 = arith.constant 0 : index
    %c0_4 = arith.constant 0 : index
    %c0_5 = arith.constant 0 : index
    %3 = vector.load %arg3[%c0_3, %c0_4, %c0_5] : memref<9x512x512xbf16, #tpu.memory_space<vmem>>, vector<1x512x512xbf16>
    %4 = vector.shape_cast %3 : vector<1x512x512xbf16> to vector<512x512xbf16>
    %cst = arith.constant dense<0.000000e+00> : vector<256x512xf32>
    %5 = tpu.matmul %2, %4, %cst {dimension_numbers = #tpu.dot_dimension_numbers<[1], [0], [0], [1], [0, 0, 1, 1], [], []>} : vector<256x512xbf16>, vector<512x512xbf16>, vector<256x512xf32> -> vector<256x512xf32>
    %c0_6 = arith.constant 0 : index
    %c0_7 = arith.constant 0 : index
    %c1 = arith.constant 1 : index
    %c0_8 = arith.constant 0 : index
    %6 = vector.load %arg2[%c0_6, %c0_7, %c1, %c0_8] : memref<16x3x18x512xbf16, #tpu.memory_space<vmem>>, vector<16x1x16x512xbf16>
    %7 = vector.shape_cast %6 : vector<16x1x16x512xbf16> to vector<16x16x512xbf16>
    %8 = vector.shape_cast %7 : vector<16x16x512xbf16> to vector<256x512xbf16>
    %c1_9 = arith.constant 1 : index
    %c0_10 = arith.constant 0 : index
    %c0_11 = arith.constant 0 : index
    %9 = vector.load %arg3[%c1_9, %c0_10, %c0_11] : memref<9x512x512xbf16, #tpu.memory_space<vmem>>, vector<1x512x512xbf16>
    %10 = vector.shape_cast %9 : vector<1x512x512xbf16> to vector<512x512xbf16>
    %cst_12 = arith.constant dense<0.000000e+00> : vector<256x512xf32>
    %11 = tpu.matmul %8, %10, %cst_12 {dimension_numbers = #tpu.dot_dimension_numbers<[1], [0], [0], [1], [0, 0, 1, 1], [], []>} : vector<256x512xbf16>, vector<512x512xbf16>, vector<256x512xf32> -> vector<256x512xf32>
    %12 = arith.addf %5, %11 : vector<256x512xf32>
    %c0_13 = arith.constant 0 : index
    %c0_14 = arith.constant 0 : index
    %c2 = arith.constant 2 : index
    %c0_15 = arith.constant 0 : index
    %13 = vector.load %arg2[%c0_13, %c0_14, %c2, %c0_15] : memref<16x3x18x512xbf16, #tpu.memory_space<vmem>>, vector<16x1x16x512xbf16>
    %14 = vector.shape_cast %13 : vector<16x1x16x512xbf16> to vector<16x16x512xbf16>
    %15 = vector.shape_cast %14 : vector<16x16x512xbf16> to vector<256x512xbf16>
    %c2_16 = arith.constant 2 : index
    %c0_17 = arith.constant 0 : index
    %c0_18 = arith.constant 0 : index
    %16 = vector.load %arg3[%c2_16, %c0_17, %c0_18] : memref<9x512x512xbf16, #tpu.memory_space<vmem>>, vector<1x512x512xbf16>
    %17 = vector.shape_cast %16 : vector<1x512x512xbf16> to vector<512x512xbf16>
    %cst_19 = arith.constant dense<0.000000e+00> : vector<256x512xf32>
    %18 = tpu.matmul %15, %17, %cst_19 {dimension_numbers = #tpu.dot_dimension_numbers<[1], [0], [0], [1], [0, 0, 1, 1], [], []>} : vector<256x512xbf16>, vector<512x512xbf16>, vector<256x512xf32> -> vector<256x512xf32>
    %19 = arith.addf %12, %18 : vector<256x512xf32>
    %c0_20 = arith.constant 0 : index
    %c1_21 = arith.constant 1 : index
    %c0_22 = arith.constant 0 : index
    %c0_23 = arith.constant 0 : index
    %20 = vector.load %arg2[%c0_20, %c1_21, %c0_22, %c0_23] : memref<16x3x18x512xbf16, #tpu.memory_space<vmem>>, vector<16x1x16x512xbf16>
    %21 = vector.shape_cast %20 : vector<16x1x16x512xbf16> to vector<16x16x512xbf16>
    %22 = vector.shape_cast %21 : vector<16x16x512xbf16> to vector<256x512xbf16>
    %c3 = arith.constant 3 : index
    %c0_24 = arith.constant 0 : index
    %c0_25 = arith.constant 0 : index
    %23 = vector.load %arg3[%c3, %c0_24, %c0_25] : memref<9x512x512xbf16, #tpu.memory_space<vmem>>, vector<1x512x512xbf16>
    %24 = vector.shape_cast %23 : vector<1x512x512xbf16> to vector<512x512xbf16>
    %cst_26 = arith.constant dense<0.000000e+00> : vector<256x512xf32>
    %25 = tpu.matmul %22, %24, %cst_26 {dimension_numbers = #tpu.dot_dimension_numbers<[1], [0], [0], [1], [0, 0, 1, 1], [], []>} : vector<256x512xbf16>, vector<512x512xbf16>, vector<256x512xf32> -> vector<256x512xf32>
    %26 = arith.addf %19, %25 : vector<256x512xf32>
    %c0_27 = arith.constant 0 : index
    %c1_28 = arith.constant 1 : index
    %c1_29 = arith.constant 1 : index
    %c0_30 = arith.constant 0 : index
    %27 = vector.load %arg2[%c0_27, %c1_28, %c1_29, %c0_30] : memref<16x3x18x512xbf16, #tpu.memory_space<vmem>>, vector<16x1x16x512xbf16>
    %28 = vector.shape_cast %27 : vector<16x1x16x512xbf16> to vector<16x16x512xbf16>
    %29 = vector.shape_cast %28 : vector<16x16x512xbf16> to vector<256x512xbf16>
    %c4 = arith.constant 4 : index
    %c0_31 = arith.constant 0 : index
    %c0_32 = arith.constant 0 : index
    %30 = vector.load %arg3[%c4, %c0_31, %c0_32] : memref<9x512x512xbf16, #tpu.memory_space<vmem>>, vector<1x512x512xbf16>
    %31 = vector.shape_cast %30 : vector<1x512x512xbf16> to vector<512x512xbf16>
    %cst_33 = arith.constant dense<0.000000e+00> : vector<256x512xf32>
    %32 = tpu.matmul %29, %31, %cst_33 {dimension_numbers = #tpu.dot_dimension_numbers<[1], [0], [0], [1], [0, 0, 1, 1], [], []>} : vector<256x512xbf16>, vector<512x512xbf16>, vector<256x512xf32> -> vector<256x512xf32>
    %33 = arith.addf %26, %32 : vector<256x512xf32>
    %c0_34 = arith.constant 0 : index
    %c1_35 = arith.constant 1 : index
    %c2_36 = arith.constant 2 : index
    %c0_37 = arith.constant 0 : index
    %34 = vector.load %arg2[%c0_34, %c1_35, %c2_36, %c0_37] : memref<16x3x18x512xbf16, #tpu.memory_space<vmem>>, vector<16x1x16x512xbf16>
    %35 = vector.shape_cast %34 : vector<16x1x16x512xbf16> to vector<16x16x512xbf16>
    %36 = vector.shape_cast %35 : vector<16x16x512xbf16> to vector<256x512xbf16>
    %c5 = arith.constant 5 : index
    %c0_38 = arith.constant 0 : index
    %c0_39 = arith.constant 0 : index
    %37 = vector.load %arg3[%c5, %c0_38, %c0_39] : memref<9x512x512xbf16, #tpu.memory_space<vmem>>, vector<1x512x512xbf16>
    %38 = vector.shape_cast %37 : vector<1x512x512xbf16> to vector<512x512xbf16>
    %cst_40 = arith.constant dense<0.000000e+00> : vector<256x512xf32>
    %39 = tpu.matmul %36, %38, %cst_40 {dimension_numbers = #tpu.dot_dimension_numbers<[1], [0], [0], [1], [0, 0, 1, 1], [], []>} : vector<256x512xbf16>, vector<512x512xbf16>, vector<256x512xf32> -> vector<256x512xf32>
    %40 = arith.addf %33, %39 : vector<256x512xf32>
    %c0_41 = arith.constant 0 : index
    %c2_42 = arith.constant 2 : index
    %c0_43 = arith.constant 0 : index
    %c0_44 = arith.constant 0 : index
    %41 = vector.load %arg2[%c0_41, %c2_42, %c0_43, %c0_44] : memref<16x3x18x512xbf16, #tpu.memory_space<vmem>>, vector<16x1x16x512xbf16>
    %42 = vector.shape_cast %41 : vector<16x1x16x512xbf16> to vector<16x16x512xbf16>
    %43 = vector.shape_cast %42 : vector<16x16x512xbf16> to vector<256x512xbf16>
    %c6 = arith.constant 6 : index
    %c0_45 = arith.constant 0 : index
    %c0_46 = arith.constant 0 : index
    %44 = vector.load %arg3[%c6, %c0_45, %c0_46] : memref<9x512x512xbf16, #tpu.memory_space<vmem>>, vector<1x512x512xbf16>
    %45 = vector.shape_cast %44 : vector<1x512x512xbf16> to vector<512x512xbf16>
    %cst_47 = arith.constant dense<0.000000e+00> : vector<256x512xf32>
    %46 = tpu.matmul %43, %45, %cst_47 {dimension_numbers = #tpu.dot_dimension_numbers<[1], [0], [0], [1], [0, 0, 1, 1], [], []>} : vector<256x512xbf16>, vector<512x512xbf16>, vector<256x512xf32> -> vector<256x512xf32>
    %47 = arith.addf %40, %46 : vector<256x512xf32>
    %c0_48 = arith.constant 0 : index
    %c2_49 = arith.constant 2 : index
    %c1_50 = arith.constant 1 : index
    %c0_51 = arith.constant 0 : index
    %48 = vector.load %arg2[%c0_48, %c2_49, %c1_50, %c0_51] : memref<16x3x18x512xbf16, #tpu.memory_space<vmem>>, vector<16x1x16x512xbf16>
    %49 = vector.shape_cast %48 : vector<16x1x16x512xbf16> to vector<16x16x512xbf16>
    %50 = vector.shape_cast %49 : vector<16x16x512xbf16> to vector<256x512xbf16>
    %c7 = arith.constant 7 : index
    %c0_52 = arith.constant 0 : index
    %c0_53 = arith.constant 0 : index
    %51 = vector.load %arg3[%c7, %c0_52, %c0_53] : memref<9x512x512xbf16, #tpu.memory_space<vmem>>, vector<1x512x512xbf16>
    %52 = vector.shape_cast %51 : vector<1x512x512xbf16> to vector<512x512xbf16>
    %cst_54 = arith.constant dense<0.000000e+00> : vector<256x512xf32>
    %53 = tpu.matmul %50, %52, %cst_54 {dimension_numbers = #tpu.dot_dimension_numbers<[1], [0], [0], [1], [0, 0, 1, 1], [], []>} : vector<256x512xbf16>, vector<512x512xbf16>, vector<256x512xf32> -> vector<256x512xf32>
    %54 = arith.addf %47, %53 : vector<256x512xf32>
    %c0_55 = arith.constant 0 : index
    %c2_56 = arith.constant 2 : index
    %c2_57 = arith.constant 2 : index
    %c0_58 = arith.constant 0 : index
    %55 = vector.load %arg2[%c0_55, %c2_56, %c2_57, %c0_58] : memref<16x3x18x512xbf16, #tpu.memory_space<vmem>>, vector<16x1x16x512xbf16>
    %56 = vector.shape_cast %55 : vector<16x1x16x512xbf16> to vector<16x16x512xbf16>
    %57 = vector.shape_cast %56 : vector<16x16x512xbf16> to vector<256x512xbf16>
    %c8 = arith.constant 8 : index
    %c0_59 = arith.constant 0 : index
    %c0_60 = arith.constant 0 : index
    %58 = vector.load %arg3[%c8, %c0_59, %c0_60] : memref<9x512x512xbf16, #tpu.memory_space<vmem>>, vector<1x512x512xbf16>
    %59 = vector.shape_cast %58 : vector<1x512x512xbf16> to vector<512x512xbf16>
    %cst_61 = arith.constant dense<0.000000e+00> : vector<256x512xf32>
    %60 = tpu.matmul %57, %59, %cst_61 {dimension_numbers = #tpu.dot_dimension_numbers<[1], [0], [0], [1], [0, 0, 1, 1], [], []>} : vector<256x512xbf16>, vector<512x512xbf16>, vector<256x512xf32> -> vector<256x512xf32>
    %61 = arith.addf %54, %60 : vector<256x512xf32>
    %c0_62 = arith.constant 0 : index
    %c0_63 = arith.constant 0 : index
    %62 = vector.load %arg4[%c0_62, %c0_63] : memref<1x512xf32, #tpu.memory_space<vmem>>, vector<1x512xf32>
    %63 = vector.broadcast %62 : vector<1x512xf32> to vector<256x512xf32>
    %64 = arith.mulf %61, %63 : vector<256x512xf32>
    %c0_64 = arith.constant 0 : index
    %c0_65 = arith.constant 0 : index
    %65 = vector.load %arg5[%c0_64, %c0_65] : memref<1x512xf32, #tpu.memory_space<vmem>>, vector<1x512xf32>
    %66 = vector.broadcast %65 : vector<1x512xf32> to vector<256x512xf32>
    %67 = arith.addf %64, %66 : vector<256x512xf32>
    %cst_66 = arith.constant 0.000000e+00 : f32
    %68 = vector.broadcast %cst_66 : f32 to vector<256x512xf32>
    %69 = arith.cmpf oge, %67, %68 : vector<256x512xf32>
    %cst_67 = arith.constant 1.000000e-01 : f32
    %70 = vector.broadcast %cst_67 : f32 to vector<256x512xf32>
    %71 = arith.mulf %70, %67 : vector<256x512xf32>
    %72 = arith.select %69, %67, %71 : vector<256x512xi1>, vector<256x512xf32>
    %73 = vector.shape_cast %72 : vector<256x512xf32> to vector<16x16x512xf32>
    %74 = arith.truncf %73 : vector<16x16x512xf32> to vector<16x16x512xbf16>
    %c0_68 = arith.constant 0 : index
    %c0_69 = arith.constant 0 : index
    %c0_70 = arith.constant 0 : index
    %75 = vector.load %arg6[%c0_68, %c0_69, %c0_70] : memref<16x16x512xbf16, #tpu.memory_space<vmem>>, vector<16x16x512xbf16>
    tpu.vector_store %arg6[%c0_68, %c0_69, %c0_70], %74 {strides = array<i32>} : memref<16x16x512xbf16, #tpu.memory_space<vmem>>, vector<16x16x512xbf16>,
    return
  }
  func.func @transform_0(%arg0: i32, %arg1: i32) -> (i32, i32, i32, i32) {
    %c0_i32 = arith.constant 0 : i32
    %c0_i32_0 = arith.constant 0 : i32
    %c0_i32_1 = arith.constant 0 : i32
    %c0_i32_2 = arith.constant 0 : i32
    return %arg1, %c0_i32, %c0_i32_0, %c0_i32_1 : i32, i32, i32, i32
  }
  func.func @transform_1(%arg0: i32, %arg1: i32) -> (i32, i32, i32) {
    %c0_i32 = arith.constant 0 : i32
    %c0_i32_0 = arith.constant 0 : i32
    %c0_i32_1 = arith.constant 0 : i32
    return %c0_i32, %c0_i32_0, %arg0 : i32, i32, i32
  }
  func.func @transform_2(%arg0: i32, %arg1: i32) -> (i32, i32) {
    %c0_i32 = arith.constant 0 : i32
    %c0_i32_0 = arith.constant 0 : i32
    return %c0_i32, %arg0 : i32, i32
  }
  func.func @transform_3(%arg0: i32, %arg1: i32) -> (i32, i32) {
    %c0_i32 = arith.constant 0 : i32
    %c0_i32_0 = arith.constant 0 : i32
    return %c0_i32, %arg0 : i32, i32
  }
  func.func @transform_4(%arg0: i32, %arg1: i32) -> (i32, i32, i32) {
    %c0_i32 = arith.constant 0 : i32
    %c0_i32_0 = arith.constant 0 : i32
    return %arg1, %c0_i32, %arg0 : i32, i32, i32
  }
}

module attributes {stable_mosaic.version = 11 : i64} {
  func.func @kernel(%arg0: i32, %arg1: i32, %arg2: memref<8x6x17x512xbf16, #tpu.memory_space<vmem>>, %arg3: memref<9x512x512xbf16, #tpu.memory_space<vmem>>, %arg4: memref<1x512xf32, #tpu.memory_space<vmem>>, %arg5: memref<1x512xf32, #tpu.memory_space<vmem>>, %arg6: memref<8x16x512xbf16, #tpu.memory_space<vmem>>) attributes {dimension_semantics = [#tpu.dimension_semantics<parallel>, #tpu.dimension_semantics<parallel>], iteration_bounds = array<i64: 1, 1>, scalar_prefetch = 0 : i64, scratch_operands = 0 : i64, tpu.core_type = #tpu.core_type<tc>, window_params = [{transform_indices = @transform_0, window_bounds = array<i64: 8, 6, 17, 512>}, {transform_indices = @transform_1, window_bounds = array<i64: 9, 512, 512>}, {transform_indices = @transform_2, window_bounds = array<i64: 1, 512>}, {transform_indices = @transform_3, window_bounds = array<i64: 1, 512>}, {transform_indices = @transform_4, window_bounds = array<i64: 8, 16, 512>}]} {
    %c0 = arith.constant 0 : index
    %c0_0 = arith.constant 0 : index
    %c0_1 = arith.constant 0 : index
    %c0_2 = arith.constant 0 : index
    %0 = vector.load %arg2[%c0, %c0_0, %c0_1, %c0_2] : memref<8x6x17x512xbf16, #tpu.memory_space<vmem>>, vector<8x1x16x512xbf16>
    %1 = vector.shape_cast %0 : vector<8x1x16x512xbf16> to vector<8x16x512xbf16>
    %2 = vector.shape_cast %1 : vector<8x16x512xbf16> to vector<128x512xbf16>
    %c0_3 = arith.constant 0 : index
    %c0_4 = arith.constant 0 : index
    %c0_5 = arith.constant 0 : index
    %3 = vector.load %arg3[%c0_3, %c0_4, %c0_5] : memref<9x512x512xbf16, #tpu.memory_space<vmem>>, vector<1x512x512xbf16>
    %4 = vector.shape_cast %3 : vector<1x512x512xbf16> to vector<512x512xbf16>
    %cst = arith.constant dense<0.000000e+00> : vector<128x512xf32>
    %5 = tpu.matmul %2, %4, %cst {dimension_numbers = #tpu.dot_dimension_numbers<[1], [0], [0], [1], [0, 0, 1, 1], [], []>} : vector<128x512xbf16>, vector<512x512xbf16>, vector<128x512xf32> -> vector<128x512xf32>
    %c0_6 = arith.constant 0 : index
    %c1 = arith.constant 1 : index
    %c0_7 = arith.constant 0 : index
    %c0_8 = arith.constant 0 : index
    %6 = vector.load %arg2[%c0_6, %c1, %c0_7, %c0_8] : memref<8x6x17x512xbf16, #tpu.memory_space<vmem>>, vector<8x1x16x512xbf16>
    %7 = vector.shape_cast %6 : vector<8x1x16x512xbf16> to vector<8x16x512xbf16>
    %8 = vector.shape_cast %7 : vector<8x16x512xbf16> to vector<128x512xbf16>
    %c1_9 = arith.constant 1 : index
    %c0_10 = arith.constant 0 : index
    %c0_11 = arith.constant 0 : index
    %9 = vector.load %arg3[%c1_9, %c0_10, %c0_11] : memref<9x512x512xbf16, #tpu.memory_space<vmem>>, vector<1x512x512xbf16>
    %10 = vector.shape_cast %9 : vector<1x512x512xbf16> to vector<512x512xbf16>
    %cst_12 = arith.constant dense<0.000000e+00> : vector<128x512xf32>
    %11 = tpu.matmul %8, %10, %cst_12 {dimension_numbers = #tpu.dot_dimension_numbers<[1], [0], [0], [1], [0, 0, 1, 1], [], []>} : vector<128x512xbf16>, vector<512x512xbf16>, vector<128x512xf32> -> vector<128x512xf32>
    %12 = arith.addf %5, %11 : vector<128x512xf32>
    %c0_13 = arith.constant 0 : index
    %c0_14 = arith.constant 0 : index
    %c1_15 = arith.constant 1 : index
    %c0_16 = arith.constant 0 : index
    %13 = vector.load %arg2[%c0_13, %c0_14, %c1_15, %c0_16] : memref<8x6x17x512xbf16, #tpu.memory_space<vmem>>, vector<8x1x16x512xbf16>
    %14 = vector.shape_cast %13 : vector<8x1x16x512xbf16> to vector<8x16x512xbf16>
    %15 = vector.shape_cast %14 : vector<8x16x512xbf16> to vector<128x512xbf16>
    %c2 = arith.constant 2 : index
    %c0_17 = arith.constant 0 : index
    %c0_18 = arith.constant 0 : index
    %16 = vector.load %arg3[%c2, %c0_17, %c0_18] : memref<9x512x512xbf16, #tpu.memory_space<vmem>>, vector<1x512x512xbf16>
    %17 = vector.shape_cast %16 : vector<1x512x512xbf16> to vector<512x512xbf16>
    %cst_19 = arith.constant dense<0.000000e+00> : vector<128x512xf32>
    %18 = tpu.matmul %15, %17, %cst_19 {dimension_numbers = #tpu.dot_dimension_numbers<[1], [0], [0], [1], [0, 0, 1, 1], [], []>} : vector<128x512xbf16>, vector<512x512xbf16>, vector<128x512xf32> -> vector<128x512xf32>
    %19 = arith.addf %12, %18 : vector<128x512xf32>
    %c0_20 = arith.constant 0 : index
    %c2_21 = arith.constant 2 : index
    %c0_22 = arith.constant 0 : index
    %c0_23 = arith.constant 0 : index
    %20 = vector.load %arg2[%c0_20, %c2_21, %c0_22, %c0_23] : memref<8x6x17x512xbf16, #tpu.memory_space<vmem>>, vector<8x1x16x512xbf16>
    %21 = vector.shape_cast %20 : vector<8x1x16x512xbf16> to vector<8x16x512xbf16>
    %22 = vector.shape_cast %21 : vector<8x16x512xbf16> to vector<128x512xbf16>
    %c3 = arith.constant 3 : index
    %c0_24 = arith.constant 0 : index
    %c0_25 = arith.constant 0 : index
    %23 = vector.load %arg3[%c3, %c0_24, %c0_25] : memref<9x512x512xbf16, #tpu.memory_space<vmem>>, vector<1x512x512xbf16>
    %24 = vector.shape_cast %23 : vector<1x512x512xbf16> to vector<512x512xbf16>
    %cst_26 = arith.constant dense<0.000000e+00> : vector<128x512xf32>
    %25 = tpu.matmul %22, %24, %cst_26 {dimension_numbers = #tpu.dot_dimension_numbers<[1], [0], [0], [1], [0, 0, 1, 1], [], []>} : vector<128x512xbf16>, vector<512x512xbf16>, vector<128x512xf32> -> vector<128x512xf32>
    %26 = arith.addf %19, %25 : vector<128x512xf32>
    %c0_27 = arith.constant 0 : index
    %c3_28 = arith.constant 3 : index
    %c0_29 = arith.constant 0 : index
    %c0_30 = arith.constant 0 : index
    %27 = vector.load %arg2[%c0_27, %c3_28, %c0_29, %c0_30] : memref<8x6x17x512xbf16, #tpu.memory_space<vmem>>, vector<8x1x16x512xbf16>
    %28 = vector.shape_cast %27 : vector<8x1x16x512xbf16> to vector<8x16x512xbf16>
    %29 = vector.shape_cast %28 : vector<8x16x512xbf16> to vector<128x512xbf16>
    %c4 = arith.constant 4 : index
    %c0_31 = arith.constant 0 : index
    %c0_32 = arith.constant 0 : index
    %30 = vector.load %arg3[%c4, %c0_31, %c0_32] : memref<9x512x512xbf16, #tpu.memory_space<vmem>>, vector<1x512x512xbf16>
    %31 = vector.shape_cast %30 : vector<1x512x512xbf16> to vector<512x512xbf16>
    %cst_33 = arith.constant dense<0.000000e+00> : vector<128x512xf32>
    %32 = tpu.matmul %29, %31, %cst_33 {dimension_numbers = #tpu.dot_dimension_numbers<[1], [0], [0], [1], [0, 0, 1, 1], [], []>} : vector<128x512xbf16>, vector<512x512xbf16>, vector<128x512xf32> -> vector<128x512xf32>
    %33 = arith.addf %26, %32 : vector<128x512xf32>
    %c0_34 = arith.constant 0 : index
    %c2_35 = arith.constant 2 : index
    %c1_36 = arith.constant 1 : index
    %c0_37 = arith.constant 0 : index
    %34 = vector.load %arg2[%c0_34, %c2_35, %c1_36, %c0_37] : memref<8x6x17x512xbf16, #tpu.memory_space<vmem>>, vector<8x1x16x512xbf16>
    %35 = vector.shape_cast %34 : vector<8x1x16x512xbf16> to vector<8x16x512xbf16>
    %36 = vector.shape_cast %35 : vector<8x16x512xbf16> to vector<128x512xbf16>
    %c5 = arith.constant 5 : index
    %c0_38 = arith.constant 0 : index
    %c0_39 = arith.constant 0 : index
    %37 = vector.load %arg3[%c5, %c0_38, %c0_39] : memref<9x512x512xbf16, #tpu.memory_space<vmem>>, vector<1x512x512xbf16>
    %38 = vector.shape_cast %37 : vector<1x512x512xbf16> to vector<512x512xbf16>
    %cst_40 = arith.constant dense<0.000000e+00> : vector<128x512xf32>
    %39 = tpu.matmul %36, %38, %cst_40 {dimension_numbers = #tpu.dot_dimension_numbers<[1], [0], [0], [1], [0, 0, 1, 1], [], []>} : vector<128x512xbf16>, vector<512x512xbf16>, vector<128x512xf32> -> vector<128x512xf32>
    %40 = arith.addf %33, %39 : vector<128x512xf32>
    %c0_41 = arith.constant 0 : index
    %c4_42 = arith.constant 4 : index
    %c0_43 = arith.constant 0 : index
    %c0_44 = arith.constant 0 : index
    %41 = vector.load %arg2[%c0_41, %c4_42, %c0_43, %c0_44] : memref<8x6x17x512xbf16, #tpu.memory_space<vmem>>, vector<8x1x16x512xbf16>
    %42 = vector.shape_cast %41 : vector<8x1x16x512xbf16> to vector<8x16x512xbf16>
    %43 = vector.shape_cast %42 : vector<8x16x512xbf16> to vector<128x512xbf16>
    %c6 = arith.constant 6 : index
    %c0_45 = arith.constant 0 : index
    %c0_46 = arith.constant 0 : index
    %44 = vector.load %arg3[%c6, %c0_45, %c0_46] : memref<9x512x512xbf16, #tpu.memory_space<vmem>>, vector<1x512x512xbf16>
    %45 = vector.shape_cast %44 : vector<1x512x512xbf16> to vector<512x512xbf16>
    %cst_47 = arith.constant dense<0.000000e+00> : vector<128x512xf32>
    %46 = tpu.matmul %43, %45, %cst_47 {dimension_numbers = #tpu.dot_dimension_numbers<[1], [0], [0], [1], [0, 0, 1, 1], [], []>} : vector<128x512xbf16>, vector<512x512xbf16>, vector<128x512xf32> -> vector<128x512xf32>
    %47 = arith.addf %40, %46 : vector<128x512xf32>
    %c0_48 = arith.constant 0 : index
    %c5_49 = arith.constant 5 : index
    %c0_50 = arith.constant 0 : index
    %c0_51 = arith.constant 0 : index
    %48 = vector.load %arg2[%c0_48, %c5_49, %c0_50, %c0_51] : memref<8x6x17x512xbf16, #tpu.memory_space<vmem>>, vector<8x1x16x512xbf16>
    %49 = vector.shape_cast %48 : vector<8x1x16x512xbf16> to vector<8x16x512xbf16>
    %50 = vector.shape_cast %49 : vector<8x16x512xbf16> to vector<128x512xbf16>
    %c7 = arith.constant 7 : index
    %c0_52 = arith.constant 0 : index
    %c0_53 = arith.constant 0 : index
    %51 = vector.load %arg3[%c7, %c0_52, %c0_53] : memref<9x512x512xbf16, #tpu.memory_space<vmem>>, vector<1x512x512xbf16>
    %52 = vector.shape_cast %51 : vector<1x512x512xbf16> to vector<512x512xbf16>
    %cst_54 = arith.constant dense<0.000000e+00> : vector<128x512xf32>
    %53 = tpu.matmul %50, %52, %cst_54 {dimension_numbers = #tpu.dot_dimension_numbers<[1], [0], [0], [1], [0, 0, 1, 1], [], []>} : vector<128x512xbf16>, vector<512x512xbf16>, vector<128x512xf32> -> vector<128x512xf32>
    %54 = arith.addf %47, %53 : vector<128x512xf32>
    %c0_55 = arith.constant 0 : index
    %c4_56 = arith.constant 4 : index
    %c1_57 = arith.constant 1 : index
    %c0_58 = arith.constant 0 : index
    %55 = vector.load %arg2[%c0_55, %c4_56, %c1_57, %c0_58] : memref<8x6x17x512xbf16, #tpu.memory_space<vmem>>, vector<8x1x16x512xbf16>
    %56 = vector.shape_cast %55 : vector<8x1x16x512xbf16> to vector<8x16x512xbf16>
    %57 = vector.shape_cast %56 : vector<8x16x512xbf16> to vector<128x512xbf16>
    %c8 = arith.constant 8 : index
    %c0_59 = arith.constant 0 : index
    %c0_60 = arith.constant 0 : index
    %58 = vector.load %arg3[%c8, %c0_59, %c0_60] : memref<9x512x512xbf16, #tpu.memory_space<vmem>>, vector<1x512x512xbf16>
    %59 = vector.shape_cast %58 : vector<1x512x512xbf16> to vector<512x512xbf16>
    %cst_61 = arith.constant dense<0.000000e+00> : vector<128x512xf32>
    %60 = tpu.matmul %57, %59, %cst_61 {dimension_numbers = #tpu.dot_dimension_numbers<[1], [0], [0], [1], [0, 0, 1, 1], [], []>} : vector<128x512xbf16>, vector<512x512xbf16>, vector<128x512xf32> -> vector<128x512xf32>
    %61 = arith.addf %54, %60 : vector<128x512xf32>
    %c0_62 = arith.constant 0 : index
    %c0_63 = arith.constant 0 : index
    %62 = vector.load %arg4[%c0_62, %c0_63] : memref<1x512xf32, #tpu.memory_space<vmem>>, vector<1x512xf32>
    %63 = vector.broadcast %62 : vector<1x512xf32> to vector<128x512xf32>
    %64 = arith.mulf %61, %63 : vector<128x512xf32>
    %c0_64 = arith.constant 0 : index
    %c0_65 = arith.constant 0 : index
    %65 = vector.load %arg5[%c0_64, %c0_65] : memref<1x512xf32, #tpu.memory_space<vmem>>, vector<1x512xf32>
    %66 = vector.broadcast %65 : vector<1x512xf32> to vector<128x512xf32>
    %67 = arith.addf %64, %66 : vector<128x512xf32>
    %cst_66 = arith.constant 0.000000e+00 : f32
    %68 = vector.broadcast %cst_66 : f32 to vector<128x512xf32>
    %69 = arith.cmpf oge, %67, %68 : vector<128x512xf32>
    %cst_67 = arith.constant 1.000000e-01 : f32
    %70 = vector.broadcast %cst_67 : f32 to vector<128x512xf32>
    %71 = arith.mulf %70, %67 : vector<128x512xf32>
    %72 = arith.select %69, %67, %71 : vector<128x512xi1>, vector<128x512xf32>
    %73 = vector.shape_cast %72 : vector<128x512xf32> to vector<8x16x512xf32>
    %74 = arith.truncf %73 : vector<8x16x512xf32> to vector<8x16x512xbf16>
    %c0_68 = arith.constant 0 : index
    %c0_69 = arith.constant 0 : index
    %c0_70 = arith.constant 0 : index
    %75 = vector.load %arg6[%c0_68, %c0_69, %c0_70] : memref<8x16x512xbf16, #tpu.memory_space<vmem>>, vector<8x16x512xbf16>
    tpu.vector_store %arg6[%c0_68, %c0_69, %c0_70], %74 {strides = array<i32>} : memref<8x16x512xbf16, #tpu.memory_space<vmem>>, vector<8x16x512xbf16>,
    return
  }
  func.func @transform_0(%arg0: i32, %arg1: i32) -> (i32, i32, i32, i32) {
    %c0_i32 = arith.constant 0 : i32
    %c0_i32_0 = arith.constant 0 : i32
    %c0_i32_1 = arith.constant 0 : i32
    %c0_i32_2 = arith.constant 0 : i32
    return %arg1, %c0_i32, %c0_i32_0, %c0_i32_1 : i32, i32, i32, i32
  }
  func.func @transform_1(%arg0: i32, %arg1: i32) -> (i32, i32, i32) {
    %c0_i32 = arith.constant 0 : i32
    %c0_i32_0 = arith.constant 0 : i32
    %c0_i32_1 = arith.constant 0 : i32
    return %c0_i32, %c0_i32_0, %arg0 : i32, i32, i32
  }
  func.func @transform_2(%arg0: i32, %arg1: i32) -> (i32, i32) {
    %c0_i32 = arith.constant 0 : i32
    %c0_i32_0 = arith.constant 0 : i32
    return %c0_i32, %arg0 : i32, i32
  }
  func.func @transform_3(%arg0: i32, %arg1: i32) -> (i32, i32) {
    %c0_i32 = arith.constant 0 : i32
    %c0_i32_0 = arith.constant 0 : i32
    return %c0_i32, %arg0 : i32, i32
  }
  func.func @transform_4(%arg0: i32, %arg1: i32) -> (i32, i32, i32) {
    %c0_i32 = arith.constant 0 : i32
    %c0_i32_0 = arith.constant 0 : i32
    return %arg1, %c0_i32, %arg0 : i32, i32, i32
  }
}

module attributes {stable_mosaic.version = 11 : i64} {
  func.func @kernel(%arg0: i32, %arg1: i32, %arg2: memref<8x3x18x512xbf16, #tpu.memory_space<vmem>>, %arg3: memref<9x512x512xbf16, #tpu.memory_space<vmem>>, %arg4: memref<1x512xf32, #tpu.memory_space<vmem>>, %arg5: memref<1x512xf32, #tpu.memory_space<vmem>>, %arg6: memref<8x16x512xbf16, #tpu.memory_space<vmem>>) attributes {dimension_semantics = [#tpu.dimension_semantics<parallel>, #tpu.dimension_semantics<parallel>], iteration_bounds = array<i64: 1, 1>, scalar_prefetch = 0 : i64, scratch_operands = 0 : i64, tpu.core_type = #tpu.core_type<tc>, window_params = [{transform_indices = @transform_0, window_bounds = array<i64: 8, 3, 18, 512>}, {transform_indices = @transform_1, window_bounds = array<i64: 9, 512, 512>}, {transform_indices = @transform_2, window_bounds = array<i64: 1, 512>}, {transform_indices = @transform_3, window_bounds = array<i64: 1, 512>}, {transform_indices = @transform_4, window_bounds = array<i64: 8, 16, 512>}]} {
    %c0 = arith.constant 0 : index
    %c0_0 = arith.constant 0 : index
    %c0_1 = arith.constant 0 : index
    %c0_2 = arith.constant 0 : index
    %0 = vector.load %arg2[%c0, %c0_0, %c0_1, %c0_2] : memref<8x3x18x512xbf16, #tpu.memory_space<vmem>>, vector<8x1x16x512xbf16>
    %1 = vector.shape_cast %0 : vector<8x1x16x512xbf16> to vector<8x16x512xbf16>
    %2 = vector.shape_cast %1 : vector<8x16x512xbf16> to vector<128x512xbf16>
    %c0_3 = arith.constant 0 : index
    %c0_4 = arith.constant 0 : index
    %c0_5 = arith.constant 0 : index
    %3 = vector.load %arg3[%c0_3, %c0_4, %c0_5] : memref<9x512x512xbf16, #tpu.memory_space<vmem>>, vector<1x512x512xbf16>
    %4 = vector.shape_cast %3 : vector<1x512x512xbf16> to vector<512x512xbf16>
    %cst = arith.constant dense<0.000000e+00> : vector<128x512xf32>
    %5 = tpu.matmul %2, %4, %cst {dimension_numbers = #tpu.dot_dimension_numbers<[1], [0], [0], [1], [0, 0, 1, 1], [], []>} : vector<128x512xbf16>, vector<512x512xbf16>, vector<128x512xf32> -> vector<128x512xf32>
    %c0_6 = arith.constant 0 : index
    %c0_7 = arith.constant 0 : index
    %c1 = arith.constant 1 : index
    %c0_8 = arith.constant 0 : index
    %6 = vector.load %arg2[%c0_6, %c0_7, %c1, %c0_8] : memref<8x3x18x512xbf16, #tpu.memory_space<vmem>>, vector<8x1x16x512xbf16>
    %7 = vector.shape_cast %6 : vector<8x1x16x512xbf16> to vector<8x16x512xbf16>
    %8 = vector.shape_cast %7 : vector<8x16x512xbf16> to vector<128x512xbf16>
    %c1_9 = arith.constant 1 : index
    %c0_10 = arith.constant 0 : index
    %c0_11 = arith.constant 0 : index
    %9 = vector.load %arg3[%c1_9, %c0_10, %c0_11] : memref<9x512x512xbf16, #tpu.memory_space<vmem>>, vector<1x512x512xbf16>
    %10 = vector.shape_cast %9 : vector<1x512x512xbf16> to vector<512x512xbf16>
    %cst_12 = arith.constant dense<0.000000e+00> : vector<128x512xf32>
    %11 = tpu.matmul %8, %10, %cst_12 {dimension_numbers = #tpu.dot_dimension_numbers<[1], [0], [0], [1], [0, 0, 1, 1], [], []>} : vector<128x512xbf16>, vector<512x512xbf16>, vector<128x512xf32> -> vector<128x512xf32>
    %12 = arith.addf %5, %11 : vector<128x512xf32>
    %c0_13 = arith.constant 0 : index
    %c0_14 = arith.constant 0 : index
    %c2 = arith.constant 2 : index
    %c0_15 = arith.constant 0 : index
    %13 = vector.load %arg2[%c0_13, %c0_14, %c2, %c0_15] : memref<8x3x18x512xbf16, #tpu.memory_space<vmem>>, vector<8x1x16x512xbf16>
    %14 = vector.shape_cast %13 : vector<8x1x16x512xbf16> to vector<8x16x512xbf16>
    %15 = vector.shape_cast %14 : vector<8x16x512xbf16> to vector<128x512xbf16>
    %c2_16 = arith.constant 2 : index
    %c0_17 = arith.constant 0 : index
    %c0_18 = arith.constant 0 : index
    %16 = vector.load %arg3[%c2_16, %c0_17, %c0_18] : memref<9x512x512xbf16, #tpu.memory_space<vmem>>, vector<1x512x512xbf16>
    %17 = vector.shape_cast %16 : vector<1x512x512xbf16> to vector<512x512xbf16>
    %cst_19 = arith.constant dense<0.000000e+00> : vector<128x512xf32>
    %18 = tpu.matmul %15, %17, %cst_19 {dimension_numbers = #tpu.dot_dimension_numbers<[1], [0], [0], [1], [0, 0, 1, 1], [], []>} : vector<128x512xbf16>, vector<512x512xbf16>, vector<128x512xf32> -> vector<128x512xf32>
    %19 = arith.addf %12, %18 : vector<128x512xf32>
    %c0_20 = arith.constant 0 : index
    %c1_21 = arith.constant 1 : index
    %c0_22 = arith.constant 0 : index
    %c0_23 = arith.constant 0 : index
    %20 = vector.load %arg2[%c0_20, %c1_21, %c0_22, %c0_23] : memref<8x3x18x512xbf16, #tpu.memory_space<vmem>>, vector<8x1x16x512xbf16>
    %21 = vector.shape_cast %20 : vector<8x1x16x512xbf16> to vector<8x16x512xbf16>
    %22 = vector.shape_cast %21 : vector<8x16x512xbf16> to vector<128x512xbf16>
    %c3 = arith.constant 3 : index
    %c0_24 = arith.constant 0 : index
    %c0_25 = arith.constant 0 : index
    %23 = vector.load %arg3[%c3, %c0_24, %c0_25] : memref<9x512x512xbf16, #tpu.memory_space<vmem>>, vector<1x512x512xbf16>
    %24 = vector.shape_cast %23 : vector<1x512x512xbf16> to vector<512x512xbf16>
    %cst_26 = arith.constant dense<0.000000e+00> : vector<128x512xf32>
    %25 = tpu.matmul %22, %24, %cst_26 {dimension_numbers = #tpu.dot_dimension_numbers<[1], [0], [0], [1], [0, 0, 1, 1], [], []>} : vector<128x512xbf16>, vector<512x512xbf16>, vector<128x512xf32> -> vector<128x512xf32>
    %26 = arith.addf %19, %25 : vector<128x512xf32>
    %c0_27 = arith.constant 0 : index
    %c1_28 = arith.constant 1 : index
    %c1_29 = arith.constant 1 : index
    %c0_30 = arith.constant 0 : index
    %27 = vector.load %arg2[%c0_27, %c1_28, %c1_29, %c0_30] : memref<8x3x18x512xbf16, #tpu.memory_space<vmem>>, vector<8x1x16x512xbf16>
    %28 = vector.shape_cast %27 : vector<8x1x16x512xbf16> to vector<8x16x512xbf16>
    %29 = vector.shape_cast %28 : vector<8x16x512xbf16> to vector<128x512xbf16>
    %c4 = arith.constant 4 : index
    %c0_31 = arith.constant 0 : index
    %c0_32 = arith.constant 0 : index
    %30 = vector.load %arg3[%c4, %c0_31, %c0_32] : memref<9x512x512xbf16, #tpu.memory_space<vmem>>, vector<1x512x512xbf16>
    %31 = vector.shape_cast %30 : vector<1x512x512xbf16> to vector<512x512xbf16>
    %cst_33 = arith.constant dense<0.000000e+00> : vector<128x512xf32>
    %32 = tpu.matmul %29, %31, %cst_33 {dimension_numbers = #tpu.dot_dimension_numbers<[1], [0], [0], [1], [0, 0, 1, 1], [], []>} : vector<128x512xbf16>, vector<512x512xbf16>, vector<128x512xf32> -> vector<128x512xf32>
    %33 = arith.addf %26, %32 : vector<128x512xf32>
    %c0_34 = arith.constant 0 : index
    %c1_35 = arith.constant 1 : index
    %c2_36 = arith.constant 2 : index
    %c0_37 = arith.constant 0 : index
    %34 = vector.load %arg2[%c0_34, %c1_35, %c2_36, %c0_37] : memref<8x3x18x512xbf16, #tpu.memory_space<vmem>>, vector<8x1x16x512xbf16>
    %35 = vector.shape_cast %34 : vector<8x1x16x512xbf16> to vector<8x16x512xbf16>
    %36 = vector.shape_cast %35 : vector<8x16x512xbf16> to vector<128x512xbf16>
    %c5 = arith.constant 5 : index
    %c0_38 = arith.constant 0 : index
    %c0_39 = arith.constant 0 : index
    %37 = vector.load %arg3[%c5, %c0_38, %c0_39] : memref<9x512x512xbf16, #tpu.memory_space<vmem>>, vector<1x512x512xbf16>
    %38 = vector.shape_cast %37 : vector<1x512x512xbf16> to vector<512x512xbf16>
    %cst_40 = arith.constant dense<0.000000e+00> : vector<128x512xf32>
    %39 = tpu.matmul %36, %38, %cst_40 {dimension_numbers = #tpu.dot_dimension_numbers<[1], [0], [0], [1], [0, 0, 1, 1], [], []>} : vector<128x512xbf16>, vector<512x512xbf16>, vector<128x512xf32> -> vector<128x512xf32>
    %40 = arith.addf %33, %39 : vector<128x512xf32>
    %c0_41 = arith.constant 0 : index
    %c2_42 = arith.constant 2 : index
    %c0_43 = arith.constant 0 : index
    %c0_44 = arith.constant 0 : index
    %41 = vector.load %arg2[%c0_41, %c2_42, %c0_43, %c0_44] : memref<8x3x18x512xbf16, #tpu.memory_space<vmem>>, vector<8x1x16x512xbf16>
    %42 = vector.shape_cast %41 : vector<8x1x16x512xbf16> to vector<8x16x512xbf16>
    %43 = vector.shape_cast %42 : vector<8x16x512xbf16> to vector<128x512xbf16>
    %c6 = arith.constant 6 : index
    %c0_45 = arith.constant 0 : index
    %c0_46 = arith.constant 0 : index
    %44 = vector.load %arg3[%c6, %c0_45, %c0_46] : memref<9x512x512xbf16, #tpu.memory_space<vmem>>, vector<1x512x512xbf16>
    %45 = vector.shape_cast %44 : vector<1x512x512xbf16> to vector<512x512xbf16>
    %cst_47 = arith.constant dense<0.000000e+00> : vector<128x512xf32>
    %46 = tpu.matmul %43, %45, %cst_47 {dimension_numbers = #tpu.dot_dimension_numbers<[1], [0], [0], [1], [0, 0, 1, 1], [], []>} : vector<128x512xbf16>, vector<512x512xbf16>, vector<128x512xf32> -> vector<128x512xf32>
    %47 = arith.addf %40, %46 : vector<128x512xf32>
    %c0_48 = arith.constant 0 : index
    %c2_49 = arith.constant 2 : index
    %c1_50 = arith.constant 1 : index
    %c0_51 = arith.constant 0 : index
    %48 = vector.load %arg2[%c0_48, %c2_49, %c1_50, %c0_51] : memref<8x3x18x512xbf16, #tpu.memory_space<vmem>>, vector<8x1x16x512xbf16>
    %49 = vector.shape_cast %48 : vector<8x1x16x512xbf16> to vector<8x16x512xbf16>
    %50 = vector.shape_cast %49 : vector<8x16x512xbf16> to vector<128x512xbf16>
    %c7 = arith.constant 7 : index
    %c0_52 = arith.constant 0 : index
    %c0_53 = arith.constant 0 : index
    %51 = vector.load %arg3[%c7, %c0_52, %c0_53] : memref<9x512x512xbf16, #tpu.memory_space<vmem>>, vector<1x512x512xbf16>
    %52 = vector.shape_cast %51 : vector<1x512x512xbf16> to vector<512x512xbf16>
    %cst_54 = arith.constant dense<0.000000e+00> : vector<128x512xf32>
    %53 = tpu.matmul %50, %52, %cst_54 {dimension_numbers = #tpu.dot_dimension_numbers<[1], [0], [0], [1], [0, 0, 1, 1], [], []>} : vector<128x512xbf16>, vector<512x512xbf16>, vector<128x512xf32> -> vector<128x512xf32>
    %54 = arith.addf %47, %53 : vector<128x512xf32>
    %c0_55 = arith.constant 0 : index
    %c2_56 = arith.constant 2 : index
    %c2_57 = arith.constant 2 : index
    %c0_58 = arith.constant 0 : index
    %55 = vector.load %arg2[%c0_55, %c2_56, %c2_57, %c0_58] : memref<8x3x18x512xbf16, #tpu.memory_space<vmem>>, vector<8x1x16x512xbf16>
    %56 = vector.shape_cast %55 : vector<8x1x16x512xbf16> to vector<8x16x512xbf16>
    %57 = vector.shape_cast %56 : vector<8x16x512xbf16> to vector<128x512xbf16>
    %c8 = arith.constant 8 : index
    %c0_59 = arith.constant 0 : index
    %c0_60 = arith.constant 0 : index
    %58 = vector.load %arg3[%c8, %c0_59, %c0_60] : memref<9x512x512xbf16, #tpu.memory_space<vmem>>, vector<1x512x512xbf16>
    %59 = vector.shape_cast %58 : vector<1x512x512xbf16> to vector<512x512xbf16>
    %cst_61 = arith.constant dense<0.000000e+00> : vector<128x512xf32>
    %60 = tpu.matmul %57, %59, %cst_61 {dimension_numbers = #tpu.dot_dimension_numbers<[1], [0], [0], [1], [0, 0, 1, 1], [], []>} : vector<128x512xbf16>, vector<512x512xbf16>, vector<128x512xf32> -> vector<128x512xf32>
    %61 = arith.addf %54, %60 : vector<128x512xf32>
    %c0_62 = arith.constant 0 : index
    %c0_63 = arith.constant 0 : index
    %62 = vector.load %arg4[%c0_62, %c0_63] : memref<1x512xf32, #tpu.memory_space<vmem>>, vector<1x512xf32>
    %63 = vector.broadcast %62 : vector<1x512xf32> to vector<128x512xf32>
    %64 = arith.mulf %61, %63 : vector<128x512xf32>
    %c0_64 = arith.constant 0 : index
    %c0_65 = arith.constant 0 : index
    %65 = vector.load %arg5[%c0_64, %c0_65] : memref<1x512xf32, #tpu.memory_space<vmem>>, vector<1x512xf32>
    %66 = vector.broadcast %65 : vector<1x512xf32> to vector<128x512xf32>
    %67 = arith.addf %64, %66 : vector<128x512xf32>
    %cst_66 = arith.constant 0.000000e+00 : f32
    %68 = vector.broadcast %cst_66 : f32 to vector<128x512xf32>
    %69 = arith.cmpf oge, %67, %68 : vector<128x512xf32>
    %cst_67 = arith.constant 1.000000e-01 : f32
    %70 = vector.broadcast %cst_67 : f32 to vector<128x512xf32>
    %71 = arith.mulf %70, %67 : vector<128x512xf32>
    %72 = arith.select %69, %67, %71 : vector<128x512xi1>, vector<128x512xf32>
    %73 = vector.shape_cast %72 : vector<128x512xf32> to vector<8x16x512xf32>
    %74 = arith.truncf %73 : vector<8x16x512xf32> to vector<8x16x512xbf16>
    %c0_68 = arith.constant 0 : index
    %c0_69 = arith.constant 0 : index
    %c0_70 = arith.constant 0 : index
    %75 = vector.load %arg6[%c0_68, %c0_69, %c0_70] : memref<8x16x512xbf16, #tpu.memory_space<vmem>>, vector<8x16x512xbf16>
    tpu.vector_store %arg6[%c0_68, %c0_69, %c0_70], %74 {strides = array<i32>} : memref<8x16x512xbf16, #tpu.memory_space<vmem>>, vector<8x16x512xbf16>,
    return
  }
  func.func @transform_0(%arg0: i32, %arg1: i32) -> (i32, i32, i32, i32) {
    %c0_i32 = arith.constant 0 : i32
    %c0_i32_0 = arith.constant 0 : i32
    %c0_i32_1 = arith.constant 0 : i32
    %c0_i32_2 = arith.constant 0 : i32
    return %arg1, %c0_i32, %c0_i32_0, %c0_i32_1 : i32, i32, i32, i32
  }
  func.func @transform_1(%arg0: i32, %arg1: i32) -> (i32, i32, i32) {
    %c0_i32 = arith.constant 0 : i32
    %c0_i32_0 = arith.constant 0 : i32
    %c0_i32_1 = arith.constant 0 : i32
    return %c0_i32, %c0_i32_0, %arg0 : i32, i32, i32
  }
  func.func @transform_2(%arg0: i32, %arg1: i32) -> (i32, i32) {
    %c0_i32 = arith.constant 0 : i32
    %c0_i32_0 = arith.constant 0 : i32
    return %c0_i32, %arg0 : i32, i32
  }
  func.func @transform_3(%arg0: i32, %arg1: i32) -> (i32, i32) {
    %c0_i32 = arith.constant 0 : i32
    %c0_i32_0 = arith.constant 0 : i32
    return %c0_i32, %arg0 : i32, i32
  }
  func.func @transform_4(%arg0: i32, %arg1: i32) -> (i32, i32, i32) {
    %c0_i32 = arith.constant 0 : i32
    %c0_i32_0 = arith.constant 0 : i32
    return %arg1, %c0_i32, %arg0 : i32, i32, i32
  }
}

module attributes {stable_mosaic.version = 11 : i64} {
  func.func @kernel(%arg0: i32, %arg1: i32, %arg2: memref<4x6x17x512xbf16, #tpu.memory_space<vmem>>, %arg3: memref<9x512x512xbf16, #tpu.memory_space<vmem>>, %arg4: memref<1x512xf32, #tpu.memory_space<vmem>>, %arg5: memref<1x512xf32, #tpu.memory_space<vmem>>, %arg6: memref<4x16x512xbf16, #tpu.memory_space<vmem>>) attributes {dimension_semantics = [#tpu.dimension_semantics<parallel>, #tpu.dimension_semantics<parallel>], iteration_bounds = array<i64: 2, 1>, scalar_prefetch = 0 : i64, scratch_operands = 0 : i64, tpu.core_type = #tpu.core_type<tc>, window_params = [{transform_indices = @transform_0, window_bounds = array<i64: 4, 6, 17, 512>}, {transform_indices = @transform_1, window_bounds = array<i64: 9, 512, 512>}, {transform_indices = @transform_2, window_bounds = array<i64: 1, 512>}, {transform_indices = @transform_3, window_bounds = array<i64: 1, 512>}, {transform_indices = @transform_4, window_bounds = array<i64: 4, 16, 512>}]} {
    %c0 = arith.constant 0 : index
    %c0_0 = arith.constant 0 : index
    %c0_1 = arith.constant 0 : index
    %c0_2 = arith.constant 0 : index
    %0 = vector.load %arg2[%c0, %c0_0, %c0_1, %c0_2] : memref<4x6x17x512xbf16, #tpu.memory_space<vmem>>, vector<4x1x16x512xbf16>
    %1 = vector.shape_cast %0 : vector<4x1x16x512xbf16> to vector<4x16x512xbf16>
    %2 = vector.shape_cast %1 : vector<4x16x512xbf16> to vector<64x512xbf16>
    %c0_3 = arith.constant 0 : index
    %c0_4 = arith.constant 0 : index
    %c0_5 = arith.constant 0 : index
    %3 = vector.load %arg3[%c0_3, %c0_4, %c0_5] : memref<9x512x512xbf16, #tpu.memory_space<vmem>>, vector<1x512x512xbf16>
    %4 = vector.shape_cast %3 : vector<1x512x512xbf16> to vector<512x512xbf16>
    %cst = arith.constant dense<0.000000e+00> : vector<64x512xf32>
    %5 = tpu.matmul %2, %4, %cst {dimension_numbers = #tpu.dot_dimension_numbers<[1], [0], [0], [1], [0, 0, 1, 1], [], []>} : vector<64x512xbf16>, vector<512x512xbf16>, vector<64x512xf32> -> vector<64x512xf32>
    %c0_6 = arith.constant 0 : index
    %c1 = arith.constant 1 : index
    %c0_7 = arith.constant 0 : index
    %c0_8 = arith.constant 0 : index
    %6 = vector.load %arg2[%c0_6, %c1, %c0_7, %c0_8] : memref<4x6x17x512xbf16, #tpu.memory_space<vmem>>, vector<4x1x16x512xbf16>
    %7 = vector.shape_cast %6 : vector<4x1x16x512xbf16> to vector<4x16x512xbf16>
    %8 = vector.shape_cast %7 : vector<4x16x512xbf16> to vector<64x512xbf16>
    %c1_9 = arith.constant 1 : index
    %c0_10 = arith.constant 0 : index
    %c0_11 = arith.constant 0 : index
    %9 = vector.load %arg3[%c1_9, %c0_10, %c0_11] : memref<9x512x512xbf16, #tpu.memory_space<vmem>>, vector<1x512x512xbf16>
    %10 = vector.shape_cast %9 : vector<1x512x512xbf16> to vector<512x512xbf16>
    %cst_12 = arith.constant dense<0.000000e+00> : vector<64x512xf32>
    %11 = tpu.matmul %8, %10, %cst_12 {dimension_numbers = #tpu.dot_dimension_numbers<[1], [0], [0], [1], [0, 0, 1, 1], [], []>} : vector<64x512xbf16>, vector<512x512xbf16>, vector<64x512xf32> -> vector<64x512xf32>
    %12 = arith.addf %5, %11 : vector<64x512xf32>
    %c0_13 = arith.constant 0 : index
    %c0_14 = arith.constant 0 : index
    %c1_15 = arith.constant 1 : index
    %c0_16 = arith.constant 0 : index
    %13 = vector.load %arg2[%c0_13, %c0_14, %c1_15, %c0_16] : memref<4x6x17x512xbf16, #tpu.memory_space<vmem>>, vector<4x1x16x512xbf16>
    %14 = vector.shape_cast %13 : vector<4x1x16x512xbf16> to vector<4x16x512xbf16>
    %15 = vector.shape_cast %14 : vector<4x16x512xbf16> to vector<64x512xbf16>
    %c2 = arith.constant 2 : index
    %c0_17 = arith.constant 0 : index
    %c0_18 = arith.constant 0 : index
    %16 = vector.load %arg3[%c2, %c0_17, %c0_18] : memref<9x512x512xbf16, #tpu.memory_space<vmem>>, vector<1x512x512xbf16>
    %17 = vector.shape_cast %16 : vector<1x512x512xbf16> to vector<512x512xbf16>
    %cst_19 = arith.constant dense<0.000000e+00> : vector<64x512xf32>
    %18 = tpu.matmul %15, %17, %cst_19 {dimension_numbers = #tpu.dot_dimension_numbers<[1], [0], [0], [1], [0, 0, 1, 1], [], []>} : vector<64x512xbf16>, vector<512x512xbf16>, vector<64x512xf32> -> vector<64x512xf32>
    %19 = arith.addf %12, %18 : vector<64x512xf32>
    %c0_20 = arith.constant 0 : index
    %c2_21 = arith.constant 2 : index
    %c0_22 = arith.constant 0 : index
    %c0_23 = arith.constant 0 : index
    %20 = vector.load %arg2[%c0_20, %c2_21, %c0_22, %c0_23] : memref<4x6x17x512xbf16, #tpu.memory_space<vmem>>, vector<4x1x16x512xbf16>
    %21 = vector.shape_cast %20 : vector<4x1x16x512xbf16> to vector<4x16x512xbf16>
    %22 = vector.shape_cast %21 : vector<4x16x512xbf16> to vector<64x512xbf16>
    %c3 = arith.constant 3 : index
    %c0_24 = arith.constant 0 : index
    %c0_25 = arith.constant 0 : index
    %23 = vector.load %arg3[%c3, %c0_24, %c0_25] : memref<9x512x512xbf16, #tpu.memory_space<vmem>>, vector<1x512x512xbf16>
    %24 = vector.shape_cast %23 : vector<1x512x512xbf16> to vector<512x512xbf16>
    %cst_26 = arith.constant dense<0.000000e+00> : vector<64x512xf32>
    %25 = tpu.matmul %22, %24, %cst_26 {dimension_numbers = #tpu.dot_dimension_numbers<[1], [0], [0], [1], [0, 0, 1, 1], [], []>} : vector<64x512xbf16>, vector<512x512xbf16>, vector<64x512xf32> -> vector<64x512xf32>
    %26 = arith.addf %19, %25 : vector<64x512xf32>
    %c0_27 = arith.constant 0 : index
    %c3_28 = arith.constant 3 : index
    %c0_29 = arith.constant 0 : index
    %c0_30 = arith.constant 0 : index
    %27 = vector.load %arg2[%c0_27, %c3_28, %c0_29, %c0_30] : memref<4x6x17x512xbf16, #tpu.memory_space<vmem>>, vector<4x1x16x512xbf16>
    %28 = vector.shape_cast %27 : vector<4x1x16x512xbf16> to vector<4x16x512xbf16>
    %29 = vector.shape_cast %28 : vector<4x16x512xbf16> to vector<64x512xbf16>
    %c4 = arith.constant 4 : index
    %c0_31 = arith.constant 0 : index
    %c0_32 = arith.constant 0 : index
    %30 = vector.load %arg3[%c4, %c0_31, %c0_32] : memref<9x512x512xbf16, #tpu.memory_space<vmem>>, vector<1x512x512xbf16>
    %31 = vector.shape_cast %30 : vector<1x512x512xbf16> to vector<512x512xbf16>
    %cst_33 = arith.constant dense<0.000000e+00> : vector<64x512xf32>
    %32 = tpu.matmul %29, %31, %cst_33 {dimension_numbers = #tpu.dot_dimension_numbers<[1], [0], [0], [1], [0, 0, 1, 1], [], []>} : vector<64x512xbf16>, vector<512x512xbf16>, vector<64x512xf32> -> vector<64x512xf32>
    %33 = arith.addf %26, %32 : vector<64x512xf32>
    %c0_34 = arith.constant 0 : index
    %c2_35 = arith.constant 2 : index
    %c1_36 = arith.constant 1 : index
    %c0_37 = arith.constant 0 : index
    %34 = vector.load %arg2[%c0_34, %c2_35, %c1_36, %c0_37] : memref<4x6x17x512xbf16, #tpu.memory_space<vmem>>, vector<4x1x16x512xbf16>
    %35 = vector.shape_cast %34 : vector<4x1x16x512xbf16> to vector<4x16x512xbf16>
    %36 = vector.shape_cast %35 : vector<4x16x512xbf16> to vector<64x512xbf16>
    %c5 = arith.constant 5 : index
    %c0_38 = arith.constant 0 : index
    %c0_39 = arith.constant 0 : index
    %37 = vector.load %arg3[%c5, %c0_38, %c0_39] : memref<9x512x512xbf16, #tpu.memory_space<vmem>>, vector<1x512x512xbf16>
    %38 = vector.shape_cast %37 : vector<1x512x512xbf16> to vector<512x512xbf16>
    %cst_40 = arith.constant dense<0.000000e+00> : vector<64x512xf32>
    %39 = tpu.matmul %36, %38, %cst_40 {dimension_numbers = #tpu.dot_dimension_numbers<[1], [0], [0], [1], [0, 0, 1, 1], [], []>} : vector<64x512xbf16>, vector<512x512xbf16>, vector<64x512xf32> -> vector<64x512xf32>
    %40 = arith.addf %33, %39 : vector<64x512xf32>
    %c0_41 = arith.constant 0 : index
    %c4_42 = arith.constant 4 : index
    %c0_43 = arith.constant 0 : index
    %c0_44 = arith.constant 0 : index
    %41 = vector.load %arg2[%c0_41, %c4_42, %c0_43, %c0_44] : memref<4x6x17x512xbf16, #tpu.memory_space<vmem>>, vector<4x1x16x512xbf16>
    %42 = vector.shape_cast %41 : vector<4x1x16x512xbf16> to vector<4x16x512xbf16>
    %43 = vector.shape_cast %42 : vector<4x16x512xbf16> to vector<64x512xbf16>
    %c6 = arith.constant 6 : index
    %c0_45 = arith.constant 0 : index
    %c0_46 = arith.constant 0 : index
    %44 = vector.load %arg3[%c6, %c0_45, %c0_46] : memref<9x512x512xbf16, #tpu.memory_space<vmem>>, vector<1x512x512xbf16>
    %45 = vector.shape_cast %44 : vector<1x512x512xbf16> to vector<512x512xbf16>
    %cst_47 = arith.constant dense<0.000000e+00> : vector<64x512xf32>
    %46 = tpu.matmul %43, %45, %cst_47 {dimension_numbers = #tpu.dot_dimension_numbers<[1], [0], [0], [1], [0, 0, 1, 1], [], []>} : vector<64x512xbf16>, vector<512x512xbf16>, vector<64x512xf32> -> vector<64x512xf32>
    %47 = arith.addf %40, %46 : vector<64x512xf32>
    %c0_48 = arith.constant 0 : index
    %c5_49 = arith.constant 5 : index
    %c0_50 = arith.constant 0 : index
    %c0_51 = arith.constant 0 : index
    %48 = vector.load %arg2[%c0_48, %c5_49, %c0_50, %c0_51] : memref<4x6x17x512xbf16, #tpu.memory_space<vmem>>, vector<4x1x16x512xbf16>
    %49 = vector.shape_cast %48 : vector<4x1x16x512xbf16> to vector<4x16x512xbf16>
    %50 = vector.shape_cast %49 : vector<4x16x512xbf16> to vector<64x512xbf16>
    %c7 = arith.constant 7 : index
    %c0_52 = arith.constant 0 : index
    %c0_53 = arith.constant 0 : index
    %51 = vector.load %arg3[%c7, %c0_52, %c0_53] : memref<9x512x512xbf16, #tpu.memory_space<vmem>>, vector<1x512x512xbf16>
    %52 = vector.shape_cast %51 : vector<1x512x512xbf16> to vector<512x512xbf16>
    %cst_54 = arith.constant dense<0.000000e+00> : vector<64x512xf32>
    %53 = tpu.matmul %50, %52, %cst_54 {dimension_numbers = #tpu.dot_dimension_numbers<[1], [0], [0], [1], [0, 0, 1, 1], [], []>} : vector<64x512xbf16>, vector<512x512xbf16>, vector<64x512xf32> -> vector<64x512xf32>
    %54 = arith.addf %47, %53 : vector<64x512xf32>
    %c0_55 = arith.constant 0 : index
    %c4_56 = arith.constant 4 : index
    %c1_57 = arith.constant 1 : index
    %c0_58 = arith.constant 0 : index
    %55 = vector.load %arg2[%c0_55, %c4_56, %c1_57, %c0_58] : memref<4x6x17x512xbf16, #tpu.memory_space<vmem>>, vector<4x1x16x512xbf16>
    %56 = vector.shape_cast %55 : vector<4x1x16x512xbf16> to vector<4x16x512xbf16>
    %57 = vector.shape_cast %56 : vector<4x16x512xbf16> to vector<64x512xbf16>
    %c8 = arith.constant 8 : index
    %c0_59 = arith.constant 0 : index
    %c0_60 = arith.constant 0 : index
    %58 = vector.load %arg3[%c8, %c0_59, %c0_60] : memref<9x512x512xbf16, #tpu.memory_space<vmem>>, vector<1x512x512xbf16>
    %59 = vector.shape_cast %58 : vector<1x512x512xbf16> to vector<512x512xbf16>
    %cst_61 = arith.constant dense<0.000000e+00> : vector<64x512xf32>
    %60 = tpu.matmul %57, %59, %cst_61 {dimension_numbers = #tpu.dot_dimension_numbers<[1], [0], [0], [1], [0, 0, 1, 1], [], []>} : vector<64x512xbf16>, vector<512x512xbf16>, vector<64x512xf32> -> vector<64x512xf32>
    %61 = arith.addf %54, %60 : vector<64x512xf32>
    %c0_62 = arith.constant 0 : index
    %c0_63 = arith.constant 0 : index
    %62 = vector.load %arg4[%c0_62, %c0_63] : memref<1x512xf32, #tpu.memory_space<vmem>>, vector<1x512xf32>
    %63 = vector.broadcast %62 : vector<1x512xf32> to vector<64x512xf32>
    %64 = arith.mulf %61, %63 : vector<64x512xf32>
    %c0_64 = arith.constant 0 : index
    %c0_65 = arith.constant 0 : index
    %65 = vector.load %arg5[%c0_64, %c0_65] : memref<1x512xf32, #tpu.memory_space<vmem>>, vector<1x512xf32>
    %66 = vector.broadcast %65 : vector<1x512xf32> to vector<64x512xf32>
    %67 = arith.addf %64, %66 : vector<64x512xf32>
    %cst_66 = arith.constant 0.000000e+00 : f32
    %68 = vector.broadcast %cst_66 : f32 to vector<64x512xf32>
    %69 = arith.cmpf oge, %67, %68 : vector<64x512xf32>
    %cst_67 = arith.constant 1.000000e-01 : f32
    %70 = vector.broadcast %cst_67 : f32 to vector<64x512xf32>
    %71 = arith.mulf %70, %67 : vector<64x512xf32>
    %72 = arith.select %69, %67, %71 : vector<64x512xi1>, vector<64x512xf32>
    %73 = vector.shape_cast %72 : vector<64x512xf32> to vector<4x16x512xf32>
    %74 = arith.truncf %73 : vector<4x16x512xf32> to vector<4x16x512xbf16>
    %c0_68 = arith.constant 0 : index
    %c0_69 = arith.constant 0 : index
    %c0_70 = arith.constant 0 : index
    %75 = vector.load %arg6[%c0_68, %c0_69, %c0_70] : memref<4x16x512xbf16, #tpu.memory_space<vmem>>, vector<4x16x512xbf16>
    tpu.vector_store %arg6[%c0_68, %c0_69, %c0_70], %74 {strides = array<i32>} : memref<4x16x512xbf16, #tpu.memory_space<vmem>>, vector<4x16x512xbf16>,
    return
  }
  func.func @transform_0(%arg0: i32, %arg1: i32) -> (i32, i32, i32, i32) {
    %c0_i32 = arith.constant 0 : i32
    %c0_i32_0 = arith.constant 0 : i32
    %c0_i32_1 = arith.constant 0 : i32
    %c0_i32_2 = arith.constant 0 : i32
    return %arg1, %c0_i32, %c0_i32_0, %c0_i32_1 : i32, i32, i32, i32
  }
  func.func @transform_1(%arg0: i32, %arg1: i32) -> (i32, i32, i32) {
    %c0_i32 = arith.constant 0 : i32
    %c0_i32_0 = arith.constant 0 : i32
    %c0_i32_1 = arith.constant 0 : i32
    return %c0_i32, %c0_i32_0, %arg0 : i32, i32, i32
  }
  func.func @transform_2(%arg0: i32, %arg1: i32) -> (i32, i32) {
    %c0_i32 = arith.constant 0 : i32
    %c0_i32_0 = arith.constant 0 : i32
    return %c0_i32, %arg0 : i32, i32
  }
  func.func @transform_3(%arg0: i32, %arg1: i32) -> (i32, i32) {
    %c0_i32 = arith.constant 0 : i32
    %c0_i32_0 = arith.constant 0 : i32
    return %c0_i32, %arg0 : i32, i32
  }
  func.func @transform_4(%arg0: i32, %arg1: i32) -> (i32, i32, i32) {
    %c0_i32 = arith.constant 0 : i32
    %c0_i32_0 = arith.constant 0 : i32
    return %arg1, %c0_i32, %arg0 : i32, i32, i32
  }
}

module attributes {stable_mosaic.version = 11 : i64} {
  func.func @kernel(%arg0: i32, %arg1: i32, %arg2: memref<8x1024xbf16, #tpu.memory_space<vmem>>, %arg3: memref<1024x256xbf16, #tpu.memory_space<vmem>>, %arg4: memref<1x256xf32, #tpu.memory_space<vmem>>, %arg5: memref<1x256xf32, #tpu.memory_space<vmem>>, %arg6: memref<8x256xbf16, #tpu.memory_space<vmem>>) attributes {dimension_semantics = [#tpu.dimension_semantics<parallel>, #tpu.dimension_semantics<parallel>], iteration_bounds = array<i64: 1, 1>, scalar_prefetch = 0 : i64, scratch_operands = 0 : i64, tpu.core_type = #tpu.core_type<tc>, window_params = [{transform_indices = @transform_0, window_bounds = array<i64: 8, 1024>}, {transform_indices = @transform_1, window_bounds = array<i64: 1024, 256>}, {transform_indices = @transform_2, window_bounds = array<i64: 1, 256>}, {transform_indices = @transform_3, window_bounds = array<i64: 1, 256>}, {transform_indices = @transform_4, window_bounds = array<i64: 8, 256>}]} {
    %c0 = arith.constant 0 : index
    %c0_0 = arith.constant 0 : index
    %0 = vector.load %arg2[%c0, %c0_0] : memref<8x1024xbf16, #tpu.memory_space<vmem>>, vector<8x1024xbf16>
    %c0_1 = arith.constant 0 : index
    %c0_2 = arith.constant 0 : index
    %1 = vector.load %arg3[%c0_1, %c0_2] : memref<1024x256xbf16, #tpu.memory_space<vmem>>, vector<1024x256xbf16>
    %cst = arith.constant dense<0.000000e+00> : vector<8x256xf32>
    %2 = tpu.matmul %0, %1, %cst {dimension_numbers = #tpu.dot_dimension_numbers<[1], [0], [0], [1], [0, 0, 1, 1], [], []>} : vector<8x1024xbf16>, vector<1024x256xbf16>, vector<8x256xf32> -> vector<8x256xf32>
    %c0_3 = arith.constant 0 : index
    %c0_4 = arith.constant 0 : index
    %3 = vector.load %arg4[%c0_3, %c0_4] : memref<1x256xf32, #tpu.memory_space<vmem>>, vector<1x256xf32>
    %4 = vector.broadcast %3 : vector<1x256xf32> to vector<8x256xf32>
    %5 = arith.mulf %2, %4 : vector<8x256xf32>
    %c0_5 = arith.constant 0 : index
    %c0_6 = arith.constant 0 : index
    %6 = vector.load %arg5[%c0_5, %c0_6] : memref<1x256xf32, #tpu.memory_space<vmem>>, vector<1x256xf32>
    %7 = vector.broadcast %6 : vector<1x256xf32> to vector<8x256xf32>
    %8 = arith.addf %5, %7 : vector<8x256xf32>
    %9 = arith.truncf %8 : vector<8x256xf32> to vector<8x256xbf16>
    %c0_7 = arith.constant 0 : index
    %c0_8 = arith.constant 0 : index
    %10 = vector.load %arg6[%c0_7, %c0_8] : memref<8x256xbf16, #tpu.memory_space<vmem>>, vector<8x256xbf16>
    tpu.vector_store %arg6[%c0_7, %c0_8], %9 {strides = array<i32>} : memref<8x256xbf16, #tpu.memory_space<vmem>>, vector<8x256xbf16>,
    return
  }
  func.func @transform_0(%arg0: i32, %arg1: i32) -> (i32, i32) {
    %c0_i32 = arith.constant 0 : i32
    %c0_i32_0 = arith.constant 0 : i32
    return %arg0, %c0_i32 : i32, i32
  }
  func.func @transform_1(%arg0: i32, %arg1: i32) -> (i32, i32) {
    %c0_i32 = arith.constant 0 : i32
    %c0_i32_0 = arith.constant 0 : i32
    return %c0_i32, %arg1 : i32, i32
  }
  func.func @transform_2(%arg0: i32, %arg1: i32) -> (i32, i32) {
    %c0_i32 = arith.constant 0 : i32
    %c0_i32_0 = arith.constant 0 : i32
    return %c0_i32, %arg1 : i32, i32
  }
  func.func @transform_3(%arg0: i32, %arg1: i32) -> (i32, i32) {
    %c0_i32 = arith.constant 0 : i32
    %c0_i32_0 = arith.constant 0 : i32
    return %c0_i32, %arg1 : i32, i32
  }
  func.func @transform_4(%arg0: i32, %arg1: i32) -> (i32, i32) {
    %c0_i32 = arith.constant 0 : i32
    return %arg0, %arg1 : i32, i32
  }
}

module attributes {stable_mosaic.version = 11 : i64} {
  func.func @kernel(%arg0: i32, %arg1: i32, %arg2: memref<128x512xbf16, #tpu.memory_space<vmem>>, %arg3: memref<512x256xbf16, #tpu.memory_space<vmem>>, %arg4: memref<1x256xf32, #tpu.memory_space<vmem>>, %arg5: memref<1x256xf32, #tpu.memory_space<vmem>>, %arg6: memref<128x256xbf16, #tpu.memory_space<vmem>>) attributes {dimension_semantics = [#tpu.dimension_semantics<parallel>, #tpu.dimension_semantics<parallel>], iteration_bounds = array<i64: 1, 1>, scalar_prefetch = 0 : i64, scratch_operands = 0 : i64, tpu.core_type = #tpu.core_type<tc>, window_params = [{transform_indices = @transform_0, window_bounds = array<i64: 128, 512>}, {transform_indices = @transform_1, window_bounds = array<i64: 512, 256>}, {transform_indices = @transform_2, window_bounds = array<i64: 1, 256>}, {transform_indices = @transform_3, window_bounds = array<i64: 1, 256>}, {transform_indices = @transform_4, window_bounds = array<i64: 128, 256>}]} {
    %c0 = arith.constant 0 : index
    %c0_0 = arith.constant 0 : index
    %0 = vector.load %arg2[%c0, %c0_0] : memref<128x512xbf16, #tpu.memory_space<vmem>>, vector<128x512xbf16>
    %c0_1 = arith.constant 0 : index
    %c0_2 = arith.constant 0 : index
    %1 = vector.load %arg3[%c0_1, %c0_2] : memref<512x256xbf16, #tpu.memory_space<vmem>>, vector<512x256xbf16>
    %cst = arith.constant dense<0.000000e+00> : vector<128x256xf32>
    %2 = tpu.matmul %0, %1, %cst {dimension_numbers = #tpu.dot_dimension_numbers<[1], [0], [0], [1], [0, 0, 1, 1], [], []>} : vector<128x512xbf16>, vector<512x256xbf16>, vector<128x256xf32> -> vector<128x256xf32>
    %c0_3 = arith.constant 0 : index
    %c0_4 = arith.constant 0 : index
    %3 = vector.load %arg4[%c0_3, %c0_4] : memref<1x256xf32, #tpu.memory_space<vmem>>, vector<1x256xf32>
    %4 = vector.broadcast %3 : vector<1x256xf32> to vector<128x256xf32>
    %5 = arith.mulf %2, %4 : vector<128x256xf32>
    %c0_5 = arith.constant 0 : index
    %c0_6 = arith.constant 0 : index
    %6 = vector.load %arg5[%c0_5, %c0_6] : memref<1x256xf32, #tpu.memory_space<vmem>>, vector<1x256xf32>
    %7 = vector.broadcast %6 : vector<1x256xf32> to vector<128x256xf32>
    %8 = arith.addf %5, %7 : vector<128x256xf32>
    %9 = arith.truncf %8 : vector<128x256xf32> to vector<128x256xbf16>
    %c0_7 = arith.constant 0 : index
    %c0_8 = arith.constant 0 : index
    %10 = vector.load %arg6[%c0_7, %c0_8] : memref<128x256xbf16, #tpu.memory_space<vmem>>, vector<128x256xbf16>
    tpu.vector_store %arg6[%c0_7, %c0_8], %9 {strides = array<i32>} : memref<128x256xbf16, #tpu.memory_space<vmem>>, vector<128x256xbf16>,
    return
  }
  func.func @transform_0(%arg0: i32, %arg1: i32) -> (i32, i32) {
    %c0_i32 = arith.constant 0 : i32
    %c0_i32_0 = arith.constant 0 : i32
    return %arg0, %c0_i32 : i32, i32
  }
  func.func @transform_1(%arg0: i32, %arg1: i32) -> (i32, i32) {
    %c0_i32 = arith.constant 0 : i32
    %c0_i32_0 = arith.constant 0 : i32
    return %c0_i32, %arg1 : i32, i32
  }
  func.func @transform_2(%arg0: i32, %arg1: i32) -> (i32, i32) {
    %c0_i32 = arith.constant 0 : i32
    %c0_i32_0 = arith.constant 0 : i32
    return %c0_i32, %arg1 : i32, i32
  }
  func.func @transform_3(%arg0: i32, %arg1: i32) -> (i32, i32) {
    %c0_i32 = arith.constant 0 : i32
    %c0_i32_0 = arith.constant 0 : i32
    return %c0_i32, %arg1 : i32, i32
  }
  func.func @transform_4(%arg0: i32, %arg1: i32) -> (i32, i32) {
    %c0_i32 = arith.constant 0 : i32
    return %arg0, %arg1 : i32, i32
  }
}

module attributes {stable_mosaic.version = 11 : i64} {
  func.func @kernel(%arg0: i32, %arg1: i32, %arg2: memref<512x256xbf16, #tpu.memory_space<vmem>>, %arg3: memref<256x256xbf16, #tpu.memory_space<vmem>>, %arg4: memref<1x256xf32, #tpu.memory_space<vmem>>, %arg5: memref<1x256xf32, #tpu.memory_space<vmem>>, %arg6: memref<512x256xbf16, #tpu.memory_space<vmem>>) attributes {dimension_semantics = [#tpu.dimension_semantics<parallel>, #tpu.dimension_semantics<parallel>], iteration_bounds = array<i64: 1, 1>, scalar_prefetch = 0 : i64, scratch_operands = 0 : i64, tpu.core_type = #tpu.core_type<tc>, window_params = [{transform_indices = @transform_0, window_bounds = array<i64: 512, 256>}, {transform_indices = @transform_1, window_bounds = array<i64: 256, 256>}, {transform_indices = @transform_2, window_bounds = array<i64: 1, 256>}, {transform_indices = @transform_3, window_bounds = array<i64: 1, 256>}, {transform_indices = @transform_4, window_bounds = array<i64: 512, 256>}]} {
    %c0 = arith.constant 0 : index
    %c0_0 = arith.constant 0 : index
    %0 = vector.load %arg2[%c0, %c0_0] : memref<512x256xbf16, #tpu.memory_space<vmem>>, vector<512x256xbf16>
    %c0_1 = arith.constant 0 : index
    %c0_2 = arith.constant 0 : index
    %1 = vector.load %arg3[%c0_1, %c0_2] : memref<256x256xbf16, #tpu.memory_space<vmem>>, vector<256x256xbf16>
    %cst = arith.constant dense<0.000000e+00> : vector<512x256xf32>
    %2 = tpu.matmul %0, %1, %cst {dimension_numbers = #tpu.dot_dimension_numbers<[1], [0], [0], [1], [0, 0, 1, 1], [], []>} : vector<512x256xbf16>, vector<256x256xbf16>, vector<512x256xf32> -> vector<512x256xf32>
    %c0_3 = arith.constant 0 : index
    %c0_4 = arith.constant 0 : index
    %3 = vector.load %arg4[%c0_3, %c0_4] : memref<1x256xf32, #tpu.memory_space<vmem>>, vector<1x256xf32>
    %4 = vector.broadcast %3 : vector<1x256xf32> to vector<512x256xf32>
    %5 = arith.mulf %2, %4 : vector<512x256xf32>
    %c0_5 = arith.constant 0 : index
    %c0_6 = arith.constant 0 : index
    %6 = vector.load %arg5[%c0_5, %c0_6] : memref<1x256xf32, #tpu.memory_space<vmem>>, vector<1x256xf32>
    %7 = vector.broadcast %6 : vector<1x256xf32> to vector<512x256xf32>
    %8 = arith.addf %5, %7 : vector<512x256xf32>
    %9 = arith.truncf %8 : vector<512x256xf32> to vector<512x256xbf16>
    %c0_7 = arith.constant 0 : index
    %c0_8 = arith.constant 0 : index
    %10 = vector.load %arg6[%c0_7, %c0_8] : memref<512x256xbf16, #tpu.memory_space<vmem>>, vector<512x256xbf16>
    tpu.vector_store %arg6[%c0_7, %c0_8], %9 {strides = array<i32>} : memref<512x256xbf16, #tpu.memory_space<vmem>>, vector<512x256xbf16>,
    return
  }
  func.func @transform_0(%arg0: i32, %arg1: i32) -> (i32, i32) {
    %c0_i32 = arith.constant 0 : i32
    %c0_i32_0 = arith.constant 0 : i32
    return %arg0, %c0_i32 : i32, i32
  }
  func.func @transform_1(%arg0: i32, %arg1: i32) -> (i32, i32) {
    %c0_i32 = arith.constant 0 : i32
    %c0_i32_0 = arith.constant 0 : i32
    return %c0_i32, %arg1 : i32, i32
  }
  func.func @transform_2(%arg0: i32, %arg1: i32) -> (i32, i32) {
    %c0_i32 = arith.constant 0 : i32
    %c0_i32_0 = arith.constant 0 : i32
    return %c0_i32, %arg1 : i32, i32
  }
  func.func @transform_3(%arg0: i32, %arg1: i32) -> (i32, i32) {
    %c0_i32 = arith.constant 0 : i32
    %c0_i32_0 = arith.constant 0 : i32
    return %c0_i32, %arg1 : i32, i32
  }
  func.func @transform_4(%arg0: i32, %arg1: i32) -> (i32, i32) {
    %c0_i32 = arith.constant 0 : i32
    return %arg0, %arg1 : i32, i32
  }
}

module attributes {stable_mosaic.version = 11 : i64} {
  func.func @kernel(%arg0: i32, %arg1: memref<128x16xbf16, #tpu.memory_space<vmem>>, %arg2: memref<8x16x256xbf16, #tpu.memory_space<vmem>>, %arg3: memref<8x128x256xbf16, #tpu.memory_space<vmem>>) attributes {dimension_semantics = [#tpu.dimension_semantics<parallel>], iteration_bounds = array<i64: 8>, scalar_prefetch = 0 : i64, scratch_operands = 0 : i64, tpu.core_type = #tpu.core_type<tc>, window_params = [{pipeline_mode = #tpu.pipeline_mode<synchronous>, transform_indices = @transform_0, window_bounds = array<i64: 128, 16>}, {transform_indices = @transform_1, window_bounds = array<i64: 8, 16, 256>}, {transform_indices = @transform_2, window_bounds = array<i64: 8, 128, 256>}]} {
    %c0 = arith.constant 0 : index
    %c0_0 = arith.constant 0 : index
    %0 = vector.load %arg1[%c0, %c0_0] : memref<128x16xbf16, #tpu.memory_space<vmem>>, vector<128x16xbf16>
    %c0_1 = arith.constant 0 : index
    %c0_2 = arith.constant 0 : index
    %c0_3 = arith.constant 0 : index
    %1 = vector.load %arg2[%c0_1, %c0_2, %c0_3] : memref<8x16x256xbf16, #tpu.memory_space<vmem>>, vector<1x16x256xbf16>
    %2 = vector.shape_cast %1 : vector<1x16x256xbf16> to vector<16x256xbf16>
    %cst = arith.constant dense<0.000000e+00> : vector<128x256xf32>
    %3 = tpu.matmul %0, %2, %cst {dimension_numbers = #tpu.dot_dimension_numbers<[1], [0], [0], [1], [0, 0, 1, 1], [], []>} : vector<128x16xbf16>, vector<16x256xbf16>, vector<128x256xf32> -> vector<128x256xf32>
    %4 = arith.truncf %3 : vector<128x256xf32> to vector<128x256xbf16>
    %c0_4 = arith.constant 0 : index
    %c0_5 = arith.constant 0 : index
    %c0_6 = arith.constant 0 : index
    %5 = vector.load %arg3[%c0_4, %c0_5, %c0_6] : memref<8x128x256xbf16, #tpu.memory_space<vmem>>, vector<1x128x256xbf16>
    %6 = vector.shape_cast %5 : vector<1x128x256xbf16> to vector<128x256xbf16>
    %7 = vector.shape_cast %4 : vector<128x256xbf16> to vector<1x128x256xbf16>
    tpu.vector_store %arg3[%c0_4, %c0_5, %c0_6], %7 {strides = array<i32>} : memref<8x128x256xbf16, #tpu.memory_space<vmem>>, vector<1x128x256xbf16>,
    %c1 = arith.constant 1 : index
    %c0_7 = arith.constant 0 : index
    %c0_8 = arith.constant 0 : index
    %8 = vector.load %arg2[%c1, %c0_7, %c0_8] : memref<8x16x256xbf16, #tpu.memory_space<vmem>>, vector<1x16x256xbf16>
    %9 = vector.shape_cast %8 : vector<1x16x256xbf16> to vector<16x256xbf16>
    %cst_9 = arith.constant dense<0.000000e+00> : vector<128x256xf32>
    %10 = tpu.matmul %0, %9, %cst_9 {dimension_numbers = #tpu.dot_dimension_numbers<[1], [0], [0], [1], [0, 0, 1, 1], [], []>} : vector<128x16xbf16>, vector<16x256xbf16>, vector<128x256xf32> -> vector<128x256xf32>
    %11 = arith.truncf %10 : vector<128x256xf32> to vector<128x256xbf16>
    %c1_10 = arith.constant 1 : index
    %c0_11 = arith.constant 0 : index
    %c0_12 = arith.constant 0 : index
    %12 = vector.load %arg3[%c1_10, %c0_11, %c0_12] : memref<8x128x256xbf16, #tpu.memory_space<vmem>>, vector<1x128x256xbf16>
    %13 = vector.shape_cast %12 : vector<1x128x256xbf16> to vector<128x256xbf16>
    %14 = vector.shape_cast %11 : vector<128x256xbf16> to vector<1x128x256xbf16>
    tpu.vector_store %arg3[%c1_10, %c0_11, %c0_12], %14 {strides = array<i32>} : memref<8x128x256xbf16, #tpu.memory_space<vmem>>, vector<1x128x256xbf16>,
    %c2 = arith.constant 2 : index
    %c0_13 = arith.constant 0 : index
    %c0_14 = arith.constant 0 : index
    %15 = vector.load %arg2[%c2, %c0_13, %c0_14] : memref<8x16x256xbf16, #tpu.memory_space<vmem>>, vector<1x16x256xbf16>
    %16 = vector.shape_cast %15 : vector<1x16x256xbf16> to vector<16x256xbf16>
    %cst_15 = arith.constant dense<0.000000e+00> : vector<128x256xf32>
    %17 = tpu.matmul %0, %16, %cst_15 {dimension_numbers = #tpu.dot_dimension_numbers<[1], [0], [0], [1], [0, 0, 1, 1], [], []>} : vector<128x16xbf16>, vector<16x256xbf16>, vector<128x256xf32> -> vector<128x256xf32>
    %18 = arith.truncf %17 : vector<128x256xf32> to vector<128x256xbf16>
    %c2_16 = arith.constant 2 : index
    %c0_17 = arith.constant 0 : index
    %c0_18 = arith.constant 0 : index
    %19 = vector.load %arg3[%c2_16, %c0_17, %c0_18] : memref<8x128x256xbf16, #tpu.memory_space<vmem>>, vector<1x128x256xbf16>
    %20 = vector.shape_cast %19 : vector<1x128x256xbf16> to vector<128x256xbf16>
    %21 = vector.shape_cast %18 : vector<128x256xbf16> to vector<1x128x256xbf16>
    tpu.vector_store %arg3[%c2_16, %c0_17, %c0_18], %21 {strides = array<i32>} : memref<8x128x256xbf16, #tpu.memory_space<vmem>>, vector<1x128x256xbf16>,
    %c3 = arith.constant 3 : index
    %c0_19 = arith.constant 0 : index
    %c0_20 = arith.constant 0 : index
    %22 = vector.load %arg2[%c3, %c0_19, %c0_20] : memref<8x16x256xbf16, #tpu.memory_space<vmem>>, vector<1x16x256xbf16>
    %23 = vector.shape_cast %22 : vector<1x16x256xbf16> to vector<16x256xbf16>
    %cst_21 = arith.constant dense<0.000000e+00> : vector<128x256xf32>
    %24 = tpu.matmul %0, %23, %cst_21 {dimension_numbers = #tpu.dot_dimension_numbers<[1], [0], [0], [1], [0, 0, 1, 1], [], []>} : vector<128x16xbf16>, vector<16x256xbf16>, vector<128x256xf32> -> vector<128x256xf32>
    %25 = arith.truncf %24 : vector<128x256xf32> to vector<128x256xbf16>
    %c3_22 = arith.constant 3 : index
    %c0_23 = arith.constant 0 : index
    %c0_24 = arith.constant 0 : index
    %26 = vector.load %arg3[%c3_22, %c0_23, %c0_24] : memref<8x128x256xbf16, #tpu.memory_space<vmem>>, vector<1x128x256xbf16>
    %27 = vector.shape_cast %26 : vector<1x128x256xbf16> to vector<128x256xbf16>
    %28 = vector.shape_cast %25 : vector<128x256xbf16> to vector<1x128x256xbf16>
    tpu.vector_store %arg3[%c3_22, %c0_23, %c0_24], %28 {strides = array<i32>} : memref<8x128x256xbf16, #tpu.memory_space<vmem>>, vector<1x128x256xbf16>,
    %c4 = arith.constant 4 : index
    %c0_25 = arith.constant 0 : index
    %c0_26 = arith.constant 0 : index
    %29 = vector.load %arg2[%c4, %c0_25, %c0_26] : memref<8x16x256xbf16, #tpu.memory_space<vmem>>, vector<1x16x256xbf16>
    %30 = vector.shape_cast %29 : vector<1x16x256xbf16> to vector<16x256xbf16>
    %cst_27 = arith.constant dense<0.000000e+00> : vector<128x256xf32>
    %31 = tpu.matmul %0, %30, %cst_27 {dimension_numbers = #tpu.dot_dimension_numbers<[1], [0], [0], [1], [0, 0, 1, 1], [], []>} : vector<128x16xbf16>, vector<16x256xbf16>, vector<128x256xf32> -> vector<128x256xf32>
    %32 = arith.truncf %31 : vector<128x256xf32> to vector<128x256xbf16>
    %c4_28 = arith.constant 4 : index
    %c0_29 = arith.constant 0 : index
    %c0_30 = arith.constant 0 : index
    %33 = vector.load %arg3[%c4_28, %c0_29, %c0_30] : memref<8x128x256xbf16, #tpu.memory_space<vmem>>, vector<1x128x256xbf16>
    %34 = vector.shape_cast %33 : vector<1x128x256xbf16> to vector<128x256xbf16>
    %35 = vector.shape_cast %32 : vector<128x256xbf16> to vector<1x128x256xbf16>
    tpu.vector_store %arg3[%c4_28, %c0_29, %c0_30], %35 {strides = array<i32>} : memref<8x128x256xbf16, #tpu.memory_space<vmem>>, vector<1x128x256xbf16>,
    %c5 = arith.constant 5 : index
    %c0_31 = arith.constant 0 : index
    %c0_32 = arith.constant 0 : index
    %36 = vector.load %arg2[%c5, %c0_31, %c0_32] : memref<8x16x256xbf16, #tpu.memory_space<vmem>>, vector<1x16x256xbf16>
    %37 = vector.shape_cast %36 : vector<1x16x256xbf16> to vector<16x256xbf16>
    %cst_33 = arith.constant dense<0.000000e+00> : vector<128x256xf32>
    %38 = tpu.matmul %0, %37, %cst_33 {dimension_numbers = #tpu.dot_dimension_numbers<[1], [0], [0], [1], [0, 0, 1, 1], [], []>} : vector<128x16xbf16>, vector<16x256xbf16>, vector<128x256xf32> -> vector<128x256xf32>
    %39 = arith.truncf %38 : vector<128x256xf32> to vector<128x256xbf16>
    %c5_34 = arith.constant 5 : index
    %c0_35 = arith.constant 0 : index
    %c0_36 = arith.constant 0 : index
    %40 = vector.load %arg3[%c5_34, %c0_35, %c0_36] : memref<8x128x256xbf16, #tpu.memory_space<vmem>>, vector<1x128x256xbf16>
    %41 = vector.shape_cast %40 : vector<1x128x256xbf16> to vector<128x256xbf16>
    %42 = vector.shape_cast %39 : vector<128x256xbf16> to vector<1x128x256xbf16>
    tpu.vector_store %arg3[%c5_34, %c0_35, %c0_36], %42 {strides = array<i32>} : memref<8x128x256xbf16, #tpu.memory_space<vmem>>, vector<1x128x256xbf16>,
    %c6 = arith.constant 6 : index
    %c0_37 = arith.constant 0 : index
    %c0_38 = arith.constant 0 : index
    %43 = vector.load %arg2[%c6, %c0_37, %c0_38] : memref<8x16x256xbf16, #tpu.memory_space<vmem>>, vector<1x16x256xbf16>
    %44 = vector.shape_cast %43 : vector<1x16x256xbf16> to vector<16x256xbf16>
    %cst_39 = arith.constant dense<0.000000e+00> : vector<128x256xf32>
    %45 = tpu.matmul %0, %44, %cst_39 {dimension_numbers = #tpu.dot_dimension_numbers<[1], [0], [0], [1], [0, 0, 1, 1], [], []>} : vector<128x16xbf16>, vector<16x256xbf16>, vector<128x256xf32> -> vector<128x256xf32>
    %46 = arith.truncf %45 : vector<128x256xf32> to vector<128x256xbf16>
    %c6_40 = arith.constant 6 : index
    %c0_41 = arith.constant 0 : index
    %c0_42 = arith.constant 0 : index
    %47 = vector.load %arg3[%c6_40, %c0_41, %c0_42] : memref<8x128x256xbf16, #tpu.memory_space<vmem>>, vector<1x128x256xbf16>
    %48 = vector.shape_cast %47 : vector<1x128x256xbf16> to vector<128x256xbf16>
    %49 = vector.shape_cast %46 : vector<128x256xbf16> to vector<1x128x256xbf16>
    tpu.vector_store %arg3[%c6_40, %c0_41, %c0_42], %49 {strides = array<i32>} : memref<8x128x256xbf16, #tpu.memory_space<vmem>>, vector<1x128x256xbf16>,
    %c7 = arith.constant 7 : index
    %c0_43 = arith.constant 0 : index
    %c0_44 = arith.constant 0 : index
    %50 = vector.load %arg2[%c7, %c0_43, %c0_44] : memref<8x16x256xbf16, #tpu.memory_space<vmem>>, vector<1x16x256xbf16>
    %51 = vector.shape_cast %50 : vector<1x16x256xbf16> to vector<16x256xbf16>
    %cst_45 = arith.constant dense<0.000000e+00> : vector<128x256xf32>
    %52 = tpu.matmul %0, %51, %cst_45 {dimension_numbers = #tpu.dot_dimension_numbers<[1], [0], [0], [1], [0, 0, 1, 1], [], []>} : vector<128x16xbf16>, vector<16x256xbf16>, vector<128x256xf32> -> vector<128x256xf32>
    %53 = arith.truncf %52 : vector<128x256xf32> to vector<128x256xbf16>
    %c7_46 = arith.constant 7 : index
    %c0_47 = arith.constant 0 : index
    %c0_48 = arith.constant 0 : index
    %54 = vector.load %arg3[%c7_46, %c0_47, %c0_48] : memref<8x128x256xbf16, #tpu.memory_space<vmem>>, vector<1x128x256xbf16>
    %55 = vector.shape_cast %54 : vector<1x128x256xbf16> to vector<128x256xbf16>
    %56 = vector.shape_cast %53 : vector<128x256xbf16> to vector<1x128x256xbf16>
    tpu.vector_store %arg3[%c7_46, %c0_47, %c0_48], %56 {strides = array<i32>} : memref<8x128x256xbf16, #tpu.memory_space<vmem>>, vector<1x128x256xbf16>,
    return
  }
  func.func @transform_0(%arg0: i32) -> (i32, i32) {
    %c0_i32 = arith.constant 0 : i32
    %c0_i32_0 = arith.constant 0 : i32
    %c0_i32_1 = arith.constant 0 : i32
    return %c0_i32, %c0_i32_0 : i32, i32
  }
  func.func @transform_1(%arg0: i32) -> (i32, i32, i32) {
    %c0_i32 = arith.constant 0 : i32
    %c0_i32_0 = arith.constant 0 : i32
    %c0_i32_1 = arith.constant 0 : i32
    return %arg0, %c0_i32, %c0_i32_0 : i32, i32, i32
  }
  func.func @transform_2(%arg0: i32) -> (i32, i32, i32) {
    %c0_i32 = arith.constant 0 : i32
    %c0_i32_0 = arith.constant 0 : i32
    %c0_i32_1 = arith.constant 0 : i32
    return %arg0, %c0_i32, %c0_i32_0 : i32, i32, i32
  }
}

module attributes {stable_mosaic.version = 11 : i64} {
  func.func @kernel(%arg0: i32, %arg1: i32, %arg2: memref<2048x72xbf16, #tpu.memory_space<vmem>>, %arg3: memref<72x128xbf16, #tpu.memory_space<vmem>>, %arg4: memref<1x128xf32, #tpu.memory_space<vmem>>, %arg5: memref<1x128xf32, #tpu.memory_space<vmem>>, %arg6: memref<2048x128xbf16, #tpu.memory_space<vmem>>) attributes {dimension_semantics = [#tpu.dimension_semantics<parallel>, #tpu.dimension_semantics<parallel>], iteration_bounds = array<i64: 2, 1>, scalar_prefetch = 0 : i64, scratch_operands = 0 : i64, tpu.core_type = #tpu.core_type<tc>, window_params = [{transform_indices = @transform_0, window_bounds = array<i64: 2048, 72>}, {transform_indices = @transform_1, window_bounds = array<i64: 72, 128>}, {transform_indices = @transform_2, window_bounds = array<i64: 1, 128>}, {transform_indices = @transform_3, window_bounds = array<i64: 1, 128>}, {transform_indices = @transform_4, window_bounds = array<i64: 2048, 128>}]} {
    %c0 = arith.constant 0 : index
    %c0_0 = arith.constant 0 : index
    %0 = vector.load %arg2[%c0, %c0_0] : memref<2048x72xbf16, #tpu.memory_space<vmem>>, vector<2048x72xbf16>
    %c0_1 = arith.constant 0 : index
    %c0_2 = arith.constant 0 : index
    %1 = vector.load %arg3[%c0_1, %c0_2] : memref<72x128xbf16, #tpu.memory_space<vmem>>, vector<72x128xbf16>
    %cst = arith.constant dense<0.000000e+00> : vector<2048x128xf32>
    %2 = tpu.matmul %0, %1, %cst {dimension_numbers = #tpu.dot_dimension_numbers<[1], [0], [0], [1], [0, 0, 1, 1], [], []>} : vector<2048x72xbf16>, vector<72x128xbf16>, vector<2048x128xf32> -> vector<2048x128xf32>
    %c0_3 = arith.constant 0 : index
    %c0_4 = arith.constant 0 : index
    %3 = vector.load %arg4[%c0_3, %c0_4] : memref<1x128xf32, #tpu.memory_space<vmem>>, vector<1x128xf32>
    %4 = vector.broadcast %3 : vector<1x128xf32> to vector<2048x128xf32>
    %5 = arith.mulf %2, %4 : vector<2048x128xf32>
    %c0_5 = arith.constant 0 : index
    %c0_6 = arith.constant 0 : index
    %6 = vector.load %arg5[%c0_5, %c0_6] : memref<1x128xf32, #tpu.memory_space<vmem>>, vector<1x128xf32>
    %7 = vector.broadcast %6 : vector<1x128xf32> to vector<2048x128xf32>
    %8 = arith.addf %5, %7 : vector<2048x128xf32>
    %9 = arith.truncf %8 : vector<2048x128xf32> to vector<2048x128xbf16>
    %c0_7 = arith.constant 0 : index
    %c0_8 = arith.constant 0 : index
    %10 = vector.load %arg6[%c0_7, %c0_8] : memref<2048x128xbf16, #tpu.memory_space<vmem>>, vector<2048x128xbf16>
    tpu.vector_store %arg6[%c0_7, %c0_8], %9 {strides = array<i32>} : memref<2048x128xbf16, #tpu.memory_space<vmem>>, vector<2048x128xbf16>,
    return
  }
  func.func @transform_0(%arg0: i32, %arg1: i32) -> (i32, i32) {
    %c0_i32 = arith.constant 0 : i32
    %c0_i32_0 = arith.constant 0 : i32
    return %arg0, %c0_i32 : i32, i32
  }
  func.func @transform_1(%arg0: i32, %arg1: i32) -> (i32, i32) {
    %c0_i32 = arith.constant 0 : i32
    %c0_i32_0 = arith.constant 0 : i32
    return %c0_i32, %arg1 : i32, i32
  }
  func.func @transform_2(%arg0: i32, %arg1: i32) -> (i32, i32) {
    %c0_i32 = arith.constant 0 : i32
    %c0_i32_0 = arith.constant 0 : i32
    return %c0_i32, %arg1 : i32, i32
  }
  func.func @transform_3(%arg0: i32, %arg1: i32) -> (i32, i32) {
    %c0_i32 = arith.constant 0 : i32
    %c0_i32_0 = arith.constant 0 : i32
    return %c0_i32, %arg1 : i32, i32
  }
  func.func @transform_4(%arg0: i32, %arg1: i32) -> (i32, i32) {
    %c0_i32 = arith.constant 0 : i32
    return %arg0, %arg1 : i32, i32
  }
}

module attributes {stable_mosaic.version = 11 : i64} {
  func.func @kernel(%arg0: i32, %arg1: i32, %arg2: memref<1024x288xbf16, #tpu.memory_space<vmem>>, %arg3: memref<288x128xbf16, #tpu.memory_space<vmem>>, %arg4: memref<1x128xf32, #tpu.memory_space<vmem>>, %arg5: memref<1x128xf32, #tpu.memory_space<vmem>>, %arg6: memref<1024x128xbf16, #tpu.memory_space<vmem>>) attributes {dimension_semantics = [#tpu.dimension_semantics<parallel>, #tpu.dimension_semantics<parallel>], iteration_bounds = array<i64: 2, 1>, scalar_prefetch = 0 : i64, scratch_operands = 0 : i64, tpu.core_type = #tpu.core_type<tc>, window_params = [{transform_indices = @transform_0, window_bounds = array<i64: 1024, 288>}, {transform_indices = @transform_1, window_bounds = array<i64: 288, 128>}, {transform_indices = @transform_2, window_bounds = array<i64: 1, 128>}, {transform_indices = @transform_3, window_bounds = array<i64: 1, 128>}, {transform_indices = @transform_4, window_bounds = array<i64: 1024, 128>}]} {
    %c0 = arith.constant 0 : index
    %c0_0 = arith.constant 0 : index
    %0 = vector.load %arg2[%c0, %c0_0] : memref<1024x288xbf16, #tpu.memory_space<vmem>>, vector<1024x288xbf16>
    %c0_1 = arith.constant 0 : index
    %c0_2 = arith.constant 0 : index
    %1 = vector.load %arg3[%c0_1, %c0_2] : memref<288x128xbf16, #tpu.memory_space<vmem>>, vector<288x128xbf16>
    %cst = arith.constant dense<0.000000e+00> : vector<1024x128xf32>
    %2 = tpu.matmul %0, %1, %cst {dimension_numbers = #tpu.dot_dimension_numbers<[1], [0], [0], [1], [0, 0, 1, 1], [], []>} : vector<1024x288xbf16>, vector<288x128xbf16>, vector<1024x128xf32> -> vector<1024x128xf32>
    %c0_3 = arith.constant 0 : index
    %c0_4 = arith.constant 0 : index
    %3 = vector.load %arg4[%c0_3, %c0_4] : memref<1x128xf32, #tpu.memory_space<vmem>>, vector<1x128xf32>
    %4 = vector.broadcast %3 : vector<1x128xf32> to vector<1024x128xf32>
    %5 = arith.mulf %2, %4 : vector<1024x128xf32>
    %c0_5 = arith.constant 0 : index
    %c0_6 = arith.constant 0 : index
    %6 = vector.load %arg5[%c0_5, %c0_6] : memref<1x128xf32, #tpu.memory_space<vmem>>, vector<1x128xf32>
    %7 = vector.broadcast %6 : vector<1x128xf32> to vector<1024x128xf32>
    %8 = arith.addf %5, %7 : vector<1024x128xf32>
    %9 = arith.truncf %8 : vector<1024x128xf32> to vector<1024x128xbf16>
    %c0_7 = arith.constant 0 : index
    %c0_8 = arith.constant 0 : index
    %10 = vector.load %arg6[%c0_7, %c0_8] : memref<1024x128xbf16, #tpu.memory_space<vmem>>, vector<1024x128xbf16>
    tpu.vector_store %arg6[%c0_7, %c0_8], %9 {strides = array<i32>} : memref<1024x128xbf16, #tpu.memory_space<vmem>>, vector<1024x128xbf16>,
    return
  }
  func.func @transform_0(%arg0: i32, %arg1: i32) -> (i32, i32) {
    %c0_i32 = arith.constant 0 : i32
    %c0_i32_0 = arith.constant 0 : i32
    return %arg0, %c0_i32 : i32, i32
  }
  func.func @transform_1(%arg0: i32, %arg1: i32) -> (i32, i32) {
    %c0_i32 = arith.constant 0 : i32
    %c0_i32_0 = arith.constant 0 : i32
    return %c0_i32, %arg1 : i32, i32
  }
  func.func @transform_2(%arg0: i32, %arg1: i32) -> (i32, i32) {
    %c0_i32 = arith.constant 0 : i32
    %c0_i32_0 = arith.constant 0 : i32
    return %c0_i32, %arg1 : i32, i32
  }
  func.func @transform_3(%arg0: i32, %arg1: i32) -> (i32, i32) {
    %c0_i32 = arith.constant 0 : i32
    %c0_i32_0 = arith.constant 0 : i32
    return %c0_i32, %arg1 : i32, i32
  }
  func.func @transform_4(%arg0: i32, %arg1: i32) -> (i32, i32) {
    %c0_i32 = arith.constant 0 : i32
    return %arg0, %arg1 : i32, i32
  }
}

module attributes {stable_mosaic.version = 11 : i64} {
  func.func @kernel(%arg0: i32, %arg1: i32, %arg2: memref<960x576xbf16, #tpu.memory_space<vmem>>, %arg3: memref<576x128xbf16, #tpu.memory_space<vmem>>, %arg4: memref<1x128xf32, #tpu.memory_space<vmem>>, %arg5: memref<1x128xf32, #tpu.memory_space<vmem>>, %arg6: memref<960x128xbf16, #tpu.memory_space<vmem>>) attributes {dimension_semantics = [#tpu.dimension_semantics<parallel>, #tpu.dimension_semantics<parallel>], iteration_bounds = array<i64: 1, 1>, scalar_prefetch = 0 : i64, scratch_operands = 0 : i64, tpu.core_type = #tpu.core_type<tc>, window_params = [{transform_indices = @transform_0, window_bounds = array<i64: 960, 576>}, {transform_indices = @transform_1, window_bounds = array<i64: 576, 128>}, {transform_indices = @transform_2, window_bounds = array<i64: 1, 128>}, {transform_indices = @transform_3, window_bounds = array<i64: 1, 128>}, {transform_indices = @transform_4, window_bounds = array<i64: 960, 128>}]} {
    %c0 = arith.constant 0 : index
    %c0_0 = arith.constant 0 : index
    %0 = vector.load %arg2[%c0, %c0_0] : memref<960x576xbf16, #tpu.memory_space<vmem>>, vector<960x576xbf16>
    %c0_1 = arith.constant 0 : index
    %c0_2 = arith.constant 0 : index
    %1 = vector.load %arg3[%c0_1, %c0_2] : memref<576x128xbf16, #tpu.memory_space<vmem>>, vector<576x128xbf16>
    %cst = arith.constant dense<0.000000e+00> : vector<960x128xf32>
    %2 = tpu.matmul %0, %1, %cst {dimension_numbers = #tpu.dot_dimension_numbers<[1], [0], [0], [1], [0, 0, 1, 1], [], []>} : vector<960x576xbf16>, vector<576x128xbf16>, vector<960x128xf32> -> vector<960x128xf32>
    %c0_3 = arith.constant 0 : index
    %c0_4 = arith.constant 0 : index
    %3 = vector.load %arg4[%c0_3, %c0_4] : memref<1x128xf32, #tpu.memory_space<vmem>>, vector<1x128xf32>
    %4 = vector.broadcast %3 : vector<1x128xf32> to vector<960x128xf32>
    %5 = arith.mulf %2, %4 : vector<960x128xf32>
    %c0_5 = arith.constant 0 : index
    %c0_6 = arith.constant 0 : index
    %6 = vector.load %arg5[%c0_5, %c0_6] : memref<1x128xf32, #tpu.memory_space<vmem>>, vector<1x128xf32>
    %7 = vector.broadcast %6 : vector<1x128xf32> to vector<960x128xf32>
    %8 = arith.addf %5, %7 : vector<960x128xf32>
    %9 = arith.truncf %8 : vector<960x128xf32> to vector<960x128xbf16>
    %c0_7 = arith.constant 0 : index
    %c0_8 = arith.constant 0 : index
    %10 = vector.load %arg6[%c0_7, %c0_8] : memref<960x128xbf16, #tpu.memory_space<vmem>>, vector<960x128xbf16>
    tpu.vector_store %arg6[%c0_7, %c0_8], %9 {strides = array<i32>} : memref<960x128xbf16, #tpu.memory_space<vmem>>, vector<960x128xbf16>,
    return
  }
  func.func @transform_0(%arg0: i32, %arg1: i32) -> (i32, i32) {
    %c0_i32 = arith.constant 0 : i32
    %c0_i32_0 = arith.constant 0 : i32
    return %arg0, %c0_i32 : i32, i32
  }
  func.func @transform_1(%arg0: i32, %arg1: i32) -> (i32, i32) {
    %c0_i32 = arith.constant 0 : i32
    %c0_i32_0 = arith.constant 0 : i32
    return %c0_i32, %arg1 : i32, i32
  }
  func.func @transform_2(%arg0: i32, %arg1: i32) -> (i32, i32) {
    %c0_i32 = arith.constant 0 : i32
    %c0_i32_0 = arith.constant 0 : i32
    return %c0_i32, %arg1 : i32, i32
  }
  func.func @transform_3(%arg0: i32, %arg1: i32) -> (i32, i32) {
    %c0_i32 = arith.constant 0 : i32
    %c0_i32_0 = arith.constant 0 : i32
    return %c0_i32, %arg1 : i32, i32
  }
  func.func @transform_4(%arg0: i32, %arg1: i32) -> (i32, i32) {
    %c0_i32 = arith.constant 0 : i32
    return %arg0, %arg1 : i32, i32
  }
}

module attributes {stable_mosaic.version = 11 : i64} {
  func.func @kernel(%arg0: i32, %arg1: i32, %arg2: memref<16x6x17x128xbf16, #tpu.memory_space<vmem>>, %arg3: memref<9x128x256xbf16, #tpu.memory_space<vmem>>, %arg4: memref<1x256xf32, #tpu.memory_space<vmem>>, %arg5: memref<1x256xf32, #tpu.memory_space<vmem>>, %arg6: memref<16x16x256xbf16, #tpu.memory_space<vmem>>) attributes {dimension_semantics = [#tpu.dimension_semantics<parallel>, #tpu.dimension_semantics<parallel>], iteration_bounds = array<i64: 1, 2>, scalar_prefetch = 0 : i64, scratch_operands = 0 : i64, tpu.core_type = #tpu.core_type<tc>, window_params = [{transform_indices = @transform_0, window_bounds = array<i64: 16, 6, 17, 128>}, {transform_indices = @transform_1, window_bounds = array<i64: 9, 128, 256>}, {transform_indices = @transform_2, window_bounds = array<i64: 1, 256>}, {transform_indices = @transform_3, window_bounds = array<i64: 1, 256>}, {transform_indices = @transform_4, window_bounds = array<i64: 16, 16, 256>}]} {
    %c0 = arith.constant 0 : index
    %c0_0 = arith.constant 0 : index
    %c0_1 = arith.constant 0 : index
    %c0_2 = arith.constant 0 : index
    %0 = vector.load %arg2[%c0, %c0_0, %c0_1, %c0_2] : memref<16x6x17x128xbf16, #tpu.memory_space<vmem>>, vector<16x1x16x128xbf16>
    %1 = vector.shape_cast %0 : vector<16x1x16x128xbf16> to vector<16x16x128xbf16>
    %2 = vector.shape_cast %1 : vector<16x16x128xbf16> to vector<256x128xbf16>
    %c0_3 = arith.constant 0 : index
    %c0_4 = arith.constant 0 : index
    %c0_5 = arith.constant 0 : index
    %3 = vector.load %arg3[%c0_3, %c0_4, %c0_5] : memref<9x128x256xbf16, #tpu.memory_space<vmem>>, vector<1x128x256xbf16>
    %4 = vector.shape_cast %3 : vector<1x128x256xbf16> to vector<128x256xbf16>
    %cst = arith.constant dense<0.000000e+00> : vector<256x256xf32>
    %5 = tpu.matmul %2, %4, %cst {dimension_numbers = #tpu.dot_dimension_numbers<[1], [0], [0], [1], [0, 0, 1, 1], [], []>} : vector<256x128xbf16>, vector<128x256xbf16>, vector<256x256xf32> -> vector<256x256xf32>
    %c0_6 = arith.constant 0 : index
    %c1 = arith.constant 1 : index
    %c0_7 = arith.constant 0 : index
    %c0_8 = arith.constant 0 : index
    %6 = vector.load %arg2[%c0_6, %c1, %c0_7, %c0_8] : memref<16x6x17x128xbf16, #tpu.memory_space<vmem>>, vector<16x1x16x128xbf16>
    %7 = vector.shape_cast %6 : vector<16x1x16x128xbf16> to vector<16x16x128xbf16>
    %8 = vector.shape_cast %7 : vector<16x16x128xbf16> to vector<256x128xbf16>
    %c1_9 = arith.constant 1 : index
    %c0_10 = arith.constant 0 : index
    %c0_11 = arith.constant 0 : index
    %9 = vector.load %arg3[%c1_9, %c0_10, %c0_11] : memref<9x128x256xbf16, #tpu.memory_space<vmem>>, vector<1x128x256xbf16>
    %10 = vector.shape_cast %9 : vector<1x128x256xbf16> to vector<128x256xbf16>
    %cst_12 = arith.constant dense<0.000000e+00> : vector<256x256xf32>
    %11 = tpu.matmul %8, %10, %cst_12 {dimension_numbers = #tpu.dot_dimension_numbers<[1], [0], [0], [1], [0, 0, 1, 1], [], []>} : vector<256x128xbf16>, vector<128x256xbf16>, vector<256x256xf32> -> vector<256x256xf32>
    %12 = arith.addf %5, %11 : vector<256x256xf32>
    %c0_13 = arith.constant 0 : index
    %c0_14 = arith.constant 0 : index
    %c1_15 = arith.constant 1 : index
    %c0_16 = arith.constant 0 : index
    %13 = vector.load %arg2[%c0_13, %c0_14, %c1_15, %c0_16] : memref<16x6x17x128xbf16, #tpu.memory_space<vmem>>, vector<16x1x16x128xbf16>
    %14 = vector.shape_cast %13 : vector<16x1x16x128xbf16> to vector<16x16x128xbf16>
    %15 = vector.shape_cast %14 : vector<16x16x128xbf16> to vector<256x128xbf16>
    %c2 = arith.constant 2 : index
    %c0_17 = arith.constant 0 : index
    %c0_18 = arith.constant 0 : index
    %16 = vector.load %arg3[%c2, %c0_17, %c0_18] : memref<9x128x256xbf16, #tpu.memory_space<vmem>>, vector<1x128x256xbf16>
    %17 = vector.shape_cast %16 : vector<1x128x256xbf16> to vector<128x256xbf16>
    %cst_19 = arith.constant dense<0.000000e+00> : vector<256x256xf32>
    %18 = tpu.matmul %15, %17, %cst_19 {dimension_numbers = #tpu.dot_dimension_numbers<[1], [0], [0], [1], [0, 0, 1, 1], [], []>} : vector<256x128xbf16>, vector<128x256xbf16>, vector<256x256xf32> -> vector<256x256xf32>
    %19 = arith.addf %12, %18 : vector<256x256xf32>
    %c0_20 = arith.constant 0 : index
    %c2_21 = arith.constant 2 : index
    %c0_22 = arith.constant 0 : index
    %c0_23 = arith.constant 0 : index
    %20 = vector.load %arg2[%c0_20, %c2_21, %c0_22, %c0_23] : memref<16x6x17x128xbf16, #tpu.memory_space<vmem>>, vector<16x1x16x128xbf16>
    %21 = vector.shape_cast %20 : vector<16x1x16x128xbf16> to vector<16x16x128xbf16>
    %22 = vector.shape_cast %21 : vector<16x16x128xbf16> to vector<256x128xbf16>
    %c3 = arith.constant 3 : index
    %c0_24 = arith.constant 0 : index
    %c0_25 = arith.constant 0 : index
    %23 = vector.load %arg3[%c3, %c0_24, %c0_25] : memref<9x128x256xbf16, #tpu.memory_space<vmem>>, vector<1x128x256xbf16>
    %24 = vector.shape_cast %23 : vector<1x128x256xbf16> to vector<128x256xbf16>
    %cst_26 = arith.constant dense<0.000000e+00> : vector<256x256xf32>
    %25 = tpu.matmul %22, %24, %cst_26 {dimension_numbers = #tpu.dot_dimension_numbers<[1], [0], [0], [1], [0, 0, 1, 1], [], []>} : vector<256x128xbf16>, vector<128x256xbf16>, vector<256x256xf32> -> vector<256x256xf32>
    %26 = arith.addf %19, %25 : vector<256x256xf32>
    %c0_27 = arith.constant 0 : index
    %c3_28 = arith.constant 3 : index
    %c0_29 = arith.constant 0 : index
    %c0_30 = arith.constant 0 : index
    %27 = vector.load %arg2[%c0_27, %c3_28, %c0_29, %c0_30] : memref<16x6x17x128xbf16, #tpu.memory_space<vmem>>, vector<16x1x16x128xbf16>
    %28 = vector.shape_cast %27 : vector<16x1x16x128xbf16> to vector<16x16x128xbf16>
    %29 = vector.shape_cast %28 : vector<16x16x128xbf16> to vector<256x128xbf16>
    %c4 = arith.constant 4 : index
    %c0_31 = arith.constant 0 : index
    %c0_32 = arith.constant 0 : index
    %30 = vector.load %arg3[%c4, %c0_31, %c0_32] : memref<9x128x256xbf16, #tpu.memory_space<vmem>>, vector<1x128x256xbf16>
    %31 = vector.shape_cast %30 : vector<1x128x256xbf16> to vector<128x256xbf16>
    %cst_33 = arith.constant dense<0.000000e+00> : vector<256x256xf32>
    %32 = tpu.matmul %29, %31, %cst_33 {dimension_numbers = #tpu.dot_dimension_numbers<[1], [0], [0], [1], [0, 0, 1, 1], [], []>} : vector<256x128xbf16>, vector<128x256xbf16>, vector<256x256xf32> -> vector<256x256xf32>
    %33 = arith.addf %26, %32 : vector<256x256xf32>
    %c0_34 = arith.constant 0 : index
    %c2_35 = arith.constant 2 : index
    %c1_36 = arith.constant 1 : index
    %c0_37 = arith.constant 0 : index
    %34 = vector.load %arg2[%c0_34, %c2_35, %c1_36, %c0_37] : memref<16x6x17x128xbf16, #tpu.memory_space<vmem>>, vector<16x1x16x128xbf16>
    %35 = vector.shape_cast %34 : vector<16x1x16x128xbf16> to vector<16x16x128xbf16>
    %36 = vector.shape_cast %35 : vector<16x16x128xbf16> to vector<256x128xbf16>
    %c5 = arith.constant 5 : index
    %c0_38 = arith.constant 0 : index
    %c0_39 = arith.constant 0 : index
    %37 = vector.load %arg3[%c5, %c0_38, %c0_39] : memref<9x128x256xbf16, #tpu.memory_space<vmem>>, vector<1x128x256xbf16>
    %38 = vector.shape_cast %37 : vector<1x128x256xbf16> to vector<128x256xbf16>
    %cst_40 = arith.constant dense<0.000000e+00> : vector<256x256xf32>
    %39 = tpu.matmul %36, %38, %cst_40 {dimension_numbers = #tpu.dot_dimension_numbers<[1], [0], [0], [1], [0, 0, 1, 1], [], []>} : vector<256x128xbf16>, vector<128x256xbf16>, vector<256x256xf32> -> vector<256x256xf32>
    %40 = arith.addf %33, %39 : vector<256x256xf32>
    %c0_41 = arith.constant 0 : index
    %c4_42 = arith.constant 4 : index
    %c0_43 = arith.constant 0 : index
    %c0_44 = arith.constant 0 : index
    %41 = vector.load %arg2[%c0_41, %c4_42, %c0_43, %c0_44] : memref<16x6x17x128xbf16, #tpu.memory_space<vmem>>, vector<16x1x16x128xbf16>
    %42 = vector.shape_cast %41 : vector<16x1x16x128xbf16> to vector<16x16x128xbf16>
    %43 = vector.shape_cast %42 : vector<16x16x128xbf16> to vector<256x128xbf16>
    %c6 = arith.constant 6 : index
    %c0_45 = arith.constant 0 : index
    %c0_46 = arith.constant 0 : index
    %44 = vector.load %arg3[%c6, %c0_45, %c0_46] : memref<9x128x256xbf16, #tpu.memory_space<vmem>>, vector<1x128x256xbf16>
    %45 = vector.shape_cast %44 : vector<1x128x256xbf16> to vector<128x256xbf16>
    %cst_47 = arith.constant dense<0.000000e+00> : vector<256x256xf32>
    %46 = tpu.matmul %43, %45, %cst_47 {dimension_numbers = #tpu.dot_dimension_numbers<[1], [0], [0], [1], [0, 0, 1, 1], [], []>} : vector<256x128xbf16>, vector<128x256xbf16>, vector<256x256xf32> -> vector<256x256xf32>
    %47 = arith.addf %40, %46 : vector<256x256xf32>
    %c0_48 = arith.constant 0 : index
    %c5_49 = arith.constant 5 : index
    %c0_50 = arith.constant 0 : index
    %c0_51 = arith.constant 0 : index
    %48 = vector.load %arg2[%c0_48, %c5_49, %c0_50, %c0_51] : memref<16x6x17x128xbf16, #tpu.memory_space<vmem>>, vector<16x1x16x128xbf16>
    %49 = vector.shape_cast %48 : vector<16x1x16x128xbf16> to vector<16x16x128xbf16>
    %50 = vector.shape_cast %49 : vector<16x16x128xbf16> to vector<256x128xbf16>
    %c7 = arith.constant 7 : index
    %c0_52 = arith.constant 0 : index
    %c0_53 = arith.constant 0 : index
    %51 = vector.load %arg3[%c7, %c0_52, %c0_53] : memref<9x128x256xbf16, #tpu.memory_space<vmem>>, vector<1x128x256xbf16>
    %52 = vector.shape_cast %51 : vector<1x128x256xbf16> to vector<128x256xbf16>
    %cst_54 = arith.constant dense<0.000000e+00> : vector<256x256xf32>
    %53 = tpu.matmul %50, %52, %cst_54 {dimension_numbers = #tpu.dot_dimension_numbers<[1], [0], [0], [1], [0, 0, 1, 1], [], []>} : vector<256x128xbf16>, vector<128x256xbf16>, vector<256x256xf32> -> vector<256x256xf32>
    %54 = arith.addf %47, %53 : vector<256x256xf32>
    %c0_55 = arith.constant 0 : index
    %c4_56 = arith.constant 4 : index
    %c1_57 = arith.constant 1 : index
    %c0_58 = arith.constant 0 : index
    %55 = vector.load %arg2[%c0_55, %c4_56, %c1_57, %c0_58] : memref<16x6x17x128xbf16, #tpu.memory_space<vmem>>, vector<16x1x16x128xbf16>
    %56 = vector.shape_cast %55 : vector<16x1x16x128xbf16> to vector<16x16x128xbf16>
    %57 = vector.shape_cast %56 : vector<16x16x128xbf16> to vector<256x128xbf16>
    %c8 = arith.constant 8 : index
    %c0_59 = arith.constant 0 : index
    %c0_60 = arith.constant 0 : index
    %58 = vector.load %arg3[%c8, %c0_59, %c0_60] : memref<9x128x256xbf16, #tpu.memory_space<vmem>>, vector<1x128x256xbf16>
    %59 = vector.shape_cast %58 : vector<1x128x256xbf16> to vector<128x256xbf16>
    %cst_61 = arith.constant dense<0.000000e+00> : vector<256x256xf32>
    %60 = tpu.matmul %57, %59, %cst_61 {dimension_numbers = #tpu.dot_dimension_numbers<[1], [0], [0], [1], [0, 0, 1, 1], [], []>} : vector<256x128xbf16>, vector<128x256xbf16>, vector<256x256xf32> -> vector<256x256xf32>
    %61 = arith.addf %54, %60 : vector<256x256xf32>
    %c0_62 = arith.constant 0 : index
    %c0_63 = arith.constant 0 : index
    %62 = vector.load %arg4[%c0_62, %c0_63] : memref<1x256xf32, #tpu.memory_space<vmem>>, vector<1x256xf32>
    %63 = vector.broadcast %62 : vector<1x256xf32> to vector<256x256xf32>
    %64 = arith.mulf %61, %63 : vector<256x256xf32>
    %c0_64 = arith.constant 0 : index
    %c0_65 = arith.constant 0 : index
    %65 = vector.load %arg5[%c0_64, %c0_65] : memref<1x256xf32, #tpu.memory_space<vmem>>, vector<1x256xf32>
    %66 = vector.broadcast %65 : vector<1x256xf32> to vector<256x256xf32>
    %67 = arith.addf %64, %66 : vector<256x256xf32>
    %68 = vector.shape_cast %67 : vector<256x256xf32> to vector<16x16x256xf32>
    %69 = arith.truncf %68 : vector<16x16x256xf32> to vector<16x16x256xbf16>
    %c0_66 = arith.constant 0 : index
    %c0_67 = arith.constant 0 : index
    %c0_68 = arith.constant 0 : index
    %70 = vector.load %arg6[%c0_66, %c0_67, %c0_68] : memref<16x16x256xbf16, #tpu.memory_space<vmem>>, vector<16x16x256xbf16>
    tpu.vector_store %arg6[%c0_66, %c0_67, %c0_68], %69 {strides = array<i32>} : memref<16x16x256xbf16, #tpu.memory_space<vmem>>, vector<16x16x256xbf16>,
    return
  }
  func.func @transform_0(%arg0: i32, %arg1: i32) -> (i32, i32, i32, i32) {
    %c0_i32 = arith.constant 0 : i32
    %c0_i32_0 = arith.constant 0 : i32
    %c0_i32_1 = arith.constant 0 : i32
    %c0_i32_2 = arith.constant 0 : i32
    return %arg1, %c0_i32, %c0_i32_0, %c0_i32_1 : i32, i32, i32, i32
  }
  func.func @transform_1(%arg0: i32, %arg1: i32) -> (i32, i32, i32) {
    %c0_i32 = arith.constant 0 : i32
    %c0_i32_0 = arith.constant 0 : i32
    %c0_i32_1 = arith.constant 0 : i32
    return %c0_i32, %c0_i32_0, %arg0 : i32, i32, i32
  }
  func.func @transform_2(%arg0: i32, %arg1: i32) -> (i32, i32) {
    %c0_i32 = arith.constant 0 : i32
    %c0_i32_0 = arith.constant 0 : i32
    return %c0_i32, %arg0 : i32, i32
  }
  func.func @transform_3(%arg0: i32, %arg1: i32) -> (i32, i32) {
    %c0_i32 = arith.constant 0 : i32
    %c0_i32_0 = arith.constant 0 : i32
    return %c0_i32, %arg0 : i32, i32
  }
  func.func @transform_4(%arg0: i32, %arg1: i32) -> (i32, i32, i32) {
    %c0_i32 = arith.constant 0 : i32
    %c0_i32_0 = arith.constant 0 : i32
    return %arg1, %c0_i32, %arg0 : i32, i32, i32
  }
}

module attributes {stable_mosaic.version = 11 : i64} {
  func.func @kernel(%arg0: i32, %arg1: i32, %arg2: memref<16x6x17x256xbf16, #tpu.memory_space<vmem>>, %arg3: memref<9x256x512xbf16, #tpu.memory_space<vmem>>, %arg4: memref<1x512xf32, #tpu.memory_space<vmem>>, %arg5: memref<1x512xf32, #tpu.memory_space<vmem>>, %arg6: memref<16x16x512xbf16, #tpu.memory_space<vmem>>) attributes {dimension_semantics = [#tpu.dimension_semantics<parallel>, #tpu.dimension_semantics<parallel>], iteration_bounds = array<i64: 1, 1>, scalar_prefetch = 0 : i64, scratch_operands = 0 : i64, tpu.core_type = #tpu.core_type<tc>, window_params = [{transform_indices = @transform_0, window_bounds = array<i64: 16, 6, 17, 256>}, {transform_indices = @transform_1, window_bounds = array<i64: 9, 256, 512>}, {transform_indices = @transform_2, window_bounds = array<i64: 1, 512>}, {transform_indices = @transform_3, window_bounds = array<i64: 1, 512>}, {transform_indices = @transform_4, window_bounds = array<i64: 16, 16, 512>}]} {
    %c0 = arith.constant 0 : index
    %c0_0 = arith.constant 0 : index
    %c0_1 = arith.constant 0 : index
    %c0_2 = arith.constant 0 : index
    %0 = vector.load %arg2[%c0, %c0_0, %c0_1, %c0_2] : memref<16x6x17x256xbf16, #tpu.memory_space<vmem>>, vector<16x1x16x256xbf16>
    %1 = vector.shape_cast %0 : vector<16x1x16x256xbf16> to vector<16x16x256xbf16>
    %2 = vector.shape_cast %1 : vector<16x16x256xbf16> to vector<256x256xbf16>
    %c0_3 = arith.constant 0 : index
    %c0_4 = arith.constant 0 : index
    %c0_5 = arith.constant 0 : index
    %3 = vector.load %arg3[%c0_3, %c0_4, %c0_5] : memref<9x256x512xbf16, #tpu.memory_space<vmem>>, vector<1x256x512xbf16>
    %4 = vector.shape_cast %3 : vector<1x256x512xbf16> to vector<256x512xbf16>
    %cst = arith.constant dense<0.000000e+00> : vector<256x512xf32>
    %5 = tpu.matmul %2, %4, %cst {dimension_numbers = #tpu.dot_dimension_numbers<[1], [0], [0], [1], [0, 0, 1, 1], [], []>} : vector<256x256xbf16>, vector<256x512xbf16>, vector<256x512xf32> -> vector<256x512xf32>
    %c0_6 = arith.constant 0 : index
    %c1 = arith.constant 1 : index
    %c0_7 = arith.constant 0 : index
    %c0_8 = arith.constant 0 : index
    %6 = vector.load %arg2[%c0_6, %c1, %c0_7, %c0_8] : memref<16x6x17x256xbf16, #tpu.memory_space<vmem>>, vector<16x1x16x256xbf16>
    %7 = vector.shape_cast %6 : vector<16x1x16x256xbf16> to vector<16x16x256xbf16>
    %8 = vector.shape_cast %7 : vector<16x16x256xbf16> to vector<256x256xbf16>
    %c1_9 = arith.constant 1 : index
    %c0_10 = arith.constant 0 : index
    %c0_11 = arith.constant 0 : index
    %9 = vector.load %arg3[%c1_9, %c0_10, %c0_11] : memref<9x256x512xbf16, #tpu.memory_space<vmem>>, vector<1x256x512xbf16>
    %10 = vector.shape_cast %9 : vector<1x256x512xbf16> to vector<256x512xbf16>
    %cst_12 = arith.constant dense<0.000000e+00> : vector<256x512xf32>
    %11 = tpu.matmul %8, %10, %cst_12 {dimension_numbers = #tpu.dot_dimension_numbers<[1], [0], [0], [1], [0, 0, 1, 1], [], []>} : vector<256x256xbf16>, vector<256x512xbf16>, vector<256x512xf32> -> vector<256x512xf32>
    %12 = arith.addf %5, %11 : vector<256x512xf32>
    %c0_13 = arith.constant 0 : index
    %c0_14 = arith.constant 0 : index
    %c1_15 = arith.constant 1 : index
    %c0_16 = arith.constant 0 : index
    %13 = vector.load %arg2[%c0_13, %c0_14, %c1_15, %c0_16] : memref<16x6x17x256xbf16, #tpu.memory_space<vmem>>, vector<16x1x16x256xbf16>
    %14 = vector.shape_cast %13 : vector<16x1x16x256xbf16> to vector<16x16x256xbf16>
    %15 = vector.shape_cast %14 : vector<16x16x256xbf16> to vector<256x256xbf16>
    %c2 = arith.constant 2 : index
    %c0_17 = arith.constant 0 : index
    %c0_18 = arith.constant 0 : index
    %16 = vector.load %arg3[%c2, %c0_17, %c0_18] : memref<9x256x512xbf16, #tpu.memory_space<vmem>>, vector<1x256x512xbf16>
    %17 = vector.shape_cast %16 : vector<1x256x512xbf16> to vector<256x512xbf16>
    %cst_19 = arith.constant dense<0.000000e+00> : vector<256x512xf32>
    %18 = tpu.matmul %15, %17, %cst_19 {dimension_numbers = #tpu.dot_dimension_numbers<[1], [0], [0], [1], [0, 0, 1, 1], [], []>} : vector<256x256xbf16>, vector<256x512xbf16>, vector<256x512xf32> -> vector<256x512xf32>
    %19 = arith.addf %12, %18 : vector<256x512xf32>
    %c0_20 = arith.constant 0 : index
    %c2_21 = arith.constant 2 : index
    %c0_22 = arith.constant 0 : index
    %c0_23 = arith.constant 0 : index
    %20 = vector.load %arg2[%c0_20, %c2_21, %c0_22, %c0_23] : memref<16x6x17x256xbf16, #tpu.memory_space<vmem>>, vector<16x1x16x256xbf16>
    %21 = vector.shape_cast %20 : vector<16x1x16x256xbf16> to vector<16x16x256xbf16>
    %22 = vector.shape_cast %21 : vector<16x16x256xbf16> to vector<256x256xbf16>
    %c3 = arith.constant 3 : index
    %c0_24 = arith.constant 0 : index
    %c0_25 = arith.constant 0 : index
    %23 = vector.load %arg3[%c3, %c0_24, %c0_25] : memref<9x256x512xbf16, #tpu.memory_space<vmem>>, vector<1x256x512xbf16>
    %24 = vector.shape_cast %23 : vector<1x256x512xbf16> to vector<256x512xbf16>
    %cst_26 = arith.constant dense<0.000000e+00> : vector<256x512xf32>
    %25 = tpu.matmul %22, %24, %cst_26 {dimension_numbers = #tpu.dot_dimension_numbers<[1], [0], [0], [1], [0, 0, 1, 1], [], []>} : vector<256x256xbf16>, vector<256x512xbf16>, vector<256x512xf32> -> vector<256x512xf32>
    %26 = arith.addf %19, %25 : vector<256x512xf32>
    %c0_27 = arith.constant 0 : index
    %c3_28 = arith.constant 3 : index
    %c0_29 = arith.constant 0 : index
    %c0_30 = arith.constant 0 : index
    %27 = vector.load %arg2[%c0_27, %c3_28, %c0_29, %c0_30] : memref<16x6x17x256xbf16, #tpu.memory_space<vmem>>, vector<16x1x16x256xbf16>
    %28 = vector.shape_cast %27 : vector<16x1x16x256xbf16> to vector<16x16x256xbf16>
    %29 = vector.shape_cast %28 : vector<16x16x256xbf16> to vector<256x256xbf16>
    %c4 = arith.constant 4 : index
    %c0_31 = arith.constant 0 : index
    %c0_32 = arith.constant 0 : index
    %30 = vector.load %arg3[%c4, %c0_31, %c0_32] : memref<9x256x512xbf16, #tpu.memory_space<vmem>>, vector<1x256x512xbf16>
    %31 = vector.shape_cast %30 : vector<1x256x512xbf16> to vector<256x512xbf16>
    %cst_33 = arith.constant dense<0.000000e+00> : vector<256x512xf32>
    %32 = tpu.matmul %29, %31, %cst_33 {dimension_numbers = #tpu.dot_dimension_numbers<[1], [0], [0], [1], [0, 0, 1, 1], [], []>} : vector<256x256xbf16>, vector<256x512xbf16>, vector<256x512xf32> -> vector<256x512xf32>
    %33 = arith.addf %26, %32 : vector<256x512xf32>
    %c0_34 = arith.constant 0 : index
    %c2_35 = arith.constant 2 : index
    %c1_36 = arith.constant 1 : index
    %c0_37 = arith.constant 0 : index
    %34 = vector.load %arg2[%c0_34, %c2_35, %c1_36, %c0_37] : memref<16x6x17x256xbf16, #tpu.memory_space<vmem>>, vector<16x1x16x256xbf16>
    %35 = vector.shape_cast %34 : vector<16x1x16x256xbf16> to vector<16x16x256xbf16>
    %36 = vector.shape_cast %35 : vector<16x16x256xbf16> to vector<256x256xbf16>
    %c5 = arith.constant 5 : index
    %c0_38 = arith.constant 0 : index
    %c0_39 = arith.constant 0 : index
    %37 = vector.load %arg3[%c5, %c0_38, %c0_39] : memref<9x256x512xbf16, #tpu.memory_space<vmem>>, vector<1x256x512xbf16>
    %38 = vector.shape_cast %37 : vector<1x256x512xbf16> to vector<256x512xbf16>
    %cst_40 = arith.constant dense<0.000000e+00> : vector<256x512xf32>
    %39 = tpu.matmul %36, %38, %cst_40 {dimension_numbers = #tpu.dot_dimension_numbers<[1], [0], [0], [1], [0, 0, 1, 1], [], []>} : vector<256x256xbf16>, vector<256x512xbf16>, vector<256x512xf32> -> vector<256x512xf32>
    %40 = arith.addf %33, %39 : vector<256x512xf32>
    %c0_41 = arith.constant 0 : index
    %c4_42 = arith.constant 4 : index
    %c0_43 = arith.constant 0 : index
    %c0_44 = arith.constant 0 : index
    %41 = vector.load %arg2[%c0_41, %c4_42, %c0_43, %c0_44] : memref<16x6x17x256xbf16, #tpu.memory_space<vmem>>, vector<16x1x16x256xbf16>
    %42 = vector.shape_cast %41 : vector<16x1x16x256xbf16> to vector<16x16x256xbf16>
    %43 = vector.shape_cast %42 : vector<16x16x256xbf16> to vector<256x256xbf16>
    %c6 = arith.constant 6 : index
    %c0_45 = arith.constant 0 : index
    %c0_46 = arith.constant 0 : index
    %44 = vector.load %arg3[%c6, %c0_45, %c0_46] : memref<9x256x512xbf16, #tpu.memory_space<vmem>>, vector<1x256x512xbf16>
    %45 = vector.shape_cast %44 : vector<1x256x512xbf16> to vector<256x512xbf16>
    %cst_47 = arith.constant dense<0.000000e+00> : vector<256x512xf32>
    %46 = tpu.matmul %43, %45, %cst_47 {dimension_numbers = #tpu.dot_dimension_numbers<[1], [0], [0], [1], [0, 0, 1, 1], [], []>} : vector<256x256xbf16>, vector<256x512xbf16>, vector<256x512xf32> -> vector<256x512xf32>
    %47 = arith.addf %40, %46 : vector<256x512xf32>
    %c0_48 = arith.constant 0 : index
    %c5_49 = arith.constant 5 : index
    %c0_50 = arith.constant 0 : index
    %c0_51 = arith.constant 0 : index
    %48 = vector.load %arg2[%c0_48, %c5_49, %c0_50, %c0_51] : memref<16x6x17x256xbf16, #tpu.memory_space<vmem>>, vector<16x1x16x256xbf16>
    %49 = vector.shape_cast %48 : vector<16x1x16x256xbf16> to vector<16x16x256xbf16>
    %50 = vector.shape_cast %49 : vector<16x16x256xbf16> to vector<256x256xbf16>
    %c7 = arith.constant 7 : index
    %c0_52 = arith.constant 0 : index
    %c0_53 = arith.constant 0 : index
    %51 = vector.load %arg3[%c7, %c0_52, %c0_53] : memref<9x256x512xbf16, #tpu.memory_space<vmem>>, vector<1x256x512xbf16>
    %52 = vector.shape_cast %51 : vector<1x256x512xbf16> to vector<256x512xbf16>
    %cst_54 = arith.constant dense<0.000000e+00> : vector<256x512xf32>
    %53 = tpu.matmul %50, %52, %cst_54 {dimension_numbers = #tpu.dot_dimension_numbers<[1], [0], [0], [1], [0, 0, 1, 1], [], []>} : vector<256x256xbf16>, vector<256x512xbf16>, vector<256x512xf32> -> vector<256x512xf32>
    %54 = arith.addf %47, %53 : vector<256x512xf32>
    %c0_55 = arith.constant 0 : index
    %c4_56 = arith.constant 4 : index
    %c1_57 = arith.constant 1 : index
    %c0_58 = arith.constant 0 : index
    %55 = vector.load %arg2[%c0_55, %c4_56, %c1_57, %c0_58] : memref<16x6x17x256xbf16, #tpu.memory_space<vmem>>, vector<16x1x16x256xbf16>
    %56 = vector.shape_cast %55 : vector<16x1x16x256xbf16> to vector<16x16x256xbf16>
    %57 = vector.shape_cast %56 : vector<16x16x256xbf16> to vector<256x256xbf16>
    %c8 = arith.constant 8 : index
    %c0_59 = arith.constant 0 : index
    %c0_60 = arith.constant 0 : index
    %58 = vector.load %arg3[%c8, %c0_59, %c0_60] : memref<9x256x512xbf16, #tpu.memory_space<vmem>>, vector<1x256x512xbf16>
    %59 = vector.shape_cast %58 : vector<1x256x512xbf16> to vector<256x512xbf16>
    %cst_61 = arith.constant dense<0.000000e+00> : vector<256x512xf32>
    %60 = tpu.matmul %57, %59, %cst_61 {dimension_numbers = #tpu.dot_dimension_numbers<[1], [0], [0], [1], [0, 0, 1, 1], [], []>} : vector<256x256xbf16>, vector<256x512xbf16>, vector<256x512xf32> -> vector<256x512xf32>
    %61 = arith.addf %54, %60 : vector<256x512xf32>
    %c0_62 = arith.constant 0 : index
    %c0_63 = arith.constant 0 : index
    %62 = vector.load %arg4[%c0_62, %c0_63] : memref<1x512xf32, #tpu.memory_space<vmem>>, vector<1x512xf32>
    %63 = vector.broadcast %62 : vector<1x512xf32> to vector<256x512xf32>
    %64 = arith.mulf %61, %63 : vector<256x512xf32>
    %c0_64 = arith.constant 0 : index
    %c0_65 = arith.constant 0 : index
    %65 = vector.load %arg5[%c0_64, %c0_65] : memref<1x512xf32, #tpu.memory_space<vmem>>, vector<1x512xf32>
    %66 = vector.broadcast %65 : vector<1x512xf32> to vector<256x512xf32>
    %67 = arith.addf %64, %66 : vector<256x512xf32>
    %68 = vector.shape_cast %67 : vector<256x512xf32> to vector<16x16x512xf32>
    %69 = arith.truncf %68 : vector<16x16x512xf32> to vector<16x16x512xbf16>
    %c0_66 = arith.constant 0 : index
    %c0_67 = arith.constant 0 : index
    %c0_68 = arith.constant 0 : index
    %70 = vector.load %arg6[%c0_66, %c0_67, %c0_68] : memref<16x16x512xbf16, #tpu.memory_space<vmem>>, vector<16x16x512xbf16>
    tpu.vector_store %arg6[%c0_66, %c0_67, %c0_68], %69 {strides = array<i32>} : memref<16x16x512xbf16, #tpu.memory_space<vmem>>, vector<16x16x512xbf16>,
    return
  }
  func.func @transform_0(%arg0: i32, %arg1: i32) -> (i32, i32, i32, i32) {
    %c0_i32 = arith.constant 0 : i32
    %c0_i32_0 = arith.constant 0 : i32
    %c0_i32_1 = arith.constant 0 : i32
    %c0_i32_2 = arith.constant 0 : i32
    return %arg1, %c0_i32, %c0_i32_0, %c0_i32_1 : i32, i32, i32, i32
  }
  func.func @transform_1(%arg0: i32, %arg1: i32) -> (i32, i32, i32) {
    %c0_i32 = arith.constant 0 : i32
    %c0_i32_0 = arith.constant 0 : i32
    %c0_i32_1 = arith.constant 0 : i32
    return %c0_i32, %c0_i32_0, %arg0 : i32, i32, i32
  }
  func.func @transform_2(%arg0: i32, %arg1: i32) -> (i32, i32) {
    %c0_i32 = arith.constant 0 : i32
    %c0_i32_0 = arith.constant 0 : i32
    return %c0_i32, %arg0 : i32, i32
  }
  func.func @transform_3(%arg0: i32, %arg1: i32) -> (i32, i32) {
    %c0_i32 = arith.constant 0 : i32
    %c0_i32_0 = arith.constant 0 : i32
    return %c0_i32, %arg0 : i32, i32
  }
  func.func @transform_4(%arg0: i32, %arg1: i32) -> (i32, i32, i32) {
    %c0_i32 = arith.constant 0 : i32
    %c0_i32_0 = arith.constant 0 : i32
    return %arg1, %c0_i32, %arg0 : i32, i32, i32
  }
}

module attributes {stable_mosaic.version = 11 : i64} {
  func.func @kernel(%arg0: i32, %arg1: i32, %arg2: memref<72x512xbf16, #tpu.memory_space<vmem>>, %arg3: memref<512x128xbf16, #tpu.memory_space<vmem>>, %arg4: memref<1x128xf32, #tpu.memory_space<vmem>>, %arg5: memref<1x128xf32, #tpu.memory_space<vmem>>, %arg6: memref<72x128xbf16, #tpu.memory_space<vmem>>) attributes {dimension_semantics = [#tpu.dimension_semantics<parallel>, #tpu.dimension_semantics<parallel>], iteration_bounds = array<i64: 1, 1>, scalar_prefetch = 0 : i64, scratch_operands = 0 : i64, tpu.core_type = #tpu.core_type<tc>, window_params = [{transform_indices = @transform_0, window_bounds = array<i64: 72, 512>}, {transform_indices = @transform_1, window_bounds = array<i64: 512, 128>}, {transform_indices = @transform_2, window_bounds = array<i64: 1, 128>}, {transform_indices = @transform_3, window_bounds = array<i64: 1, 128>}, {transform_indices = @transform_4, window_bounds = array<i64: 72, 128>}]} {
    %c0 = arith.constant 0 : index
    %c0_0 = arith.constant 0 : index
    %0 = vector.load %arg2[%c0, %c0_0] : memref<72x512xbf16, #tpu.memory_space<vmem>>, vector<72x512xbf16>
    %c0_1 = arith.constant 0 : index
    %c0_2 = arith.constant 0 : index
    %1 = vector.load %arg3[%c0_1, %c0_2] : memref<512x128xbf16, #tpu.memory_space<vmem>>, vector<512x128xbf16>
    %cst = arith.constant dense<0.000000e+00> : vector<72x128xf32>
    %2 = tpu.matmul %0, %1, %cst {dimension_numbers = #tpu.dot_dimension_numbers<[1], [0], [0], [1], [0, 0, 1, 1], [], []>} : vector<72x512xbf16>, vector<512x128xbf16>, vector<72x128xf32> -> vector<72x128xf32>
    %c0_3 = arith.constant 0 : index
    %c0_4 = arith.constant 0 : index
    %3 = vector.load %arg4[%c0_3, %c0_4] : memref<1x128xf32, #tpu.memory_space<vmem>>, vector<1x128xf32>
    %4 = vector.broadcast %3 : vector<1x128xf32> to vector<72x128xf32>
    %5 = arith.mulf %2, %4 : vector<72x128xf32>
    %c0_5 = arith.constant 0 : index
    %c0_6 = arith.constant 0 : index
    %6 = vector.load %arg5[%c0_5, %c0_6] : memref<1x128xf32, #tpu.memory_space<vmem>>, vector<1x128xf32>
    %7 = vector.broadcast %6 : vector<1x128xf32> to vector<72x128xf32>
    %8 = arith.addf %5, %7 : vector<72x128xf32>
    %9 = arith.truncf %8 : vector<72x128xf32> to vector<72x128xbf16>
    %c0_7 = arith.constant 0 : index
    %c0_8 = arith.constant 0 : index
    %10 = vector.load %arg6[%c0_7, %c0_8] : memref<72x128xbf16, #tpu.memory_space<vmem>>, vector<72x128xbf16>
    tpu.vector_store %arg6[%c0_7, %c0_8], %9 {strides = array<i32>} : memref<72x128xbf16, #tpu.memory_space<vmem>>, vector<72x128xbf16>,
    return
  }
  func.func @transform_0(%arg0: i32, %arg1: i32) -> (i32, i32) {
    %c0_i32 = arith.constant 0 : i32
    %c0_i32_0 = arith.constant 0 : i32
    return %arg0, %c0_i32 : i32, i32
  }
  func.func @transform_1(%arg0: i32, %arg1: i32) -> (i32, i32) {
    %c0_i32 = arith.constant 0 : i32
    %c0_i32_0 = arith.constant 0 : i32
    return %c0_i32, %arg1 : i32, i32
  }
  func.func @transform_2(%arg0: i32, %arg1: i32) -> (i32, i32) {
    %c0_i32 = arith.constant 0 : i32
    %c0_i32_0 = arith.constant 0 : i32
    return %c0_i32, %arg1 : i32, i32
  }
  func.func @transform_3(%arg0: i32, %arg1: i32) -> (i32, i32) {
    %c0_i32 = arith.constant 0 : i32
    %c0_i32_0 = arith.constant 0 : i32
    return %c0_i32, %arg1 : i32, i32
  }
  func.func @transform_4(%arg0: i32, %arg1: i32) -> (i32, i32) {
    %c0_i32 = arith.constant 0 : i32
    return %arg0, %arg1 : i32, i32
  }
}

module attributes {stable_mosaic.version = 11 : i64} {
  func.func @kernel(%arg0: i32, %arg1: i32, %arg2: memref<72x128xbf16, #tpu.memory_space<vmem>>, %arg3: memref<128x256xbf16, #tpu.memory_space<vmem>>, %arg4: memref<1x256xf32, #tpu.memory_space<vmem>>, %arg5: memref<1x256xf32, #tpu.memory_space<vmem>>, %arg6: memref<72x256xbf16, #tpu.memory_space<vmem>>) attributes {dimension_semantics = [#tpu.dimension_semantics<parallel>, #tpu.dimension_semantics<parallel>], iteration_bounds = array<i64: 1, 1>, scalar_prefetch = 0 : i64, scratch_operands = 0 : i64, tpu.core_type = #tpu.core_type<tc>, window_params = [{transform_indices = @transform_0, window_bounds = array<i64: 72, 128>}, {transform_indices = @transform_1, window_bounds = array<i64: 128, 256>}, {transform_indices = @transform_2, window_bounds = array<i64: 1, 256>}, {transform_indices = @transform_3, window_bounds = array<i64: 1, 256>}, {transform_indices = @transform_4, window_bounds = array<i64: 72, 256>}]} {
    %c0 = arith.constant 0 : index
    %c0_0 = arith.constant 0 : index
    %0 = vector.load %arg2[%c0, %c0_0] : memref<72x128xbf16, #tpu.memory_space<vmem>>, vector<72x128xbf16>
    %c0_1 = arith.constant 0 : index
    %c0_2 = arith.constant 0 : index
    %1 = vector.load %arg3[%c0_1, %c0_2] : memref<128x256xbf16, #tpu.memory_space<vmem>>, vector<128x256xbf16>
    %cst = arith.constant dense<0.000000e+00> : vector<72x256xf32>
    %2 = tpu.matmul %0, %1, %cst {dimension_numbers = #tpu.dot_dimension_numbers<[1], [0], [0], [1], [0, 0, 1, 1], [], []>} : vector<72x128xbf16>, vector<128x256xbf16>, vector<72x256xf32> -> vector<72x256xf32>
    %c0_3 = arith.constant 0 : index
    %c0_4 = arith.constant 0 : index
    %3 = vector.load %arg4[%c0_3, %c0_4] : memref<1x256xf32, #tpu.memory_space<vmem>>, vector<1x256xf32>
    %4 = vector.broadcast %3 : vector<1x256xf32> to vector<72x256xf32>
    %5 = arith.mulf %2, %4 : vector<72x256xf32>
    %c0_5 = arith.constant 0 : index
    %c0_6 = arith.constant 0 : index
    %6 = vector.load %arg5[%c0_5, %c0_6] : memref<1x256xf32, #tpu.memory_space<vmem>>, vector<1x256xf32>
    %7 = vector.broadcast %6 : vector<1x256xf32> to vector<72x256xf32>
    %8 = arith.addf %5, %7 : vector<72x256xf32>
    %9 = arith.truncf %8 : vector<72x256xf32> to vector<72x256xbf16>
    %c0_7 = arith.constant 0 : index
    %c0_8 = arith.constant 0 : index
    %10 = vector.load %arg6[%c0_7, %c0_8] : memref<72x256xbf16, #tpu.memory_space<vmem>>, vector<72x256xbf16>
    tpu.vector_store %arg6[%c0_7, %c0_8], %9 {strides = array<i32>} : memref<72x256xbf16, #tpu.memory_space<vmem>>, vector<72x256xbf16>,
    return
  }
  func.func @transform_0(%arg0: i32, %arg1: i32) -> (i32, i32) {
    %c0_i32 = arith.constant 0 : i32
    %c0_i32_0 = arith.constant 0 : i32
    return %arg0, %c0_i32 : i32, i32
  }
  func.func @transform_1(%arg0: i32, %arg1: i32) -> (i32, i32) {
    %c0_i32 = arith.constant 0 : i32
    %c0_i32_0 = arith.constant 0 : i32
    return %c0_i32, %arg1 : i32, i32
  }
  func.func @transform_2(%arg0: i32, %arg1: i32) -> (i32, i32) {
    %c0_i32 = arith.constant 0 : i32
    %c0_i32_0 = arith.constant 0 : i32
    return %c0_i32, %arg1 : i32, i32
  }
  func.func @transform_3(%arg0: i32, %arg1: i32) -> (i32, i32) {
    %c0_i32 = arith.constant 0 : i32
    %c0_i32_0 = arith.constant 0 : i32
    return %c0_i32, %arg1 : i32, i32
  }
  func.func @transform_4(%arg0: i32, %arg1: i32) -> (i32, i32) {
    %c0_i32 = arith.constant 0 : i32
    return %arg0, %arg1 : i32, i32
  }
}

module attributes {stable_mosaic.version = 11 : i64} {
  func.func @kernel(%arg0: i32, %arg1: i32, %arg2: memref<224x256xbf16, #tpu.memory_space<vmem>>, %arg3: memref<256x256xbf16, #tpu.memory_space<vmem>>, %arg4: memref<1x256xf32, #tpu.memory_space<vmem>>, %arg5: memref<1x256xf32, #tpu.memory_space<vmem>>, %arg6: memref<224x256xbf16, #tpu.memory_space<vmem>>) attributes {dimension_semantics = [#tpu.dimension_semantics<parallel>, #tpu.dimension_semantics<parallel>], iteration_bounds = array<i64: 1, 1>, scalar_prefetch = 0 : i64, scratch_operands = 0 : i64, tpu.core_type = #tpu.core_type<tc>, window_params = [{transform_indices = @transform_0, window_bounds = array<i64: 224, 256>}, {transform_indices = @transform_1, window_bounds = array<i64: 256, 256>}, {transform_indices = @transform_2, window_bounds = array<i64: 1, 256>}, {transform_indices = @transform_3, window_bounds = array<i64: 1, 256>}, {transform_indices = @transform_4, window_bounds = array<i64: 224, 256>}]} {
    %c0 = arith.constant 0 : index
    %c0_0 = arith.constant 0 : index
    %0 = vector.load %arg2[%c0, %c0_0] : memref<224x256xbf16, #tpu.memory_space<vmem>>, vector<224x256xbf16>
    %c0_1 = arith.constant 0 : index
    %c0_2 = arith.constant 0 : index
    %1 = vector.load %arg3[%c0_1, %c0_2] : memref<256x256xbf16, #tpu.memory_space<vmem>>, vector<256x256xbf16>
    %cst = arith.constant dense<0.000000e+00> : vector<224x256xf32>
    %2 = tpu.matmul %0, %1, %cst {dimension_numbers = #tpu.dot_dimension_numbers<[1], [0], [0], [1], [0, 0, 1, 1], [], []>} : vector<224x256xbf16>, vector<256x256xbf16>, vector<224x256xf32> -> vector<224x256xf32>
    %c0_3 = arith.constant 0 : index
    %c0_4 = arith.constant 0 : index
    %3 = vector.load %arg4[%c0_3, %c0_4] : memref<1x256xf32, #tpu.memory_space<vmem>>, vector<1x256xf32>
    %4 = vector.broadcast %3 : vector<1x256xf32> to vector<224x256xf32>
    %5 = arith.mulf %2, %4 : vector<224x256xf32>
    %c0_5 = arith.constant 0 : index
    %c0_6 = arith.constant 0 : index
    %6 = vector.load %arg5[%c0_5, %c0_6] : memref<1x256xf32, #tpu.memory_space<vmem>>, vector<1x256xf32>
    %7 = vector.broadcast %6 : vector<1x256xf32> to vector<224x256xf32>
    %8 = arith.addf %5, %7 : vector<224x256xf32>
    %9 = arith.truncf %8 : vector<224x256xf32> to vector<224x256xbf16>
    %c0_7 = arith.constant 0 : index
    %c0_8 = arith.constant 0 : index
    %10 = vector.load %arg6[%c0_7, %c0_8] : memref<224x256xbf16, #tpu.memory_space<vmem>>, vector<224x256xbf16>
    tpu.vector_store %arg6[%c0_7, %c0_8], %9 {strides = array<i32>} : memref<224x256xbf16, #tpu.memory_space<vmem>>, vector<224x256xbf16>,
    return
  }
  func.func @transform_0(%arg0: i32, %arg1: i32) -> (i32, i32) {
    %c0_i32 = arith.constant 0 : i32
    %c0_i32_0 = arith.constant 0 : i32
    return %arg0, %c0_i32 : i32, i32
  }
  func.func @transform_1(%arg0: i32, %arg1: i32) -> (i32, i32) {
    %c0_i32 = arith.constant 0 : i32
    %c0_i32_0 = arith.constant 0 : i32
    return %c0_i32, %arg1 : i32, i32
  }
  func.func @transform_2(%arg0: i32, %arg1: i32) -> (i32, i32) {
    %c0_i32 = arith.constant 0 : i32
    %c0_i32_0 = arith.constant 0 : i32
    return %c0_i32, %arg1 : i32, i32
  }
  func.func @transform_3(%arg0: i32, %arg1: i32) -> (i32, i32) {
    %c0_i32 = arith.constant 0 : i32
    %c0_i32_0 = arith.constant 0 : i32
    return %c0_i32, %arg1 : i32, i32
  }
  func.func @transform_4(%arg0: i32, %arg1: i32) -> (i32, i32) {
    %c0_i32 = arith.constant 0 : i32
    return %arg0, %arg1 : i32, i32
  }
}

module attributes {stable_mosaic.version = 11 : i64} {
  func.func @kernel(%arg0: i32, %arg1: i32, %arg2: memref<960x128xbf16, #tpu.memory_space<vmem>>, %arg3: memref<128x256xbf16, #tpu.memory_space<vmem>>, %arg4: memref<1x256xf32, #tpu.memory_space<vmem>>, %arg5: memref<1x256xf32, #tpu.memory_space<vmem>>, %arg6: memref<960x256xbf16, #tpu.memory_space<vmem>>) attributes {dimension_semantics = [#tpu.dimension_semantics<parallel>, #tpu.dimension_semantics<parallel>], iteration_bounds = array<i64: 1, 1>, scalar_prefetch = 0 : i64, scratch_operands = 0 : i64, tpu.core_type = #tpu.core_type<tc>, window_params = [{transform_indices = @transform_0, window_bounds = array<i64: 960, 128>}, {transform_indices = @transform_1, window_bounds = array<i64: 128, 256>}, {transform_indices = @transform_2, window_bounds = array<i64: 1, 256>}, {transform_indices = @transform_3, window_bounds = array<i64: 1, 256>}, {transform_indices = @transform_4, window_bounds = array<i64: 960, 256>}]} {
    %c0 = arith.constant 0 : index
    %c0_0 = arith.constant 0 : index
    %0 = vector.load %arg2[%c0, %c0_0] : memref<960x128xbf16, #tpu.memory_space<vmem>>, vector<960x128xbf16>
    %c0_1 = arith.constant 0 : index
    %c0_2 = arith.constant 0 : index
    %1 = vector.load %arg3[%c0_1, %c0_2] : memref<128x256xbf16, #tpu.memory_space<vmem>>, vector<128x256xbf16>
    %cst = arith.constant dense<0.000000e+00> : vector<960x256xf32>
    %2 = tpu.matmul %0, %1, %cst {dimension_numbers = #tpu.dot_dimension_numbers<[1], [0], [0], [1], [0, 0, 1, 1], [], []>} : vector<960x128xbf16>, vector<128x256xbf16>, vector<960x256xf32> -> vector<960x256xf32>
    %c0_3 = arith.constant 0 : index
    %c0_4 = arith.constant 0 : index
    %3 = vector.load %arg4[%c0_3, %c0_4] : memref<1x256xf32, #tpu.memory_space<vmem>>, vector<1x256xf32>
    %4 = vector.broadcast %3 : vector<1x256xf32> to vector<960x256xf32>
    %5 = arith.mulf %2, %4 : vector<960x256xf32>
    %c0_5 = arith.constant 0 : index
    %c0_6 = arith.constant 0 : index
    %6 = vector.load %arg5[%c0_5, %c0_6] : memref<1x256xf32, #tpu.memory_space<vmem>>, vector<1x256xf32>
    %7 = vector.broadcast %6 : vector<1x256xf32> to vector<960x256xf32>
    %8 = arith.addf %5, %7 : vector<960x256xf32>
    %9 = arith.truncf %8 : vector<960x256xf32> to vector<960x256xbf16>
    %c0_7 = arith.constant 0 : index
    %c0_8 = arith.constant 0 : index
    %10 = vector.load %arg6[%c0_7, %c0_8] : memref<960x256xbf16, #tpu.memory_space<vmem>>, vector<960x256xbf16>
    tpu.vector_store %arg6[%c0_7, %c0_8], %9 {strides = array<i32>} : memref<960x256xbf16, #tpu.memory_space<vmem>>, vector<960x256xbf16>,
    return
  }
  func.func @transform_0(%arg0: i32, %arg1: i32) -> (i32, i32) {
    %c0_i32 = arith.constant 0 : i32
    %c0_i32_0 = arith.constant 0 : i32
    return %arg0, %c0_i32 : i32, i32
  }
  func.func @transform_1(%arg0: i32, %arg1: i32) -> (i32, i32) {
    %c0_i32 = arith.constant 0 : i32
    %c0_i32_0 = arith.constant 0 : i32
    return %c0_i32, %arg1 : i32, i32
  }
  func.func @transform_2(%arg0: i32, %arg1: i32) -> (i32, i32) {
    %c0_i32 = arith.constant 0 : i32
    %c0_i32_0 = arith.constant 0 : i32
    return %c0_i32, %arg1 : i32, i32
  }
  func.func @transform_3(%arg0: i32, %arg1: i32) -> (i32, i32) {
    %c0_i32 = arith.constant 0 : i32
    %c0_i32_0 = arith.constant 0 : i32
    return %c0_i32, %arg1 : i32, i32
  }
  func.func @transform_4(%arg0: i32, %arg1: i32) -> (i32, i32) {
    %c0_i32 = arith.constant 0 : i32
    return %arg0, %arg1 : i32, i32
  }
}

module attributes {stable_mosaic.version = 11 : i64} {
  func.func @kernel(%arg0: i32, %arg1: i32, %arg2: i32, %arg3: memref<1x1x130x256xbf16, #tpu.memory_space<vmem>>, %arg4: memref<1x1x130x256xbf16, #tpu.memory_space<vmem>>, %arg5: memref<1x3x256x256xbf16, #tpu.memory_space<vmem>>, %arg6: memref<1x3x256x256xbf16, #tpu.memory_space<vmem>>, %arg7: memref<1x256xf32, #tpu.memory_space<vmem>>, %arg8: memref<1x1x256xf32, #tpu.memory_space<vmem>>, %arg9: memref<1x256xf32, #tpu.memory_space<vmem>>) attributes {dimension_semantics = [#tpu.dimension_semantics<parallel>, #tpu.dimension_semantics<arbitrary>, #tpu.dimension_semantics<arbitrary>], iteration_bounds = array<i64: 4, 3, 16>, scalar_prefetch = 0 : i64, scratch_operands = 1 : i64, tpu.core_type = #tpu.core_type<tc>, window_params = [{transform_indices = @transform_0, window_bounds = array<i64: 1, 1, 130, 256>}, {transform_indices = @transform_1, window_bounds = array<i64: 1, 1, 130, 256>}, {transform_indices = @transform_2, window_bounds = array<i64: 1, 3, 256, 256>}, {transform_indices = @transform_3, window_bounds = array<i64: 1, 3, 256, 256>}, {pipeline_mode = #tpu.pipeline_mode<synchronous>, transform_indices = @transform_4, window_bounds = array<i64: 1, 256>}, {transform_indices = @transform_5, window_bounds = array<i64: 1, 1, 256>}]} {
    %c0 = arith.constant 0 : index
    %c0_0 = arith.constant 0 : index
    %c0_1 = arith.constant 0 : index
    %c0_2 = arith.constant 0 : index
    %0 = vector.load %arg3[%c0, %c0_0, %c0_1, %c0_2] : memref<1x1x130x256xbf16, #tpu.memory_space<vmem>>, vector<1x1x128x256xbf16>
    %1 = vector.shape_cast %0 : vector<1x1x128x256xbf16> to vector<128x256xbf16>
    %c0_3 = arith.constant 0 : index
    %c0_4 = arith.constant 0 : index
    %c0_5 = arith.constant 0 : index
    %c0_6 = arith.constant 0 : index
    %2 = vector.load %arg4[%c0_3, %c0_4, %c0_5, %c0_6] : memref<1x1x130x256xbf16, #tpu.memory_space<vmem>>, vector<1x1x128x256xbf16>
    %3 = vector.shape_cast %2 : vector<1x1x128x256xbf16> to vector<128x256xbf16>
    %c0_7 = arith.constant 0 : index
    %c0_8 = arith.constant 0 : index
    %c0_9 = arith.constant 0 : index
    %c0_10 = arith.constant 0 : index
    %4 = vector.load %arg5[%c0_7, %c0_8, %c0_9, %c0_10] : memref<1x3x256x256xbf16, #tpu.memory_space<vmem>>, vector<1x1x256x256xbf16>
    %5 = vector.shape_cast %4 : vector<1x1x256x256xbf16> to vector<256x256xbf16>
    %cst = arith.constant dense<0.000000e+00> : vector<128x256xf32>
    %6 = tpu.matmul %1, %5, %cst {dimension_numbers = #tpu.dot_dimension_numbers<[1], [0], [0], [1], [0, 0, 1, 1], [], []>} : vector<128x256xbf16>, vector<256x256xbf16>, vector<128x256xf32> -> vector<128x256xf32>
    %c0_11 = arith.constant 0 : index
    %c0_12 = arith.constant 0 : index
    %c0_13 = arith.constant 0 : index
    %c0_14 = arith.constant 0 : index
    %7 = vector.load %arg6[%c0_11, %c0_12, %c0_13, %c0_14] : memref<1x3x256x256xbf16, #tpu.memory_space<vmem>>, vector<1x1x256x256xbf16>
    %8 = vector.shape_cast %7 : vector<1x1x256x256xbf16> to vector<256x256xbf16>
    %cst_15 = arith.constant dense<0.000000e+00> : vector<128x256xf32>
    %9 = tpu.matmul %3, %8, %cst_15 {dimension_numbers = #tpu.dot_dimension_numbers<[1], [0], [0], [1], [0, 0, 1, 1], [], []>} : vector<128x256xbf16>, vector<256x256xbf16>, vector<128x256xf32> -> vector<128x256xf32>
    %10 = arith.addf %6, %9 : vector<128x256xf32>
    %c0_16 = arith.constant 0 : index
    %c0_17 = arith.constant 0 : index
    %c1 = arith.constant 1 : index
    %c0_18 = arith.constant 0 : index
    %11 = vector.load %arg3[%c0_16, %c0_17, %c1, %c0_18] : memref<1x1x130x256xbf16, #tpu.memory_space<vmem>>, vector<1x1x128x256xbf16>
    %12 = vector.shape_cast %11 : vector<1x1x128x256xbf16> to vector<128x256xbf16>
    %c0_19 = arith.constant 0 : index
    %c0_20 = arith.constant 0 : index
    %c1_21 = arith.constant 1 : index
    %c0_22 = arith.constant 0 : index
    %13 = vector.load %arg4[%c0_19, %c0_20, %c1_21, %c0_22] : memref<1x1x130x256xbf16, #tpu.memory_space<vmem>>, vector<1x1x128x256xbf16>
    %14 = vector.shape_cast %13 : vector<1x1x128x256xbf16> to vector<128x256xbf16>
    %c0_23 = arith.constant 0 : index
    %c1_24 = arith.constant 1 : index
    %c0_25 = arith.constant 0 : index
    %c0_26 = arith.constant 0 : index
    %15 = vector.load %arg5[%c0_23, %c1_24, %c0_25, %c0_26] : memref<1x3x256x256xbf16, #tpu.memory_space<vmem>>, vector<1x1x256x256xbf16>
    %16 = vector.shape_cast %15 : vector<1x1x256x256xbf16> to vector<256x256xbf16>
    %cst_27 = arith.constant dense<0.000000e+00> : vector<128x256xf32>
    %17 = tpu.matmul %12, %16, %cst_27 {dimension_numbers = #tpu.dot_dimension_numbers<[1], [0], [0], [1], [0, 0, 1, 1], [], []>} : vector<128x256xbf16>, vector<256x256xbf16>, vector<128x256xf32> -> vector<128x256xf32>
    %c0_28 = arith.constant 0 : index
    %c1_29 = arith.constant 1 : index
    %c0_30 = arith.constant 0 : index
    %c0_31 = arith.constant 0 : index
    %18 = vector.load %arg6[%c0_28, %c1_29, %c0_30, %c0_31] : memref<1x3x256x256xbf16, #tpu.memory_space<vmem>>, vector<1x1x256x256xbf16>
    %19 = vector.shape_cast %18 : vector<1x1x256x256xbf16> to vector<256x256xbf16>
    %cst_32 = arith.constant dense<0.000000e+00> : vector<128x256xf32>
    %20 = tpu.matmul %14, %19, %cst_32 {dimension_numbers = #tpu.dot_dimension_numbers<[1], [0], [0], [1], [0, 0, 1, 1], [], []>} : vector<128x256xbf16>, vector<256x256xbf16>, vector<128x256xf32> -> vector<128x256xf32>
    %21 = arith.addf %17, %20 : vector<128x256xf32>
    %22 = arith.addf %10, %21 : vector<128x256xf32>
    %c0_33 = arith.constant 0 : index
    %c0_34 = arith.constant 0 : index
    %c2 = arith.constant 2 : index
    %c0_35 = arith.constant 0 : index
    %23 = vector.load %arg3[%c0_33, %c0_34, %c2, %c0_35] : memref<1x1x130x256xbf16, #tpu.memory_space<vmem>>, vector<1x1x128x256xbf16>
    %24 = vector.shape_cast %23 : vector<1x1x128x256xbf16> to vector<128x256xbf16>
    %c0_36 = arith.constant 0 : index
    %c0_37 = arith.constant 0 : index
    %c2_38 = arith.constant 2 : index
    %c0_39 = arith.constant 0 : index
    %25 = vector.load %arg4[%c0_36, %c0_37, %c2_38, %c0_39] : memref<1x1x130x256xbf16, #tpu.memory_space<vmem>>, vector<1x1x128x256xbf16>
    %26 = vector.shape_cast %25 : vector<1x1x128x256xbf16> to vector<128x256xbf16>
    %c0_40 = arith.constant 0 : index
    %c2_41 = arith.constant 2 : index
    %c0_42 = arith.constant 0 : index
    %c0_43 = arith.constant 0 : index
    %27 = vector.load %arg5[%c0_40, %c2_41, %c0_42, %c0_43] : memref<1x3x256x256xbf16, #tpu.memory_space<vmem>>, vector<1x1x256x256xbf16>
    %28 = vector.shape_cast %27 : vector<1x1x256x256xbf16> to vector<256x256xbf16>
    %cst_44 = arith.constant dense<0.000000e+00> : vector<128x256xf32>
    %29 = tpu.matmul %24, %28, %cst_44 {dimension_numbers = #tpu.dot_dimension_numbers<[1], [0], [0], [1], [0, 0, 1, 1], [], []>} : vector<128x256xbf16>, vector<256x256xbf16>, vector<128x256xf32> -> vector<128x256xf32>
    %c0_45 = arith.constant 0 : index
    %c2_46 = arith.constant 2 : index
    %c0_47 = arith.constant 0 : index
    %c0_48 = arith.constant 0 : index
    %30 = vector.load %arg6[%c0_45, %c2_46, %c0_47, %c0_48] : memref<1x3x256x256xbf16, #tpu.memory_space<vmem>>, vector<1x1x256x256xbf16>
    %31 = vector.shape_cast %30 : vector<1x1x256x256xbf16> to vector<256x256xbf16>
    %cst_49 = arith.constant dense<0.000000e+00> : vector<128x256xf32>
    %32 = tpu.matmul %26, %31, %cst_49 {dimension_numbers = #tpu.dot_dimension_numbers<[1], [0], [0], [1], [0, 0, 1, 1], [], []>} : vector<128x256xbf16>, vector<256x256xbf16>, vector<128x256xf32> -> vector<128x256xf32>
    %33 = arith.addf %29, %32 : vector<128x256xf32>
    %34 = arith.addf %22, %33 : vector<128x256xf32>
    %35 = tpu.iota {dimensions = array<i32: 0>} : vector<128x1xi32>
    %c128_i32 = arith.constant 128 : i32
    %36 = vector.broadcast %c128_i32 : i32 to vector<128x1xi32>
    %37 = arith.cmpi slt, %35, %36 : vector<128x1xi32>
    %cst_50 = arith.constant 0.000000e+00 : f32
    %38 = vector.shape_cast %37 : vector<128x1xi1> to vector<128x1xi1>
    %39 = vector.broadcast %38 : vector<128x1xi1> to vector<128x256xi1>
    %40 = vector.broadcast %cst_50 : f32 to vector<128x256xf32>
    %41 = arith.select %39, %34, %40 : vector<128x256xi1>, vector<128x256xf32>
    %c0_i32 = arith.constant 0 : i32
    %42 = arith.cmpi eq, %arg1, %c0_i32 : i32
    %c0_i32_51 = arith.constant 0 : i32
    %43 = arith.cmpi eq, %arg2, %c0_i32_51 : i32
    %44 = arith.andi %42, %43 : i1
    %45 = arith.extui %44 : i1 to i32
    %c0_i32_52 = arith.constant 0 : i32
    %46 = arith.cmpi ne, %45, %c0_i32_52 : i32
    scf.if %46 {
      %cst_59 = arith.constant 0.000000e+00 : f32
      %57 = vector.broadcast %cst_59 : f32 to vector<1x256xf32>
      %c0_60 = arith.constant 0 : index
      %c0_61 = arith.constant 0 : index
      %58 = vector.load %arg9[%c0_60, %c0_61] : memref<1x256xf32, #tpu.memory_space<vmem>>, vector<1x256xf32>
      tpu.vector_store %arg9[%c0_60, %c0_61], %57 {strides = array<i32>} : memref<1x256xf32, #tpu.memory_space<vmem>>, vector<1x256xf32>,
    } else {
    }
    %c0_53 = arith.constant 0 : index
    %c0_54 = arith.constant 0 : index
    %47 = vector.load %arg9[%c0_53, %c0_54] : memref<1x256xf32, #tpu.memory_space<vmem>>, vector<1x256xf32>
    %cst_55 = arith.constant dense<0.000000e+00> : vector<256xf32>
    %48 = vector.multi_reduction <add>, %41, %cst_55 [0] : vector<128x256xf32> to vector<256xf32>
    %49 = vector.shape_cast %48 : vector<256xf32> to vector<1x256xf32>
    %50 = arith.addf %47, %49 : vector<1x256xf32>
    %c0_56 = arith.constant 0 : index
    %c0_57 = arith.constant 0 : index
    %51 = vector.load %arg9[%c0_56, %c0_57] : memref<1x256xf32, #tpu.memory_space<vmem>>, vector<1x256xf32>
    tpu.vector_store %arg9[%c0_56, %c0_57], %50 {strides = array<i32>} : memref<1x256xf32, #tpu.memory_space<vmem>>, vector<1x256xf32>,
    %c2_i32 = arith.constant 2 : i32
    %52 = arith.cmpi eq, %arg1, %c2_i32 : i32
    %c15_i32 = arith.constant 15 : i32
    %53 = arith.cmpi eq, %arg2, %c15_i32 : i32
    %54 = arith.andi %52, %53 : i1
    %55 = arith.extui %54 : i1 to i32
    %c0_i32_58 = arith.constant 0 : i32
    %56 = arith.cmpi ne, %55, %c0_i32_58 : i32
    scf.if %56 {
      %c0_59 = arith.constant 0 : index
      %c0_60 = arith.constant 0 : index
      %57 = vector.load %arg9[%c0_59, %c0_60] : memref<1x256xf32, #tpu.memory_space<vmem>>, vector<1x256xf32>
      %cst_61 = arith.constant 4.8828125E-4 : f32
      %58 = vector.broadcast %cst_61 : f32 to vector<1x256xf32>
      %59 = arith.mulf %57, %58 : vector<1x256xf32>
      %c0_62 = arith.constant 0 : index
      %c0_63 = arith.constant 0 : index
      %60 = vector.load %arg7[%c0_62, %c0_63] : memref<1x256xf32, #tpu.memory_space<vmem>>, vector<1x256xf32>
      %61 = arith.addf %59, %60 : vector<1x256xf32>
      %c0_64 = arith.constant 0 : index
      %c0_65 = arith.constant 0 : index
      %c0_66 = arith.constant 0 : index
      %62 = vector.load %arg8[%c0_64, %c0_65, %c0_66] : memref<1x1x256xf32, #tpu.memory_space<vmem>>, vector<1x1x256xf32>
      %63 = vector.shape_cast %62 : vector<1x1x256xf32> to vector<1x256xf32>
      %64 = vector.shape_cast %61 : vector<1x256xf32> to vector<1x1x256xf32>
      tpu.vector_store %arg8[%c0_64, %c0_65, %c0_66], %64 {strides = array<i32>} : memref<1x1x256xf32, #tpu.memory_space<vmem>>, vector<1x1x256xf32>,
    } else {
    }
    return
  }
  func.func @transform_0(%arg0: i32, %arg1: i32, %arg2: i32) -> (i32, i32, i32, i32) {
    %0 = arith.addi %arg2, %arg1 : i32
    %c0_i32 = arith.constant 0 : i32
    %c0_i32_0 = arith.constant 0 : i32
    %c0_i32_1 = arith.constant 0 : i32
    return %arg0, %0, %c0_i32, %c0_i32_0 : i32, i32, i32, i32
  }
  func.func @transform_1(%arg0: i32, %arg1: i32, %arg2: i32) -> (i32, i32, i32, i32) {
    %0 = arith.addi %arg2, %arg1 : i32
    %c0_i32 = arith.constant 0 : i32
    %c0_i32_0 = arith.constant 0 : i32
    %c0_i32_1 = arith.constant 0 : i32
    return %arg0, %0, %c0_i32, %c0_i32_0 : i32, i32, i32, i32
  }
  func.func @transform_2(%arg0: i32, %arg1: i32, %arg2: i32) -> (i32, i32, i32, i32) {
    %c0_i32 = arith.constant 0 : i32
    %c0_i32_0 = arith.constant 0 : i32
    %c0_i32_1 = arith.constant 0 : i32
    %c0_i32_2 = arith.constant 0 : i32
    return %arg1, %c0_i32, %c0_i32_0, %c0_i32_1 : i32, i32, i32, i32
  }
  func.func @transform_3(%arg0: i32, %arg1: i32, %arg2: i32) -> (i32, i32, i32, i32) {
    %c0_i32 = arith.constant 0 : i32
    %c0_i32_0 = arith.constant 0 : i32
    %c0_i32_1 = arith.constant 0 : i32
    %c0_i32_2 = arith.constant 0 : i32
    return %arg1, %c0_i32, %c0_i32_0, %c0_i32_1 : i32, i32, i32, i32
  }
  func.func @transform_4(%arg0: i32, %arg1: i32, %arg2: i32) -> (i32, i32) {
    %c0_i32 = arith.constant 0 : i32
    %c0_i32_0 = arith.constant 0 : i32
    %c0_i32_1 = arith.constant 0 : i32
    return %c0_i32, %c0_i32_0 : i32, i32
  }
  func.func @transform_5(%arg0: i32, %arg1: i32, %arg2: i32) -> (i32, i32, i32) {
    %c0_i32 = arith.constant 0 : i32
    %c0_i32_0 = arith.constant 0 : i32
    %c0_i32_1 = arith.constant 0 : i32
    return %arg0, %c0_i32, %c0_i32_0 : i32, i32, i32
  }
}

</mosaic_0001>

<bundles_post_ra>
// kernel: custom-call.50
= control target key start
LH: loop header
LB: loop body
LE: loop exit
PB: predicated region body
PF: predicated region fallthrough
CT: control target
= control target key end

     0   :  { %s6_s0 = inlined_call_operand.vmem [shape: bf16[2,2,2,256], index: 0, kind: output, shape index: {}]  }

// kernel: custom-call.8
= control target key start
LH: loop header
LB: loop body
LE: loop exit
PB: predicated region body
PF: predicated region fallthrough
CT: control target
= control target key end

     0   :  { %s6_s0 = inlined_call_operand.vmem [shape: bf16[2,2,256], index: 0, kind: output, shape index: {}]  }

// kernel: custom-call.9
= control target key start
LH: loop header
LB: loop body
LE: loop exit
PB: predicated region body
PF: predicated region fallthrough
CT: control target
= control target key end

     0   :  { %s6_s0 = inlined_call_operand.vmem [shape: f32[2,2,256], index: 0, kind: output, shape index: {}]  }

</bundles_post_ra>
